<compile_context>
chip_gen: v7x
topology: tpu7x:2x2x1
jax: 0.10.0
libtpu: 0.0.40
codegen_flags: <defaults>
</compile_context>

<pallas_src>
import math

import jax
import jax.numpy as jnp
from jax.experimental import pallas as pl
from jax.experimental.pallas import tpu as pltpu

OM_W = 32                       # offset/mask conv width: 27 real channels, pad to 32
_VMEM_LIMIT = 32 * 1024 * 1024  # scoped VMEM limit (safe on v5e/v6e/v7x)
_BLOCK_BUDGET = 3 << 20         # ~3 MiB of VMEM per row block (before double-buffering)


# ----------------------------------------------------------------------------
# Tiling heuristics
# ----------------------------------------------------------------------------
def _num_cores():
    """Best-effort TensorCore count (v7x has 2 per chip); safe fallback = 2."""
    try:
        info = pltpu.get_tpu_info()
        for attr in ("num_cores", "core_count", "num_tensorcores"):
            v = getattr(info, attr, None)
            if isinstance(v, int) and v > 0:
                return v
    except Exception:
        pass
    return 2


def _choose_grid(M, K, Cout, has_residual):
    """Row-tile size & grid length from a VMEM budget + core count."""
    # Per-row VMEM bytes per buffer: cols (bf16) + out (f32) (+ residual f32).
    row_bytes = K * 2 + Cout * 4 * (1 + int(has_residual))
    tm_cap = max(16, min(2048, (_BLOCK_BUDGET // max(row_bytes, 1)) // 16 * 16))
    nblk = max(1, pl.cdiv(M, tm_cap))
    ncores = _num_cores()
    if M >= 4096:
        nblk = max(nblk, 8)            # long grid -> cols DMA pipelines vs. MXU
    elif M >= 256 * ncores:
        nblk = max(nblk, ncores)       # feed every TensorCore (v7x megacore)
    tm = ((pl.cdiv(M, nblk) + 15) // 16) * 16   # bf16 sublane tile = 16
    return tm, pl.cdiv(M, tm)


def _cols_spec(tm, K, nblk):
    idx = lambda i: (i, 0)
    if nblk >= 4:
        try:   # deeper buffering only on the streaming operand
            return pl.BlockSpec((tm, K), idx, pipeline_mode=pl.Buffered(3))
        except Exception:
            pass
    return pl.BlockSpec((tm, K), idx)


# ----------------------------------------------------------------------------
# Pallas fused matmul + shift (+sigmoid lanes) (+ReLU) (+residual) kernel
# ----------------------------------------------------------------------------
def _make_fused_kernel(apply_relu: bool, has_residual: bool, sigmoid_from):
    def kernel(*refs):
        if has_residual:
            cols_ref, w_ref, shift_ref, res_ref, out_ref = refs
        else:
            cols_ref, w_ref, shift_ref, out_ref = refs
        # bf16 x bf16 on the MXU, f32 accumulation.
        y = jnp.dot(cols_ref[...], w_ref[...], preferred_element_type=jnp.float32)
        y = y + shift_ref[...]
        if sigmoid_from is not None:
            lane = jax.lax.broadcasted_iota(jnp.int32, y.shape, 1)
            y = jnp.where(lane >= sigmoid_from, jax.nn.sigmoid(y), y)
        if apply_relu:
            y = jnp.maximum(y, 0.0)
        if has_residual:
            y = y + res_ref[...]        # residual added AFTER ReLU (matches reference)
        out_ref[...] = y.astype(out_ref.dtype)
    return kernel


def fused_matmul(cols, w, shift, residual=None, apply_relu=False, sigmoid_from=None):
    """out[M, Cout] = act(cols[M, K] @ w[K, Cout] + shift) (+ residual).

    cols / w hit the MXU in bf16; accumulation, shift, activations, residual and
    the stored output stay f32.  BN scale / conv bias are pre-folded into w/shift.
    """
    M, K = cols.shape
    K2, Cout = w.shape
    assert K == K2
    cols = cols.astype(jnp.bfloat16)
    w = w.astype(jnp.bfloat16)
    shift = shift.reshape(1, Cout).astype(jnp.float32)

    tm, nblk = _choose_grid(M, K, Cout, residual is not None)
    Mp = tm * nblk
    if Mp != M:
        cols = jnp.pad(cols, ((0, Mp - M), (0, 0)))
        if residual is not None:
            residual = jnp.pad(residual, ((0, Mp - M), (0, 0)))

    in_specs = [
        _cols_spec(tm, K, nblk),
        pl.BlockSpec((K, Cout), lambda i: (0, 0)),
        pl.BlockSpec((1, Cout), lambda i: (0, 0)),
    ]
    args = [cols, w, shift]
    if residual is not None:
        in_specs.append(pl.BlockSpec((tm, Cout), lambda i: (i, 0)))
        args.append(residual.astype(jnp.float32))

    out = pl.pallas_call(
        _make_fused_kernel(apply_relu, residual is not None, sigmoid_from),
        out_shape=jax.ShapeDtypeStruct((Mp, Cout), jnp.float32),
        grid=(nblk,),
        in_specs=in_specs,
        out_specs=pl.BlockSpec((tm, Cout), lambda i: (i, 0)),
        compiler_params=pltpu.CompilerParams(
            dimension_semantics=("parallel",),
            vmem_limit_bytes=_VMEM_LIMIT),
    )(*args)
    return out if Mp == M else out[:M]


# ----------------------------------------------------------------------------
# Glue: im2col (NHWC), nearest 2x upsample, batched deformable sampling
# ----------------------------------------------------------------------------
def im2col_3x3(x):
    """x: [N, H, W, C] -> cols [N*H*W, 9*C] (K index = (ki*3+kj)*C + c)."""
    N, H, W, C = x.shape
    xp = jnp.pad(x, ((0, 0), (1, 1), (1, 1), (0, 0)))
    taps = [xp[:, ki:ki + H, kj:kj + W, :] for ki in range(3) for kj in range(3)]
    cols = jnp.stack(taps, axis=3)                    # [N, H, W, 9, C]
    return cols.reshape(N * H * W, 9 * C)


def upsample2x(x):
    """Nearest-neighbor 2x upsample, NHWC (broadcast+reshape, one copy)."""
    N, H, W, C = x.shape
    y = jnp.broadcast_to(x[:, :, None, :, None, :], (N, H, 2, W, 2, C))
    return y.reshape(N, 2 * H, 2 * W, C)


def deform_sample_cols(x, om):
    """Modulated deformable (DCNv2) sampling.

    x:  [N, H, W, C] NHWC feature map.
    om: [N, H, W, OM_W] offset/mask conv output; lanes [0:18] interleaved (dy,dx)
        per tap, lanes [18:27] mask (sigmoid already applied in the Pallas epilogue).
    Returns columns [N*H*W, 9*C] (tap-major K layout).
    """
    N, H, W, C = x.shape
    dy = om[..., 0:18:2]                              # [N,H,W,9]
    dx = om[..., 1:18:2]
    mask = om[..., 18:27]

    ki = jnp.arange(9, dtype=jnp.float32) // 3
    kj = jnp.arange(9, dtype=jnp.float32) % 3
    hh = jnp.arange(H, dtype=jnp.float32).reshape(1, H, 1, 1)
    ww = jnp.arange(W, dtype=jnp.float32).reshape(1, 1, W, 1)
    y = hh - 1.0 + ki + dy                            # [N,H,W,9]
    xq = ww - 1.0 + kj + dx

    y0 = jnp.floor(y)
    x0 = jnp.floor(xq)
    ly = y - y0
    lx = xq - x0

    ys = jnp.stack([y0, y0, y0 + 1.0, y0 + 1.0], axis=-1)      # [N,H,W,9,4]
    xs = jnp.stack([x0, x0 + 1.0, x0, x0 + 1.0], axis=-1)
    wy = jnp.stack([1.0 - ly, 1.0 - ly, ly, ly], axis=-1)
    wx = jnp.stack([1.0 - lx, lx, 1.0 - lx, lx], axis=-1)
    valid = ((ys >= 0) & (ys <= H - 1) &
             (xs >= 0) & (xs <= W - 1)).astype(jnp.float32)
    wgt = wy * wx * valid * mask[..., None]                    # [N,H,W,9,4]

    yi = jnp.clip(ys, 0, H - 1).astype(jnp.int32)
    xi = jnp.clip(xs, 0, W - 1).astype(jnp.int32)
    idx = (yi * W + xi).reshape(N, H * W * 36, 1)

    xf = x.reshape(N, H * W, C)
    # TODO(synk): move this bilinear gather into the Pallas kernel with x resident
    # in VMEM (and fuse it with the main matmul); blocked on robust in-kernel
    # gather lowering on Mosaic, so it stays a single batched XLA gather for now.
    g = jnp.take_along_axis(xf, idx, axis=1).reshape(N, H, W, 9, 4, C)
    cols = jnp.sum(g * wgt[..., None], axis=4)                 # [N,H,W,9,C]
    return cols.reshape(N * H * W, 9 * C)


# ----------------------------------------------------------------------------
# DeformConv (DCNv2 + BN(eval) + ReLU) and FeatureFusor forward (NHWC inside)
# ----------------------------------------------------------------------------
def deform_conv_bn_relu(x, p, residual=None):
    """DCN(3x3) -> BN -> ReLU (+ residual added afterwards). Returns [N,H,W,cho]."""
    N, H, W, Cin = x.shape
    M = N * H * W

    # Offset/mask branch: plain 3x3 conv; mask sigmoid fused in the Pallas epilogue.
    # TODO(synk): fuse im2col into the kernel (x row-band + halo resident in VMEM,
    # 9 accumulated K-slab matmuls) to avoid the 9x cols HBM roundtrip.
    cols = im2col_3x3(x)
    om = fused_matmul(cols, p["w_om"], p["b_om"], sigmoid_from=18)
    om = om.reshape(N, H, W, OM_W)            # consumed at stored width (no :27 copy)

    # Deformable sampling -> columns, then fused matmul + BN + ReLU (+residual).
    dcols = deform_sample_cols(x, om)
    res2d = None if residual is None else residual.reshape(M, residual.shape[-1])
    out = fused_matmul(dcols, p["w_main"], p["bn_shift"],
                       residual=res2d, apply_relu=True)
    return out.reshape(N, H, W, -1)


def feature_fusor_forward(params, p1, p2, p3):
    # NCHW (PyTorch layout) -> NHWC once at the boundary.
    p1 = jnp.transpose(p1, (0, 2, 3, 1))
    p2 = jnp.transpose(p2, (0, 2, 3, 1))
    p3 = jnp.transpose(p3, (0, 2, 3, 1))

    # TODO(synk): fold the nearest-2x residual expansion into the main-conv kernel
    # (spatially-tiled grid + in-kernel broadcast) instead of materializing it; the
    # residual is at least d-channel-narrow now so the traffic is 4x smaller than before.
    t3 = deform_conv_bn_relu(p3, params["p3_dc2"])
    x2 = deform_conv_bn_relu(p2, params["p2_dc1"], residual=upsample2x(t3))
    t2 = deform_conv_bn_relu(x2, params["p2_dc2"])
    x1 = deform_conv_bn_relu(p1, params["p1_dc1"], residual=upsample2x(t2))
    t1 = deform_conv_bn_relu(x1, params["p1_dc2"])

    if params["post_w"] is not None:
        # 1x1 convs commute with nearest upsample: run the composed chain at the
        # lower resolution (exact, 4x less work/traffic), then upsample.
        N, H1, W1, C = t1.shape
        t1 = fused_matmul(t1.reshape(N * H1 * W1, C),
                          params["post_w"], params["post_b"]).reshape(N, H1, W1, C)

    p0 = upsample2x(t1)
    return jnp.transpose(p0, (0, 3, 1, 2))    # back to NCHW


# ----------------------------------------------------------------------------
# Deterministic parameter initialization (synthetic, no checkpoint loading)
# ----------------------------------------------------------------------------
def init_deform_conv_params(key, chi, cho):
    ks = jax.random.split(key, 8)
    w_om = jax.random.normal(ks[0], (chi * 9, 27), jnp.float32) * 0.01
    b_om = jax.random.normal(ks[1], (27,), jnp.float32) * 0.01
    w4 = jax.random.normal(ks[2], (cho, chi, 3, 3), jnp.float32) / math.sqrt(chi * 9)
    # tap-major K layout: K index = (ki*3+kj)*chi + c
    w_main = w4.transpose(2, 3, 1, 0).reshape(chi * 9, cho)
    b_main = jax.random.normal(ks[3], (cho,), jnp.float32) * 0.05
    gamma = 1.0 + 0.1 * jax.random.normal(ks[4], (cho,), jnp.float32)
    beta = 0.1 * jax.random.normal(ks[5], (cho,), jnp.float32)
    mean = 0.1 * jax.random.normal(ks[6], (cho,), jnp.float32)
    var = 1.0 + 0.1 * jnp.abs(jax.random.normal(ks[7], (cho,), jnp.float32))
    bn_scale = gamma / jnp.sqrt(var + 1e-5)
    bn_shift = (b_main - mean) * bn_scale + beta
    w_main = w_main * bn_scale[None, :]          # fold BN scale into the conv weight
    return dict(
        w_om=jnp.pad(w_om, ((0, 0), (0, OM_W - 27))).astype(jnp.bfloat16),
        b_om=jnp.pad(b_om, (0, OM_W - 27)).reshape(1, OM_W),
        w_main=w_main.astype(jnp.bfloat16),
        bn_shift=bn_shift.reshape(1, cho),
    )


def init_feature_fusor_params(key, in_channels, width, reid_feat_dim,
                              post_conv_layers):
    c1, c2, c3 = [int(c * width) for c in in_channels]
    d = reid_feat_dim
    ks = jax.random.split(key, 5 + post_conv_layers)
    params = {
        "p3_dc2": init_deform_conv_params(ks[0], c3, d),
        "p2_dc1": init_deform_conv_params(ks[1], c2, d),
        "p1_dc1": init_deform_conv_params(ks[2], c1, d),
        "p2_dc2": init_deform_conv_params(ks[3], d, d),
        "p1_dc2": init_deform_conv_params(ks[4], d, d),
    }
    if post_conv_layers > 0:
        # Compose the 1x1 conv chain (no activation between them) exactly.
        w_total = jnp.eye(d, dtype=jnp.float32)
        b_total = jnp.zeros((d,), jnp.float32)
        for i in range(post_conv_layers):
            kw, kb = jax.random.split(ks[5 + i])
            w = jax.random.normal(kw, (d, d), jnp.float32) / math.sqrt(d)
            b = jax.random.normal(kb, (d,), jnp.float32) * 0.05
            w_total = w_total @ w
            b_total = b_total @ w + b
        params["post_w"] = w_total.astype(jnp.bfloat16)
        params["post_b"] = b_total.reshape(1, d)
    else:
        params["post_w"] = None
        params["post_b"] = None
    return params


# ----------------------------------------------------------------------------
if __name__ == "__main__":
    key = jax.random.PRNGKey(0)
    k_params, k1, k2, k3 = jax.random.split(key, 4)

    in_channels = [16, 32, 64]
    width = 1.0
    reid_feat_dim = 32
    post_conv_layers = 1

    N = 2
    p1 = jax.random.normal(k1, (N, in_channels[0], 16, 16), jnp.float32)
    p2 = jax.random.normal(k2, (N, in_channels[1], 8, 8), jnp.float32)
    p3 = jax.random.normal(k3, (N, in_channels[2], 4, 4), jnp.float32)

    params = init_feature_fusor_params(k_params, in_channels, width,
                                       reid_feat_dim, post_conv_layers)

    fwd = jax.jit(feature_fusor_forward)
    p0 = fwd(params, p1, p2, p3)
    jax.block_until_ready(p0)

    assert p0.shape == (N, reid_feat_dim, 32, 32), p0.shape
    assert bool(jnp.all(jnp.isfinite(p0)))
    print("KERNEL_OK")
</pallas_src>

<mosaic_0001>
module attributes {stable_mosaic.version = 11 : i64} {
  func.func @kernel(%arg0: i32, %arg1: memref<256x144xbf16, #tpu.memory_space<vmem>>, %arg2: memref<144x32xbf16, #tpu.memory_space<vmem>>, %arg3: memref<1x32xf32, #tpu.memory_space<vmem>>, %arg4: memref<256x32xf32, #tpu.memory_space<vmem>>) attributes {dimension_semantics = [#tpu.dimension_semantics<parallel>], iteration_bounds = array<i64: 2>, scalar_prefetch = 0 : i64, scratch_operands = 0 : i64, tpu.core_type = #tpu.core_type<tc>, window_params = [{transform_indices = @transform_0, window_bounds = array<i64: 256, 144>}, {pipeline_mode = #tpu.pipeline_mode<synchronous>, transform_indices = @transform_1, window_bounds = array<i64: 144, 32>}, {pipeline_mode = #tpu.pipeline_mode<synchronous>, transform_indices = @transform_2, window_bounds = array<i64: 1, 32>}, {transform_indices = @transform_3, window_bounds = array<i64: 256, 32>}]} {
    %c0 = arith.constant 0 : index
    %c0_0 = arith.constant 0 : index
    %0 = vector.load %arg1[%c0, %c0_0] : memref<256x144xbf16, #tpu.memory_space<vmem>>, vector<256x144xbf16>
    %c0_1 = arith.constant 0 : index
    %c0_2 = arith.constant 0 : index
    %1 = vector.load %arg2[%c0_1, %c0_2] : memref<144x32xbf16, #tpu.memory_space<vmem>>, vector<144x32xbf16>
    %cst = arith.constant dense<0.000000e+00> : vector<256x32xf32>
    %2 = tpu.matmul %0, %1, %cst {dimension_numbers = #tpu.dot_dimension_numbers<[1], [0], [0], [1], [0, 0, 1, 1], [], []>} : vector<256x144xbf16>, vector<144x32xbf16>, vector<256x32xf32> -> vector<256x32xf32>
    %c0_3 = arith.constant 0 : index
    %c0_4 = arith.constant 0 : index
    %3 = vector.load %arg3[%c0_3, %c0_4] : memref<1x32xf32, #tpu.memory_space<vmem>>, vector<1x32xf32>
    %4 = vector.broadcast %3 : vector<1x32xf32> to vector<256x32xf32>
    %5 = arith.addf %2, %4 : vector<256x32xf32>
    %6 = tpu.iota {dimensions = array<i32: 1>} : vector<256x32xi32>
    %c18_i32 = arith.constant 18 : i32
    %7 = vector.broadcast %c18_i32 : i32 to vector<256x32xi32>
    %8 = arith.cmpi sge, %6, %7 : vector<256x32xi32>
    %9 = arith.negf %5 : vector<256x32xf32>
    %10 = math.exp %9 : vector<256x32xf32>
    %cst_5 = arith.constant 1.000000e+00 : f32
    %11 = vector.broadcast %cst_5 : f32 to vector<256x32xf32>
    %12 = arith.addf %11, %10 : vector<256x32xf32>
    %13 = arith.divf %11, %12 : vector<256x32xf32>
    %14 = arith.select %8, %13, %5 : vector<256x32xi1>, vector<256x32xf32>
    %c0_6 = arith.constant 0 : index
    %c0_7 = arith.constant 0 : index
    %15 = vector.load %arg4[%c0_6, %c0_7] : memref<256x32xf32, #tpu.memory_space<vmem>>, vector<256x32xf32>
    tpu.vector_store %arg4[%c0_6, %c0_7], %14 {strides = array<i32>} : memref<256x32xf32, #tpu.memory_space<vmem>>, vector<256x32xf32>,
    return
  }
  func.func @transform_0(%arg0: i32) -> (i32, i32) {
    %c0_i32 = arith.constant 0 : i32
    %c0_i32_0 = arith.constant 0 : i32
    return %arg0, %c0_i32 : i32, i32
  }
  func.func @transform_1(%arg0: i32) -> (i32, i32) {
    %c0_i32 = arith.constant 0 : i32
    %c0_i32_0 = arith.constant 0 : i32
    %c0_i32_1 = arith.constant 0 : i32
    return %c0_i32, %c0_i32_0 : i32, i32
  }
  func.func @transform_2(%arg0: i32) -> (i32, i32) {
    %c0_i32 = arith.constant 0 : i32
    %c0_i32_0 = arith.constant 0 : i32
    %c0_i32_1 = arith.constant 0 : i32
    return %c0_i32, %c0_i32_0 : i32, i32
  }
  func.func @transform_3(%arg0: i32) -> (i32, i32) {
    %c0_i32 = arith.constant 0 : i32
    %c0_i32_0 = arith.constant 0 : i32
    return %arg0, %c0_i32 : i32, i32
  }
}

module attributes {stable_mosaic.version = 11 : i64} {
  func.func @kernel(%arg0: i32, %arg1: memref<128x288xbf16, #tpu.memory_space<vmem>>, %arg2: memref<288x32xbf16, #tpu.memory_space<vmem>>, %arg3: memref<1x32xf32, #tpu.memory_space<vmem>>, %arg4: memref<128x32xf32, #tpu.memory_space<vmem>>) attributes {dimension_semantics = [#tpu.dimension_semantics<parallel>], iteration_bounds = array<i64: 1>, scalar_prefetch = 0 : i64, scratch_operands = 0 : i64, tpu.core_type = #tpu.core_type<tc>, window_params = [{transform_indices = @transform_0, window_bounds = array<i64: 128, 288>}, {pipeline_mode = #tpu.pipeline_mode<synchronous>, transform_indices = @transform_1, window_bounds = array<i64: 288, 32>}, {pipeline_mode = #tpu.pipeline_mode<synchronous>, transform_indices = @transform_2, window_bounds = array<i64: 1, 32>}, {transform_indices = @transform_3, window_bounds = array<i64: 128, 32>}]} {
    %c0 = arith.constant 0 : index
    %c0_0 = arith.constant 0 : index
    %0 = vector.load %arg1[%c0, %c0_0] : memref<128x288xbf16, #tpu.memory_space<vmem>>, vector<128x288xbf16>
    %c0_1 = arith.constant 0 : index
    %c0_2 = arith.constant 0 : index
    %1 = vector.load %arg2[%c0_1, %c0_2] : memref<288x32xbf16, #tpu.memory_space<vmem>>, vector<288x32xbf16>
    %cst = arith.constant dense<0.000000e+00> : vector<128x32xf32>
    %2 = tpu.matmul %0, %1, %cst {dimension_numbers = #tpu.dot_dimension_numbers<[1], [0], [0], [1], [0, 0, 1, 1], [], []>} : vector<128x288xbf16>, vector<288x32xbf16>, vector<128x32xf32> -> vector<128x32xf32>
    %c0_3 = arith.constant 0 : index
    %c0_4 = arith.constant 0 : index
    %3 = vector.load %arg3[%c0_3, %c0_4] : memref<1x32xf32, #tpu.memory_space<vmem>>, vector<1x32xf32>
    %4 = vector.broadcast %3 : vector<1x32xf32> to vector<128x32xf32>
    %5 = arith.addf %2, %4 : vector<128x32xf32>
    %6 = tpu.iota {dimensions = array<i32: 1>} : vector<128x32xi32>
    %c18_i32 = arith.constant 18 : i32
    %7 = vector.broadcast %c18_i32 : i32 to vector<128x32xi32>
    %8 = arith.cmpi sge, %6, %7 : vector<128x32xi32>
    %9 = arith.negf %5 : vector<128x32xf32>
    %10 = math.exp %9 : vector<128x32xf32>
    %cst_5 = arith.constant 1.000000e+00 : f32
    %11 = vector.broadcast %cst_5 : f32 to vector<128x32xf32>
    %12 = arith.addf %11, %10 : vector<128x32xf32>
    %13 = arith.divf %11, %12 : vector<128x32xf32>
    %14 = arith.select %8, %13, %5 : vector<128x32xi1>, vector<128x32xf32>
    %c0_6 = arith.constant 0 : index
    %c0_7 = arith.constant 0 : index
    %15 = vector.load %arg4[%c0_6, %c0_7] : memref<128x32xf32, #tpu.memory_space<vmem>>, vector<128x32xf32>
    tpu.vector_store %arg4[%c0_6, %c0_7], %14 {strides = array<i32>} : memref<128x32xf32, #tpu.memory_space<vmem>>, vector<128x32xf32>,
    return
  }
  func.func @transform_0(%arg0: i32) -> (i32, i32) {
    %c0_i32 = arith.constant 0 : i32
    %c0_i32_0 = arith.constant 0 : i32
    return %arg0, %c0_i32 : i32, i32
  }
  func.func @transform_1(%arg0: i32) -> (i32, i32) {
    %c0_i32 = arith.constant 0 : i32
    %c0_i32_0 = arith.constant 0 : i32
    %c0_i32_1 = arith.constant 0 : i32
    return %c0_i32, %c0_i32_0 : i32, i32
  }
  func.func @transform_2(%arg0: i32) -> (i32, i32) {
    %c0_i32 = arith.constant 0 : i32
    %c0_i32_0 = arith.constant 0 : i32
    %c0_i32_1 = arith.constant 0 : i32
    return %c0_i32, %c0_i32_0 : i32, i32
  }
  func.func @transform_3(%arg0: i32) -> (i32, i32) {
    %c0_i32 = arith.constant 0 : i32
    %c0_i32_0 = arith.constant 0 : i32
    return %arg0, %c0_i32 : i32, i32
  }
}

module attributes {stable_mosaic.version = 11 : i64} {
  func.func @kernel(%arg0: i32, %arg1: memref<32x576xbf16, #tpu.memory_space<vmem>>, %arg2: memref<576x32xbf16, #tpu.memory_space<vmem>>, %arg3: memref<1x32xf32, #tpu.memory_space<vmem>>, %arg4: memref<32x32xf32, #tpu.memory_space<vmem>>) attributes {dimension_semantics = [#tpu.dimension_semantics<parallel>], iteration_bounds = array<i64: 1>, scalar_prefetch = 0 : i64, scratch_operands = 0 : i64, tpu.core_type = #tpu.core_type<tc>, window_params = [{transform_indices = @transform_0, window_bounds = array<i64: 32, 576>}, {pipeline_mode = #tpu.pipeline_mode<synchronous>, transform_indices = @transform_1, window_bounds = array<i64: 576, 32>}, {pipeline_mode = #tpu.pipeline_mode<synchronous>, transform_indices = @transform_2, window_bounds = array<i64: 1, 32>}, {transform_indices = @transform_3, window_bounds = array<i64: 32, 32>}]} {
    %c0 = arith.constant 0 : index
    %c0_0 = arith.constant 0 : index
    %0 = vector.load %arg1[%c0, %c0_0] : memref<32x576xbf16, #tpu.memory_space<vmem>>, vector<32x576xbf16>
    %c0_1 = arith.constant 0 : index
    %c0_2 = arith.constant 0 : index
    %1 = vector.load %arg2[%c0_1, %c0_2] : memref<576x32xbf16, #tpu.memory_space<vmem>>, vector<576x32xbf16>
    %cst = arith.constant dense<0.000000e+00> : vector<32x32xf32>
    %2 = tpu.matmul %0, %1, %cst {dimension_numbers = #tpu.dot_dimension_numbers<[1], [0], [0], [1], [0, 0, 1, 1], [], []>} : vector<32x576xbf16>, vector<576x32xbf16>, vector<32x32xf32> -> vector<32x32xf32>
    %c0_3 = arith.constant 0 : index
    %c0_4 = arith.constant 0 : index
    %3 = vector.load %arg3[%c0_3, %c0_4] : memref<1x32xf32, #tpu.memory_space<vmem>>, vector<1x32xf32>
    %4 = vector.broadcast %3 : vector<1x32xf32> to vector<32x32xf32>
    %5 = arith.addf %2, %4 : vector<32x32xf32>
    %6 = tpu.iota {dimensions = array<i32: 1>} : vector<32x32xi32>
    %c18_i32 = arith.constant 18 : i32
    %7 = vector.broadcast %c18_i32 : i32 to vector<32x32xi32>
    %8 = arith.cmpi sge, %6, %7 : vector<32x32xi32>
    %9 = arith.negf %5 : vector<32x32xf32>
    %10 = math.exp %9 : vector<32x32xf32>
    %cst_5 = arith.constant 1.000000e+00 : f32
    %11 = vector.broadcast %cst_5 : f32 to vector<32x32xf32>
    %12 = arith.addf %11, %10 : vector<32x32xf32>
    %13 = arith.divf %11, %12 : vector<32x32xf32>
    %14 = arith.select %8, %13, %5 : vector<32x32xi1>, vector<32x32xf32>
    %c0_6 = arith.constant 0 : index
    %c0_7 = arith.constant 0 : index
    %15 = vector.load %arg4[%c0_6, %c0_7] : memref<32x32xf32, #tpu.memory_space<vmem>>, vector<32x32xf32>
    tpu.vector_store %arg4[%c0_6, %c0_7], %14 {strides = array<i32>} : memref<32x32xf32, #tpu.memory_space<vmem>>, vector<32x32xf32>,
    return
  }
  func.func @transform_0(%arg0: i32) -> (i32, i32) {
    %c0_i32 = arith.constant 0 : i32
    %c0_i32_0 = arith.constant 0 : i32
    return %arg0, %c0_i32 : i32, i32
  }
  func.func @transform_1(%arg0: i32) -> (i32, i32) {
    %c0_i32 = arith.constant 0 : i32
    %c0_i32_0 = arith.constant 0 : i32
    %c0_i32_1 = arith.constant 0 : i32
    return %c0_i32, %c0_i32_0 : i32, i32
  }
  func.func @transform_2(%arg0: i32) -> (i32, i32) {
    %c0_i32 = arith.constant 0 : i32
    %c0_i32_0 = arith.constant 0 : i32
    %c0_i32_1 = arith.constant 0 : i32
    return %c0_i32, %c0_i32_0 : i32, i32
  }
  func.func @transform_3(%arg0: i32) -> (i32, i32) {
    %c0_i32 = arith.constant 0 : i32
    %c0_i32_0 = arith.constant 0 : i32
    return %arg0, %c0_i32 : i32, i32
  }
}

module attributes {stable_mosaic.version = 11 : i64} {
  func.func @kernel(%arg0: i32, %arg1: memref<32x576xbf16, #tpu.memory_space<vmem>>, %arg2: memref<576x32xbf16, #tpu.memory_space<vmem>>, %arg3: memref<1x32xf32, #tpu.memory_space<vmem>>, %arg4: memref<32x32xf32, #tpu.memory_space<vmem>>) attributes {dimension_semantics = [#tpu.dimension_semantics<parallel>], iteration_bounds = array<i64: 1>, scalar_prefetch = 0 : i64, scratch_operands = 0 : i64, tpu.core_type = #tpu.core_type<tc>, window_params = [{transform_indices = @transform_0, window_bounds = array<i64: 32, 576>}, {pipeline_mode = #tpu.pipeline_mode<synchronous>, transform_indices = @transform_1, window_bounds = array<i64: 576, 32>}, {pipeline_mode = #tpu.pipeline_mode<synchronous>, transform_indices = @transform_2, window_bounds = array<i64: 1, 32>}, {transform_indices = @transform_3, window_bounds = array<i64: 32, 32>}]} {
    %c0 = arith.constant 0 : index
    %c0_0 = arith.constant 0 : index
    %0 = vector.load %arg1[%c0, %c0_0] : memref<32x576xbf16, #tpu.memory_space<vmem>>, vector<32x576xbf16>
    %c0_1 = arith.constant 0 : index
    %c0_2 = arith.constant 0 : index
    %1 = vector.load %arg2[%c0_1, %c0_2] : memref<576x32xbf16, #tpu.memory_space<vmem>>, vector<576x32xbf16>
    %cst = arith.constant dense<0.000000e+00> : vector<32x32xf32>
    %2 = tpu.matmul %0, %1, %cst {dimension_numbers = #tpu.dot_dimension_numbers<[1], [0], [0], [1], [0, 0, 1, 1], [], []>} : vector<32x576xbf16>, vector<576x32xbf16>, vector<32x32xf32> -> vector<32x32xf32>
    %c0_3 = arith.constant 0 : index
    %c0_4 = arith.constant 0 : index
    %3 = vector.load %arg3[%c0_3, %c0_4] : memref<1x32xf32, #tpu.memory_space<vmem>>, vector<1x32xf32>
    %4 = vector.broadcast %3 : vector<1x32xf32> to vector<32x32xf32>
    %5 = arith.addf %2, %4 : vector<32x32xf32>
    %cst_5 = arith.constant 0.000000e+00 : f32
    %6 = vector.broadcast %cst_5 : f32 to vector<32x32xf32>
    %7 = arith.maximumf %5, %6 : vector<32x32xf32>
    %c0_6 = arith.constant 0 : index
    %c0_7 = arith.constant 0 : index
    %8 = vector.load %arg4[%c0_6, %c0_7] : memref<32x32xf32, #tpu.memory_space<vmem>>, vector<32x32xf32>
    tpu.vector_store %arg4[%c0_6, %c0_7], %7 {strides = array<i32>} : memref<32x32xf32, #tpu.memory_space<vmem>>, vector<32x32xf32>,
    return
  }
  func.func @transform_0(%arg0: i32) -> (i32, i32) {
    %c0_i32 = arith.constant 0 : i32
    %c0_i32_0 = arith.constant 0 : i32
    return %arg0, %c0_i32 : i32, i32
  }
  func.func @transform_1(%arg0: i32) -> (i32, i32) {
    %c0_i32 = arith.constant 0 : i32
    %c0_i32_0 = arith.constant 0 : i32
    %c0_i32_1 = arith.constant 0 : i32
    return %c0_i32, %c0_i32_0 : i32, i32
  }
  func.func @transform_2(%arg0: i32) -> (i32, i32) {
    %c0_i32 = arith.constant 0 : i32
    %c0_i32_0 = arith.constant 0 : i32
    %c0_i32_1 = arith.constant 0 : i32
    return %c0_i32, %c0_i32_0 : i32, i32
  }
  func.func @transform_3(%arg0: i32) -> (i32, i32) {
    %c0_i32 = arith.constant 0 : i32
    %c0_i32_0 = arith.constant 0 : i32
    return %arg0, %c0_i32 : i32, i32
  }
}

module attributes {stable_mosaic.version = 11 : i64} {
  func.func @kernel(%arg0: i32, %arg1: memref<128x288xbf16, #tpu.memory_space<vmem>>, %arg2: memref<288x32xbf16, #tpu.memory_space<vmem>>, %arg3: memref<1x32xf32, #tpu.memory_space<vmem>>, %arg4: memref<128x32xf32, #tpu.memory_space<vmem>>, %arg5: memref<128x32xf32, #tpu.memory_space<vmem>>) attributes {dimension_semantics = [#tpu.dimension_semantics<parallel>], iteration_bounds = array<i64: 1>, scalar_prefetch = 0 : i64, scratch_operands = 0 : i64, tpu.core_type = #tpu.core_type<tc>, window_params = [{transform_indices = @transform_0, window_bounds = array<i64: 128, 288>}, {pipeline_mode = #tpu.pipeline_mode<synchronous>, transform_indices = @transform_1, window_bounds = array<i64: 288, 32>}, {pipeline_mode = #tpu.pipeline_mode<synchronous>, transform_indices = @transform_2, window_bounds = array<i64: 1, 32>}, {transform_indices = @transform_3, window_bounds = array<i64: 128, 32>}, {transform_indices = @transform_4, window_bounds = array<i64: 128, 32>}]} {
    %c0 = arith.constant 0 : index
    %c0_0 = arith.constant 0 : index
    %0 = vector.load %arg1[%c0, %c0_0] : memref<128x288xbf16, #tpu.memory_space<vmem>>, vector<128x288xbf16>
    %c0_1 = arith.constant 0 : index
    %c0_2 = arith.constant 0 : index
    %1 = vector.load %arg2[%c0_1, %c0_2] : memref<288x32xbf16, #tpu.memory_space<vmem>>, vector<288x32xbf16>
    %cst = arith.constant dense<0.000000e+00> : vector<128x32xf32>
    %2 = tpu.matmul %0, %1, %cst {dimension_numbers = #tpu.dot_dimension_numbers<[1], [0], [0], [1], [0, 0, 1, 1], [], []>} : vector<128x288xbf16>, vector<288x32xbf16>, vector<128x32xf32> -> vector<128x32xf32>
    %c0_3 = arith.constant 0 : index
    %c0_4 = arith.constant 0 : index
    %3 = vector.load %arg3[%c0_3, %c0_4] : memref<1x32xf32, #tpu.memory_space<vmem>>, vector<1x32xf32>
    %4 = vector.broadcast %3 : vector<1x32xf32> to vector<128x32xf32>
    %5 = arith.addf %2, %4 : vector<128x32xf32>
    %cst_5 = arith.constant 0.000000e+00 : f32
    %6 = vector.broadcast %cst_5 : f32 to vector<128x32xf32>
    %7 = arith.maximumf %5, %6 : vector<128x32xf32>
    %c0_6 = arith.constant 0 : index
    %c0_7 = arith.constant 0 : index
    %8 = vector.load %arg4[%c0_6, %c0_7] : memref<128x32xf32, #tpu.memory_space<vmem>>, vector<128x32xf32>
    %9 = arith.addf %7, %8 : vector<128x32xf32>
    %c0_8 = arith.constant 0 : index
    %c0_9 = arith.constant 0 : index
    %10 = vector.load %arg5[%c0_8, %c0_9] : memref<128x32xf32, #tpu.memory_space<vmem>>, vector<128x32xf32>
    tpu.vector_store %arg5[%c0_8, %c0_9], %9 {strides = array<i32>} : memref<128x32xf32, #tpu.memory_space<vmem>>, vector<128x32xf32>,
    return
  }
  func.func @transform_0(%arg0: i32) -> (i32, i32) {
    %c0_i32 = arith.constant 0 : i32
    %c0_i32_0 = arith.constant 0 : i32
    return %arg0, %c0_i32 : i32, i32
  }
  func.func @transform_1(%arg0: i32) -> (i32, i32) {
    %c0_i32 = arith.constant 0 : i32
    %c0_i32_0 = arith.constant 0 : i32
    %c0_i32_1 = arith.constant 0 : i32
    return %c0_i32, %c0_i32_0 : i32, i32
  }
  func.func @transform_2(%arg0: i32) -> (i32, i32) {
    %c0_i32 = arith.constant 0 : i32
    %c0_i32_0 = arith.constant 0 : i32
    %c0_i32_1 = arith.constant 0 : i32
    return %c0_i32, %c0_i32_0 : i32, i32
  }
  func.func @transform_3(%arg0: i32) -> (i32, i32) {
    %c0_i32 = arith.constant 0 : i32
    %c0_i32_0 = arith.constant 0 : i32
    return %arg0, %c0_i32 : i32, i32
  }
  func.func @transform_4(%arg0: i32) -> (i32, i32) {
    %c0_i32 = arith.constant 0 : i32
    %c0_i32_0 = arith.constant 0 : i32
    return %arg0, %c0_i32 : i32, i32
  }
}

module attributes {stable_mosaic.version = 11 : i64} {
  func.func @kernel(%arg0: i32, %arg1: memref<128x288xbf16, #tpu.memory_space<vmem>>, %arg2: memref<288x32xbf16, #tpu.memory_space<vmem>>, %arg3: memref<1x32xf32, #tpu.memory_space<vmem>>, %arg4: memref<128x32xf32, #tpu.memory_space<vmem>>) attributes {dimension_semantics = [#tpu.dimension_semantics<parallel>], iteration_bounds = array<i64: 1>, scalar_prefetch = 0 : i64, scratch_operands = 0 : i64, tpu.core_type = #tpu.core_type<tc>, window_params = [{transform_indices = @transform_0, window_bounds = array<i64: 128, 288>}, {pipeline_mode = #tpu.pipeline_mode<synchronous>, transform_indices = @transform_1, window_bounds = array<i64: 288, 32>}, {pipeline_mode = #tpu.pipeline_mode<synchronous>, transform_indices = @transform_2, window_bounds = array<i64: 1, 32>}, {transform_indices = @transform_3, window_bounds = array<i64: 128, 32>}]} {
    %c0 = arith.constant 0 : index
    %c0_0 = arith.constant 0 : index
    %0 = vector.load %arg1[%c0, %c0_0] : memref<128x288xbf16, #tpu.memory_space<vmem>>, vector<128x288xbf16>
    %c0_1 = arith.constant 0 : index
    %c0_2 = arith.constant 0 : index
    %1 = vector.load %arg2[%c0_1, %c0_2] : memref<288x32xbf16, #tpu.memory_space<vmem>>, vector<288x32xbf16>
    %cst = arith.constant dense<0.000000e+00> : vector<128x32xf32>
    %2 = tpu.matmul %0, %1, %cst {dimension_numbers = #tpu.dot_dimension_numbers<[1], [0], [0], [1], [0, 0, 1, 1], [], []>} : vector<128x288xbf16>, vector<288x32xbf16>, vector<128x32xf32> -> vector<128x32xf32>
    %c0_3 = arith.constant 0 : index
    %c0_4 = arith.constant 0 : index
    %3 = vector.load %arg3[%c0_3, %c0_4] : memref<1x32xf32, #tpu.memory_space<vmem>>, vector<1x32xf32>
    %4 = vector.broadcast %3 : vector<1x32xf32> to vector<128x32xf32>
    %5 = arith.addf %2, %4 : vector<128x32xf32>
    %cst_5 = arith.constant 0.000000e+00 : f32
    %6 = vector.broadcast %cst_5 : f32 to vector<128x32xf32>
    %7 = arith.maximumf %5, %6 : vector<128x32xf32>
    %c0_6 = arith.constant 0 : index
    %c0_7 = arith.constant 0 : index
    %8 = vector.load %arg4[%c0_6, %c0_7] : memref<128x32xf32, #tpu.memory_space<vmem>>, vector<128x32xf32>
    tpu.vector_store %arg4[%c0_6, %c0_7], %7 {strides = array<i32>} : memref<128x32xf32, #tpu.memory_space<vmem>>, vector<128x32xf32>,
    return
  }
  func.func @transform_0(%arg0: i32) -> (i32, i32) {
    %c0_i32 = arith.constant 0 : i32
    %c0_i32_0 = arith.constant 0 : i32
    return %arg0, %c0_i32 : i32, i32
  }
  func.func @transform_1(%arg0: i32) -> (i32, i32) {
    %c0_i32 = arith.constant 0 : i32
    %c0_i32_0 = arith.constant 0 : i32
    %c0_i32_1 = arith.constant 0 : i32
    return %c0_i32, %c0_i32_0 : i32, i32
  }
  func.func @transform_2(%arg0: i32) -> (i32, i32) {
    %c0_i32 = arith.constant 0 : i32
    %c0_i32_0 = arith.constant 0 : i32
    %c0_i32_1 = arith.constant 0 : i32
    return %c0_i32, %c0_i32_0 : i32, i32
  }
  func.func @transform_3(%arg0: i32) -> (i32, i32) {
    %c0_i32 = arith.constant 0 : i32
    %c0_i32_0 = arith.constant 0 : i32
    return %arg0, %c0_i32 : i32, i32
  }
}

module attributes {stable_mosaic.version = 11 : i64} {
  func.func @kernel(%arg0: i32, %arg1: memref<256x144xbf16, #tpu.memory_space<vmem>>, %arg2: memref<144x32xbf16, #tpu.memory_space<vmem>>, %arg3: memref<1x32xf32, #tpu.memory_space<vmem>>, %arg4: memref<256x32xf32, #tpu.memory_space<vmem>>, %arg5: memref<256x32xf32, #tpu.memory_space<vmem>>) attributes {dimension_semantics = [#tpu.dimension_semantics<parallel>], iteration_bounds = array<i64: 2>, scalar_prefetch = 0 : i64, scratch_operands = 0 : i64, tpu.core_type = #tpu.core_type<tc>, window_params = [{transform_indices = @transform_0, window_bounds = array<i64: 256, 144>}, {pipeline_mode = #tpu.pipeline_mode<synchronous>, transform_indices = @transform_1, window_bounds = array<i64: 144, 32>}, {pipeline_mode = #tpu.pipeline_mode<synchronous>, transform_indices = @transform_2, window_bounds = array<i64: 1, 32>}, {transform_indices = @transform_3, window_bounds = array<i64: 256, 32>}, {transform_indices = @transform_4, window_bounds = array<i64: 256, 32>}]} {
    %c0 = arith.constant 0 : index
    %c0_0 = arith.constant 0 : index
    %0 = vector.load %arg1[%c0, %c0_0] : memref<256x144xbf16, #tpu.memory_space<vmem>>, vector<256x144xbf16>
    %c0_1 = arith.constant 0 : index
    %c0_2 = arith.constant 0 : index
    %1 = vector.load %arg2[%c0_1, %c0_2] : memref<144x32xbf16, #tpu.memory_space<vmem>>, vector<144x32xbf16>
    %cst = arith.constant dense<0.000000e+00> : vector<256x32xf32>
    %2 = tpu.matmul %0, %1, %cst {dimension_numbers = #tpu.dot_dimension_numbers<[1], [0], [0], [1], [0, 0, 1, 1], [], []>} : vector<256x144xbf16>, vector<144x32xbf16>, vector<256x32xf32> -> vector<256x32xf32>
    %c0_3 = arith.constant 0 : index
    %c0_4 = arith.constant 0 : index
    %3 = vector.load %arg3[%c0_3, %c0_4] : memref<1x32xf32, #tpu.memory_space<vmem>>, vector<1x32xf32>
    %4 = vector.broadcast %3 : vector<1x32xf32> to vector<256x32xf32>
    %5 = arith.addf %2, %4 : vector<256x32xf32>
    %cst_5 = arith.constant 0.000000e+00 : f32
    %6 = vector.broadcast %cst_5 : f32 to vector<256x32xf32>
    %7 = arith.maximumf %5, %6 : vector<256x32xf32>
    %c0_6 = arith.constant 0 : index
    %c0_7 = arith.constant 0 : index
    %8 = vector.load %arg4[%c0_6, %c0_7] : memref<256x32xf32, #tpu.memory_space<vmem>>, vector<256x32xf32>
    %9 = arith.addf %7, %8 : vector<256x32xf32>
    %c0_8 = arith.constant 0 : index
    %c0_9 = arith.constant 0 : index
    %10 = vector.load %arg5[%c0_8, %c0_9] : memref<256x32xf32, #tpu.memory_space<vmem>>, vector<256x32xf32>
    tpu.vector_store %arg5[%c0_8, %c0_9], %9 {strides = array<i32>} : memref<256x32xf32, #tpu.memory_space<vmem>>, vector<256x32xf32>,
    return
  }
  func.func @transform_0(%arg0: i32) -> (i32, i32) {
    %c0_i32 = arith.constant 0 : i32
    %c0_i32_0 = arith.constant 0 : i32
    return %arg0, %c0_i32 : i32, i32
  }
  func.func @transform_1(%arg0: i32) -> (i32, i32) {
    %c0_i32 = arith.constant 0 : i32
    %c0_i32_0 = arith.constant 0 : i32
    %c0_i32_1 = arith.constant 0 : i32
    return %c0_i32, %c0_i32_0 : i32, i32
  }
  func.func @transform_2(%arg0: i32) -> (i32, i32) {
    %c0_i32 = arith.constant 0 : i32
    %c0_i32_0 = arith.constant 0 : i32
    %c0_i32_1 = arith.constant 0 : i32
    return %c0_i32, %c0_i32_0 : i32, i32
  }
  func.func @transform_3(%arg0: i32) -> (i32, i32) {
    %c0_i32 = arith.constant 0 : i32
    %c0_i32_0 = arith.constant 0 : i32
    return %arg0, %c0_i32 : i32, i32
  }
  func.func @transform_4(%arg0: i32) -> (i32, i32) {
    %c0_i32 = arith.constant 0 : i32
    %c0_i32_0 = arith.constant 0 : i32
    return %arg0, %c0_i32 : i32, i32
  }
}

module attributes {stable_mosaic.version = 11 : i64} {
  func.func @kernel(%arg0: i32, %arg1: memref<256x288xbf16, #tpu.memory_space<vmem>>, %arg2: memref<288x32xbf16, #tpu.memory_space<vmem>>, %arg3: memref<1x32xf32, #tpu.memory_space<vmem>>, %arg4: memref<256x32xf32, #tpu.memory_space<vmem>>) attributes {dimension_semantics = [#tpu.dimension_semantics<parallel>], iteration_bounds = array<i64: 2>, scalar_prefetch = 0 : i64, scratch_operands = 0 : i64, tpu.core_type = #tpu.core_type<tc>, window_params = [{transform_indices = @transform_0, window_bounds = array<i64: 256, 288>}, {pipeline_mode = #tpu.pipeline_mode<synchronous>, transform_indices = @transform_1, window_bounds = array<i64: 288, 32>}, {pipeline_mode = #tpu.pipeline_mode<synchronous>, transform_indices = @transform_2, window_bounds = array<i64: 1, 32>}, {transform_indices = @transform_3, window_bounds = array<i64: 256, 32>}]} {
    %c0 = arith.constant 0 : index
    %c0_0 = arith.constant 0 : index
    %0 = vector.load %arg1[%c0, %c0_0] : memref<256x288xbf16, #tpu.memory_space<vmem>>, vector<256x288xbf16>
    %c0_1 = arith.constant 0 : index
    %c0_2 = arith.constant 0 : index
    %1 = vector.load %arg2[%c0_1, %c0_2] : memref<288x32xbf16, #tpu.memory_space<vmem>>, vector<288x32xbf16>
    %cst = arith.constant dense<0.000000e+00> : vector<256x32xf32>
    %2 = tpu.matmul %0, %1, %cst {dimension_numbers = #tpu.dot_dimension_numbers<[1], [0], [0], [1], [0, 0, 1, 1], [], []>} : vector<256x288xbf16>, vector<288x32xbf16>, vector<256x32xf32> -> vector<256x32xf32>
    %c0_3 = arith.constant 0 : index
    %c0_4 = arith.constant 0 : index
    %3 = vector.load %arg3[%c0_3, %c0_4] : memref<1x32xf32, #tpu.memory_space<vmem>>, vector<1x32xf32>
    %4 = vector.broadcast %3 : vector<1x32xf32> to vector<256x32xf32>
    %5 = arith.addf %2, %4 : vector<256x32xf32>
    %6 = tpu.iota {dimensions = array<i32: 1>} : vector<256x32xi32>
    %c18_i32 = arith.constant 18 : i32
    %7 = vector.broadcast %c18_i32 : i32 to vector<256x32xi32>
    %8 = arith.cmpi sge, %6, %7 : vector<256x32xi32>
    %9 = arith.negf %5 : vector<256x32xf32>
    %10 = math.exp %9 : vector<256x32xf32>
    %cst_5 = arith.constant 1.000000e+00 : f32
    %11 = vector.broadcast %cst_5 : f32 to vector<256x32xf32>
    %12 = arith.addf %11, %10 : vector<256x32xf32>
    %13 = arith.divf %11, %12 : vector<256x32xf32>
    %14 = arith.select %8, %13, %5 : vector<256x32xi1>, vector<256x32xf32>
    %c0_6 = arith.constant 0 : index
    %c0_7 = arith.constant 0 : index
    %15 = vector.load %arg4[%c0_6, %c0_7] : memref<256x32xf32, #tpu.memory_space<vmem>>, vector<256x32xf32>
    tpu.vector_store %arg4[%c0_6, %c0_7], %14 {strides = array<i32>} : memref<256x32xf32, #tpu.memory_space<vmem>>, vector<256x32xf32>,
    return
  }
  func.func @transform_0(%arg0: i32) -> (i32, i32) {
    %c0_i32 = arith.constant 0 : i32
    %c0_i32_0 = arith.constant 0 : i32
    return %arg0, %c0_i32 : i32, i32
  }
  func.func @transform_1(%arg0: i32) -> (i32, i32) {
    %c0_i32 = arith.constant 0 : i32
    %c0_i32_0 = arith.constant 0 : i32
    %c0_i32_1 = arith.constant 0 : i32
    return %c0_i32, %c0_i32_0 : i32, i32
  }
  func.func @transform_2(%arg0: i32) -> (i32, i32) {
    %c0_i32 = arith.constant 0 : i32
    %c0_i32_0 = arith.constant 0 : i32
    %c0_i32_1 = arith.constant 0 : i32
    return %c0_i32, %c0_i32_0 : i32, i32
  }
  func.func @transform_3(%arg0: i32) -> (i32, i32) {
    %c0_i32 = arith.constant 0 : i32
    %c0_i32_0 = arith.constant 0 : i32
    return %arg0, %c0_i32 : i32, i32
  }
}

module attributes {stable_mosaic.version = 11 : i64} {
  func.func @kernel(%arg0: i32, %arg1: memref<256x288xbf16, #tpu.memory_space<vmem>>, %arg2: memref<288x32xbf16, #tpu.memory_space<vmem>>, %arg3: memref<1x32xf32, #tpu.memory_space<vmem>>, %arg4: memref<256x32xf32, #tpu.memory_space<vmem>>) attributes {dimension_semantics = [#tpu.dimension_semantics<parallel>], iteration_bounds = array<i64: 2>, scalar_prefetch = 0 : i64, scratch_operands = 0 : i64, tpu.core_type = #tpu.core_type<tc>, window_params = [{transform_indices = @transform_0, window_bounds = array<i64: 256, 288>}, {pipeline_mode = #tpu.pipeline_mode<synchronous>, transform_indices = @transform_1, window_bounds = array<i64: 288, 32>}, {pipeline_mode = #tpu.pipeline_mode<synchronous>, transform_indices = @transform_2, window_bounds = array<i64: 1, 32>}, {transform_indices = @transform_3, window_bounds = array<i64: 256, 32>}]} {
    %c0 = arith.constant 0 : index
    %c0_0 = arith.constant 0 : index
    %0 = vector.load %arg1[%c0, %c0_0] : memref<256x288xbf16, #tpu.memory_space<vmem>>, vector<256x288xbf16>
    %c0_1 = arith.constant 0 : index
    %c0_2 = arith.constant 0 : index
    %1 = vector.load %arg2[%c0_1, %c0_2] : memref<288x32xbf16, #tpu.memory_space<vmem>>, vector<288x32xbf16>
    %cst = arith.constant dense<0.000000e+00> : vector<256x32xf32>
    %2 = tpu.matmul %0, %1, %cst {dimension_numbers = #tpu.dot_dimension_numbers<[1], [0], [0], [1], [0, 0, 1, 1], [], []>} : vector<256x288xbf16>, vector<288x32xbf16>, vector<256x32xf32> -> vector<256x32xf32>
    %c0_3 = arith.constant 0 : index
    %c0_4 = arith.constant 0 : index
    %3 = vector.load %arg3[%c0_3, %c0_4] : memref<1x32xf32, #tpu.memory_space<vmem>>, vector<1x32xf32>
    %4 = vector.broadcast %3 : vector<1x32xf32> to vector<256x32xf32>
    %5 = arith.addf %2, %4 : vector<256x32xf32>
    %cst_5 = arith.constant 0.000000e+00 : f32
    %6 = vector.broadcast %cst_5 : f32 to vector<256x32xf32>
    %7 = arith.maximumf %5, %6 : vector<256x32xf32>
    %c0_6 = arith.constant 0 : index
    %c0_7 = arith.constant 0 : index
    %8 = vector.load %arg4[%c0_6, %c0_7] : memref<256x32xf32, #tpu.memory_space<vmem>>, vector<256x32xf32>
    tpu.vector_store %arg4[%c0_6, %c0_7], %7 {strides = array<i32>} : memref<256x32xf32, #tpu.memory_space<vmem>>, vector<256x32xf32>,
    return
  }
  func.func @transform_0(%arg0: i32) -> (i32, i32) {
    %c0_i32 = arith.constant 0 : i32
    %c0_i32_0 = arith.constant 0 : i32
    return %arg0, %c0_i32 : i32, i32
  }
  func.func @transform_1(%arg0: i32) -> (i32, i32) {
    %c0_i32 = arith.constant 0 : i32
    %c0_i32_0 = arith.constant 0 : i32
    %c0_i32_1 = arith.constant 0 : i32
    return %c0_i32, %c0_i32_0 : i32, i32
  }
  func.func @transform_2(%arg0: i32) -> (i32, i32) {
    %c0_i32 = arith.constant 0 : i32
    %c0_i32_0 = arith.constant 0 : i32
    %c0_i32_1 = arith.constant 0 : i32
    return %c0_i32, %c0_i32_0 : i32, i32
  }
  func.func @transform_3(%arg0: i32) -> (i32, i32) {
    %c0_i32 = arith.constant 0 : i32
    %c0_i32_0 = arith.constant 0 : i32
    return %arg0, %c0_i32 : i32, i32
  }
}

module attributes {stable_mosaic.version = 11 : i64} {
  func.func @kernel(%arg0: i32, %arg1: memref<256x32xbf16, #tpu.memory_space<vmem>>, %arg2: memref<32x32xbf16, #tpu.memory_space<vmem>>, %arg3: memref<1x32xf32, #tpu.memory_space<vmem>>, %arg4: memref<256x32xf32, #tpu.memory_space<vmem>>) attributes {dimension_semantics = [#tpu.dimension_semantics<parallel>], iteration_bounds = array<i64: 2>, scalar_prefetch = 0 : i64, scratch_operands = 0 : i64, tpu.core_type = #tpu.core_type<tc>, window_params = [{transform_indices = @transform_0, window_bounds = array<i64: 256, 32>}, {pipeline_mode = #tpu.pipeline_mode<synchronous>, transform_indices = @transform_1, window_bounds = array<i64: 32, 32>}, {pipeline_mode = #tpu.pipeline_mode<synchronous>, transform_indices = @transform_2, window_bounds = array<i64: 1, 32>}, {transform_indices = @transform_3, window_bounds = array<i64: 256, 32>}]} {
    %c0 = arith.constant 0 : index
    %c0_0 = arith.constant 0 : index
    %0 = vector.load %arg1[%c0, %c0_0] : memref<256x32xbf16, #tpu.memory_space<vmem>>, vector<256x32xbf16>
    %c0_1 = arith.constant 0 : index
    %c0_2 = arith.constant 0 : index
    %1 = vector.load %arg2[%c0_1, %c0_2] : memref<32x32xbf16, #tpu.memory_space<vmem>>, vector<32x32xbf16>
    %cst = arith.constant dense<0.000000e+00> : vector<256x32xf32>
    %2 = tpu.matmul %0, %1, %cst {dimension_numbers = #tpu.dot_dimension_numbers<[1], [0], [0], [1], [0, 0, 1, 1], [], []>} : vector<256x32xbf16>, vector<32x32xbf16>, vector<256x32xf32> -> vector<256x32xf32>
    %c0_3 = arith.constant 0 : index
    %c0_4 = arith.constant 0 : index
    %3 = vector.load %arg3[%c0_3, %c0_4] : memref<1x32xf32, #tpu.memory_space<vmem>>, vector<1x32xf32>
    %4 = vector.broadcast %3 : vector<1x32xf32> to vector<256x32xf32>
    %5 = arith.addf %2, %4 : vector<256x32xf32>
    %c0_5 = arith.constant 0 : index
    %c0_6 = arith.constant 0 : index
    %6 = vector.load %arg4[%c0_5, %c0_6] : memref<256x32xf32, #tpu.memory_space<vmem>>, vector<256x32xf32>
    tpu.vector_store %arg4[%c0_5, %c0_6], %5 {strides = array<i32>} : memref<256x32xf32, #tpu.memory_space<vmem>>, vector<256x32xf32>,
    return
  }
  func.func @transform_0(%arg0: i32) -> (i32, i32) {
    %c0_i32 = arith.constant 0 : i32
    %c0_i32_0 = arith.constant 0 : i32
    return %arg0, %c0_i32 : i32, i32
  }
  func.func @transform_1(%arg0: i32) -> (i32, i32) {
    %c0_i32 = arith.constant 0 : i32
    %c0_i32_0 = arith.constant 0 : i32
    %c0_i32_1 = arith.constant 0 : i32
    return %c0_i32, %c0_i32_0 : i32, i32
  }
  func.func @transform_2(%arg0: i32) -> (i32, i32) {
    %c0_i32 = arith.constant 0 : i32
    %c0_i32_0 = arith.constant 0 : i32
    %c0_i32_1 = arith.constant 0 : i32
    return %c0_i32, %c0_i32_0 : i32, i32
  }
  func.func @transform_3(%arg0: i32) -> (i32, i32) {
    %c0_i32 = arith.constant 0 : i32
    %c0_i32_0 = arith.constant 0 : i32
    return %arg0, %c0_i32 : i32, i32
  }
}

</mosaic_0001>

<bundles_post_ra>
// kernel: feature_fusor_forward.17
= control target key start
LH: loop header
LB: loop body
LE: loop exit
PB: predicated region body
PF: predicated region fallthrough
CT: control target
= control target key end

     0   :  { %s1303_s12 = smov 0   ;;  %s1702_s0 = inlined_call_operand.vmem [shape: bf16[512,144], index: 0, kind: input, shape index: {}]   ;;  %s1703_s1 = inlined_call_operand.vmem [shape: bf16[144,32], index: 1, kind: input, shape index: {}]   ;;  %s1704_s2 = inlined_call_operand.vmem [shape: f32[1,32], index: 2, kind: input, shape index: {}]   ;;  %s1705_s3 = inlined_call_operand.vmem [shape: f32[512,32], index: 3, kind: output, shape index: {}]  }
   0x1 LB: > { %s959_s13 = sadd.s32 4294967295, %s1280_s12   ;;  %p963_p0 = scmp.ge.s32.totalorder %s1280_s12, 1  ;;  %s1280_s12 = sphi %s1303_s12, %s13_s12  }
   0x2   : > { %p139_p1 = scmp.lt.s32.totalorder %s1280_s12, 3 }
   0x4   : > { %p140_p2 = pnand %p963_p0, %p139_p1 }
   0x5   : > { %v1089_v0 = vld [vmem:[%s1703_s1] sm:$0xff] (!%p140_p2)   ;;  %v1282_v1 = vmov (!%p140_p2), 0   ;;  %s964_s16 = sshll.u32 (!%p140_p2), %s959_s13, 5  ;;  %v1090_v2 = vld [vmem:[%s1703_s1 + $0x8] sm:$0xff] (!%p140_p2)   ;;  %v1091_v3 = vld [vmem:[%s1703_s1 + $0x10] sm:$0xff] (!%p140_p2)   ;;  %vm433_vm0 = vcmask (!%p140_p2), 130048  }
   0x6   : > { %143 = sbr.rel (%p140_p2) target bundleno = 348 (0x15c), region = 32  ;;  %482 = vmatprep.subr.bf16.mxu0 (!%p140_p2), %v1282_v1  ;;  %1062 = vmatprep.subr.bf16.mxu1 (!%p140_p2), %v1282_v1  ;;  %p165_p3 = scmp.lt.s32.totalorder (!%p140_p2), %s964_s16, 63  ;;  %v1092_v4 = vld [vmem:[%s1703_s1 + $0x18] sm:$0xff] (!%p140_p2)   ;;  %v1093_v7 = vld [vmem:[%s1703_s1 + $0x20] sm:$0xff] (!%p140_p2)   ;;  %v1094_v8 = vld [vmem:[%s1703_s1 + $0x28] sm:$0xff] (!%p140_p2)   ;;  %vm870_vm2 = vcmask (!%p140_p2), 261120  }
   0x7   : > { %483 = vmatpush1.bf16.msra.mxu0 (!%p140_p2), %v1089_v0  ;;  %1071 = vmatpush1.bf16.msra.mxu1 (!%p140_p2), %v1089_v0  ;;  %v1095_v9 = vld [vmem:[%s1703_s1 + $0x30] sm:$0xff] (!%p140_p2)   ;;  %v1096_v10 = vld [vmem:[%s1703_s1 + $0x38] sm:$0xff] (!%p140_p2)   ;;  %v1097_v11 = vld [vmem:[%s1703_s1 + $0x40] sm:$0xff] (!%p140_p2)  }
   0x8   : > { %484 = vmatprep.subr.bf16.mxu0 (!%p140_p2), %v1282_v1  ;;  %1063 = vmatprep.subr.bf16.mxu1 (!%p140_p2), %v1282_v1  ;;  %v1399_v42 = vld [vmem:[%s1704_s2] ss:$0 sm:$0xff] (!%p140_p2) }
   0xb   : > { %485 = vmatpush1.bf16.msra.mxu0 (!%p140_p2), %v1090_v2  ;;  %1072 = vmatpush1.bf16.msra.mxu1 (!%p140_p2), %v1090_v2 }
   0xc   : > { %486 = vmatprep.subr.bf16.mxu0 (!%p140_p2), %v1282_v1  ;;  %1064 = vmatprep.subr.bf16.mxu1 (!%p140_p2), %v1282_v1 }
   0xd   : > { %s1707_s16 = smov (!%p165_p3, %s964_s16), 63 }
   0xe   : > { %s1061_s21 = sshll.u32 %s1707_s16, 3 }
   0xf   : > { %s1328_s24 = scalar_lea.vmem %s1702_s0, %s1061_s21  ;;  %487 = vmatpush1.bf16.msra.mxu0 %v1091_v3  ;;  %1073 = vmatpush1.bf16.msra.mxu1 %v1091_v3  ;;  %s1463_s15 = scalar_lea.vmem %s1705_s3, %s1061_s21 }
  0x10   : > { %v1100_v5 = vld [vmem:[%s1328_s24 + $0x4] ss:$8 sps:$4 sm:$0xff]   ;;  %488 = vmatprep.subr.bf16.mxu0 %v1282_v1  ;;  %1065 = vmatprep.subr.bf16.mxu1 %v1282_v1  ;;  %v1098_v12 = vld [vmem:[%s1328_s24] ss:$8 sps:$4 sm:$0xff]   ;;  %v1104_v14 = vld [vmem:[%s1328_s24 + $0x14] ss:$8 sps:$4 sm:$0xff]  }
  0x11   : > { %v1103_v6 = vld [vmem:[%s1328_s24 + $0x84] ss:$8 sps:$4 sm:$0xff]   ;;  %1011 = vmatprep.mubr.msk.bf16.mxu0 %vm433_vm0, %v1100_v5  ;;  %v1101_v13 = vld [vmem:[%s1328_s24 + $0x80] ss:$8 sps:$4 sm:$0xff]   ;;  %v1106_v15 = vld [vmem:[%s1328_s24 + $0x94] ss:$8 sps:$4 sm:$0xff]  }
  0x12   : > { %1019 = vmatprep.mubr.msk.bf16.mxu1 %vm433_vm0, %v1103_v6  ;;  %v1108_v16 = vld [vmem:[%s1328_s24 + $0x10] ss:$8 sps:$4 sm:$0xff]   ;;  %v1110_v18 = vld [vmem:[%s1328_s24 + $0x24] ss:$8 sps:$4 sm:$0xff]   ;;  %v1114_v20 = vld [vmem:[%s1328_s24 + $0x20] ss:$8 sps:$4 sm:$0xff]  }
  0x13   : > { %489 = vmatpush1.bf16.msra.mxu0 %v1092_v4  ;;  %1074 = vmatpush1.bf16.msra.mxu1 %v1092_v4  ;;  %v1109_v17 = vld [vmem:[%s1328_s24 + $0x90] ss:$8 sps:$4 sm:$0xff]   ;;  %v1112_v19 = vld [vmem:[%s1328_s24 + $0xa4] ss:$8 sps:$4 sm:$0xff]   ;;  %v1115_v21 = vld [vmem:[%s1328_s24 + $0xa0] ss:$8 sps:$4 sm:$0xff]  }
  0x14   : > { %490 = vmatprep.subr.bf16.mxu0 %v1282_v1  ;;  %1066 = vmatprep.subr.bf16.mxu1 %v1282_v1  ;;  %v1116_v22 = vld [vmem:[%s1328_s24 + $0x34] ss:$8 sps:$4 sm:$0xff]   ;;  %v1120_v24 = vld [vmem:[%s1328_s24 + $0x30] ss:$8 sps:$4 sm:$0xff]   ;;  %v1122_v26 = vld [vmem:[%s1328_s24 + $0x44] ss:$8 sps:$4 sm:$0xff]  }
  0x15   : > { %v1118_v23 = vld [vmem:[%s1328_s24 + $0xb4] ss:$8 sps:$4 sm:$0xff]   ;;  %v1121_v25 = vld [vmem:[%s1328_s24 + $0xb0] ss:$8 sps:$4 sm:$0xff]   ;;  %v1124_v27 = vld [vmem:[%s1328_s24 + $0xc4] ss:$8 sps:$4 sm:$0xff]  }
  0x16   : > { %v1126_v28 = vld [vmem:[%s1328_s24 + $0x40] ss:$8 sps:$4 sm:$0xff]   ;;  %v1128_v30 = vld [vmem:[%s1328_s24 + $0x54] ss:$8 sps:$4 sm:$0xff]   ;;  %v1132_v32 = vld [vmem:[%s1328_s24 + $0x50] ss:$8 sps:$4 sm:$0xff]  }
  0x17   : > { %491 = vmatpush1.bf16.msra.mxu0 %v1093_v7  ;;  %1075 = vmatpush1.bf16.msra.mxu1 %v1093_v7  ;;  %v1127_v29 = vld [vmem:[%s1328_s24 + $0xc0] ss:$8 sps:$4 sm:$0xff]   ;;  %v1130_v31 = vld [vmem:[%s1328_s24 + $0xd4] ss:$8 sps:$4 sm:$0xff]   ;;  %v1133_v33 = vld [vmem:[%s1328_s24 + $0xd0] ss:$8 sps:$4 sm:$0xff]  }
  0x18   : > { %492 = vmatprep.subr.bf16.mxu0 %v1282_v1  ;;  %1067 = vmatprep.subr.bf16.mxu1 %v1282_v1  ;;  %v1134_v34 = vld [vmem:[%s1328_s24 + $0x64] ss:$8 sps:$4 sm:$0xff]   ;;  %v1138_v36 = vld [vmem:[%s1328_s24 + $0x60] ss:$8 sps:$4 sm:$0xff]   ;;  %v1140_v38 = vld [vmem:[%s1328_s24 + $0x74] ss:$8 sps:$4 sm:$0xff]  }
  0x19   : > { %v1136_v35 = vld [vmem:[%s1328_s24 + $0xe4] ss:$8 sps:$4 sm:$0xff]   ;;  %v1139_v37 = vld [vmem:[%s1328_s24 + $0xe0] ss:$8 sps:$4 sm:$0xff]   ;;  %v1142_v39 = vld [vmem:[%s1328_s24 + $0xf4] ss:$8 sps:$4 sm:$0xff]  }
  0x1a   : > { %v1144_v40 = vld [vmem:[%s1328_s24 + $0x70] ss:$8 sps:$4 sm:$0xff]  }
  0x1b   : > { %493 = vmatpush1.bf16.msra.mxu0 %v1094_v8  ;;  %1076 = vmatpush1.bf16.msra.mxu1 %v1094_v8  ;;  %v1145_v41 = vld [vmem:[%s1328_s24 + $0xf0] ss:$8 sps:$4 sm:$0xff]  }
  0x1c   : > { %494 = vmatprep.subr.bf16.mxu0 %v1282_v1  ;;  %1068 = vmatprep.subr.bf16.mxu1 %v1282_v1 }
  0x1f   : > { %495 = vmatpush1.bf16.msra.mxu0 %v1095_v9  ;;  %1077 = vmatpush1.bf16.msra.mxu1 %v1095_v9 }
  0x20   : > { %496 = vmatprep.subr.bf16.mxu0 %v1282_v1  ;;  %1069 = vmatprep.subr.bf16.mxu1 %v1282_v1 }
  0x23   : > { %497 = vmatpush1.bf16.msra.mxu0 %v1096_v10  ;;  %1078 = vmatpush1.bf16.msra.mxu1 %v1096_v10 }
  0x24   : > { %498 = vmatprep.subr.bf16.mxu0 %v1282_v1  ;;  %1070 = vmatprep.subr.bf16.mxu1 %v1282_v1 }
  0x27   : > { %499 = vmatpush1.bf16.msra.mxu0 %v1097_v11  ;;  %1079 = vmatpush1.bf16.msra.mxu1 %v1097_v11 }
  0x2a   : > { %515 = vmatmul.mubr.bf16.vlgmr.msra.gmra.mrb[0].mxu0 %v1098_v12  ;;  %579 = vmatmul.mubr.bf16.vlgmr.msra.gmra.mrb[0].mxu1 %v1101_v13 }
  0x2b   : > { %1012 = vmatprep.mubr.msk.bf16.mxu0 %vm433_vm0, %v1104_v14  ;;  %1020 = vmatprep.mubr.msk.bf16.mxu1 %vm433_vm0, %v1106_v15 }
  0x32   : > { %523 = vmatmul.mubr.bf16.gmra.mrb[4].mxu0 %v1108_v16  ;;  %587 = vmatmul.mubr.bf16.gmra.mrb[4].mxu1 %v1109_v17 }
  0x33   : > { %1013 = vmatprep.mubr.msk.bf16.mxu0 %vm433_vm0, %v1110_v18  ;;  %1021 = vmatprep.mubr.msk.bf16.mxu1 %vm433_vm0, %v1112_v19 }
  0x3a   : > { %531 = vmatmul.mubr.bf16.gmra.mrb[8].mxu0 %v1114_v20  ;;  %595 = vmatmul.mubr.bf16.gmra.mrb[8].mxu1 %v1115_v21 }
  0x3b   : > { %1014 = vmatprep.mubr.msk.bf16.mxu0 %vm433_vm0, %v1116_v22  ;;  %1022 = vmatprep.mubr.msk.bf16.mxu1 %vm433_vm0, %v1118_v23  ;;  %v643_v23 = vlaneseq }
  0x42   : > { %539 = vmatmul.mubr.bf16.gmra.mrb[12].mxu0 %v1120_v24  ;;  %603 = vmatmul.mubr.bf16.gmra.mrb[12].mxu1 %v1121_v25 }
  0x43   : > { %1015 = vmatprep.mubr.msk.bf16.mxu0 %vm433_vm0, %v1122_v26  ;;  %1023 = vmatprep.mubr.msk.bf16.mxu1 %vm433_vm0, %v1124_v27 }
  0x4a   : > { %547 = vmatmul.mubr.bf16.gmra.mrb[16].mxu0 %v1126_v28  ;;  %611 = vmatmul.mubr.bf16.gmra.mrb[16].mxu1 %v1127_v29 }
  0x4b   : > { %1016 = vmatprep.mubr.msk.bf16.mxu0 %vm433_vm0, %v1128_v30  ;;  %1024 = vmatprep.mubr.msk.bf16.mxu1 %vm433_vm0, %v1130_v31 }
  0x52   : > { %555 = vmatmul.mubr.bf16.gmra.mrb[20].mxu0 %v1132_v32  ;;  %619 = vmatmul.mubr.bf16.gmra.mrb[20].mxu1 %v1133_v33 }
  0x53   : > { %1017 = vmatprep.mubr.msk.bf16.mxu0 %vm433_vm0, %v1134_v34  ;;  %1025 = vmatprep.mubr.msk.bf16.mxu1 %vm433_vm0, %v1136_v35  ;;  %v1447_v34 = vand.u32 127, %v643_v23 }
  0x55   : > { %vm645_vm1 = vcmp.ge.s32.totalorder %v1447_v34, 18 }
  0x5a   : > { %563 = vmatmul.mubr.bf16.gmra.mrb[24].mxu0 %v1138_v36  ;;  %627 = vmatmul.mubr.bf16.gmra.mrb[24].mxu1 %v1139_v37 }
  0x5b   : > { %1018 = vmatprep.mubr.msk.bf16.mxu0 %vm433_vm0, %v1140_v38  ;;  %1026 = vmatprep.mubr.msk.bf16.mxu1 %vm433_vm0, %v1142_v39 }
  0x62   : > { %571 = vmatmul.mubr.bf16.gmra.mrb[28].mxu0 %v1144_v40  ;;  %635 = vmatmul.mubr.bf16.gmra.mrb[28].mxu1 %v1145_v41 }
  0xfd   : > { %v516_v43 = vpop.f32.mrb[0].mxu0  ;;  %v580_v44 = vpop.f32.mrb[0].mxu1 }
  0xfe   : > { %v1402_v45 = vadd.f32 %v1399_v42, %v516_v43  ;;  %v1405_v46 = vadd.f32 %v1399_v42, %v580_v44  ;;  %v518_v47 = vpop.f32.mrb[1].mxu0  ;;  %v582_v48 = vpop.f32.mrb[1].mxu1 }
  0xff   : > { %v519_v49 = vpop.f32.mrb[2].mxu0  ;;  %v583_v50 = vpop.f32.mrb[2].mxu1 }
 0x100   : > { %v1027_v51 = vmul.f32 -1.442695, %v1402_v45  ;;  %v1043_v52 = vmul.f32 -1.442695, %v1405_v46  ;;  %v1410_v53 = vadd.f32 %v1399_v42, %v519_v49  ;;  %v1413_v54 = vadd.f32 %v1399_v42, %v583_v50  ;;  %v521_v55 = vpop.f32.mrb[3].mxu0  ;;  %v585_v56 = vpop.f32.mrb[3].mxu1 }
 0x102   : > { %1146 = vpow2.f32 %v1027_v51  ;;  %v1028_v57 = vmul.f32 -1.442695, %v1410_v53  ;;  %v1044_v58 = vmul.f32 -1.442695, %v1413_v54 }
 0x103   : > { %1148 = vpow2.f32 %v1043_v52 }
 0x104   : > { %1150 = vpow2.f32 %v1028_v57 }
 0x105   : > { %1152 = vpow2.f32 %v1044_v58  ;;  %v524_v59 = vpop.f32.mrb[4].mxu0  ;;  %v588_v60 = vpop.f32.mrb[4].mxu1 }
 0x106   : > { %v1418_v61 = vadd.f32 %v1399_v42, %v524_v59  ;;  %v1421_v62 = vadd.f32 %v1399_v42, %v588_v60  ;;  %v526_v63 = vpop.f32.mrb[5].mxu0  ;;  %v590_v0 = vpop.f32.mrb[5].mxu1 }
 0x107   : > { %v527_v1 = vpop.f32.mrb[6].mxu0  ;;  %v591_v2 = vpop.f32.mrb[6].mxu1 }
 0x108   : > { %v1029_v3 = vmul.f32 -1.442695, %v1418_v61  ;;  %v1045_v4 = vmul.f32 -1.442695, %v1421_v62  ;;  %v1426_v5 = vadd.f32 %v1399_v42, %v527_v1  ;;  %v1429_v6 = vadd.f32 %v1399_v42, %v591_v2  ;;  %v529_v7 = vpop.f32.mrb[7].mxu0  ;;  %v593_v8 = vpop.f32.mrb[7].mxu1 }
 0x10a   : > { %1154 = vpow2.f32 %v1029_v3  ;;  %v1030_v9 = vmul.f32 -1.442695, %v1426_v5  ;;  %v1046_v10 = vmul.f32 -1.442695, %v1429_v6 }
 0x10b   : > { %1156 = vpow2.f32 %v1045_v4 }
 0x10c   : > { %v1147_v11 = vpop.eup %1146  ;;  %1158 = vpow2.f32 %v1030_v9 }
 0x10d   : > { %v1149_v12 = vpop.eup %1148  ;;  %v742_v13 = vadd.f32 1.0, %v1147_v11  ;;  %1160 = vpow2.f32 %v1046_v10  ;;  %v532_v14 = vpop.f32.mrb[8].mxu0 }
 0x10e   : > { %v596_v15 = vpop.f32.mrb[8].mxu1  ;;  %v1151_v16 = vpop.eup %1150  ;;  %v758_v17 = vadd.f32 1.0, %v1149_v12  ;;  %v1434_v18 = vadd.f32 %v1399_v42, %v532_v14 }
 0x10f   : > { %v1437_v19 = vadd.f32 %v1399_v42, %v596_v15  ;;  %v534_v20 = vpop.f32.mrb[9].mxu0  ;;  %v598_v21 = vpop.f32.mrb[9].mxu1  ;;  %1162 = vrcp.f32 %v742_v13  ;;  %v743_v24 = vadd.f32 1.0, %v1151_v16 }
 0x110   : > { %v1153_v22 = vpop.eup %1152  ;;  %v535_v25 = vpop.f32.mrb[10].mxu0  ;;  %1164 = vrcp.f32 %v758_v17  ;;  %v1031_v28 = vmul.f32 -1.442695, %v1434_v18 }
 0x111   : > { %v599_v26 = vpop.f32.mrb[10].mxu1  ;;  %v759_v27 = vadd.f32 1.0, %v1153_v22  ;;  %v1047_v29 = vmul.f32 -1.442695, %v1437_v19  ;;  %v537_v30 = vpop.f32.mrb[11].mxu0  ;;  %1166 = vrcp.f32 %v743_v24  ;;  %v1442_v31 = vadd.f32 %v1399_v42, %v535_v25 }
 0x112   : > { %v1445_v32 = vadd.f32 %v1399_v42, %v599_v26  ;;  %v601_v33 = vpop.f32.mrb[11].mxu1 }
 0x113   : > { %1168 = vrcp.f32 %v759_v27  ;;  %v1032_v35 = vmul.f32 -1.442695, %v1442_v31 }
 0x114   : > { %1170 = vpow2.f32 %v1031_v28  ;;  %v1048_v36 = vmul.f32 -1.442695, %v1445_v32  ;;  %v1155_v37 = vpop.eup %1154 }
 0x115   : > { %1172 = vpow2.f32 %v1047_v29  ;;  %v1157_v38 = vpop.eup %1156  ;;  %v744_v39 = vadd.f32 1.0, %v1155_v37  ;;  %v540_v40 = vpop.f32.mrb[12].mxu0 }
 0x116   : > { %1174 = vpow2.f32 %v1032_v35  ;;  %v604_v41 = vpop.f32.mrb[12].mxu1  ;;  %v1159_v43 = vpop.eup %1158  ;;  %v760_v44 = vadd.f32 1.0, %v1157_v38  ;;  %v1452_v47 = vadd.f32 %v1399_v42, %v540_v40 }
 0x117   : > { %1176 = vpow2.f32 %v1048_v36  ;;  %v1455_v48 = vadd.f32 %v1399_v42, %v604_v41  ;;  %v542_v49 = vpop.f32.mrb[13].mxu0  ;;  %v606_v50 = vpop.f32.mrb[13].mxu1  ;;  %v745_v52 = vadd.f32 1.0, %v1159_v43 }
 0x118   : > { %v1161_v51 = vpop.eup %1160  ;;  %1178 = vrcp.f32 %v744_v39  ;;  %v543_v55 = vpop.f32.mrb[14].mxu0  ;;  %v1033_v58 = vmul.f32 -1.442695, %v1452_v47 }
 0x119   : > { %v607_v56 = vpop.f32.mrb[14].mxu1  ;;  %1180 = vrcp.f32 %v760_v44  ;;  %v761_v57 = vadd.f32 1.0, %v1161_v51  ;;  %v1049_v59 = vmul.f32 -1.442695, %v1455_v48  ;;  %v545_v60 = vpop.f32.mrb[15].mxu0  ;;  %v1468_v0 = vadd.f32 %v1399_v42, %v543_v55 }
 0x11a   : > { %v1163_v63 = vpop.eup %1162  ;;  %1182 = vrcp.f32 %v745_v52  ;;  %v1471_v1 = vadd.f32 %v1399_v42, %v607_v56  ;;  %v609_v2 = vpop.f32.mrb[15].mxu1 }
 0x11b   : > { %v1165_v3 = vpop.eup %1164  ;;  %v838_v4 = vsel %vm645_vm1, %v1163_v63, %v1402_v45  ;;  %1184 = vrcp.f32 %v761_v57  ;;  %v1034_v9 = vmul.f32 -1.442695, %v1468_v0 }
 0x11c   : > { %v1167_v7 = vpop.eup %1166  ;;  %871 = vst.msk [vmem:[%s1463_s15] sm:$0xff] %vm870_vm2, %v838_v4  ;;  %v854_v8 = vsel %vm645_vm1, %v1165_v3, %v1405_v46  ;;  %1186 = vpow2.f32 %v1033_v58  ;;  %v1050_v10 = vmul.f32 -1.442695, %v1471_v1 }
 0x11d   : > { %v1169_v11 = vpop.eup %1168  ;;  %887 = vst.msk [vmem:[%s1463_s15 + $0x80] sm:$0xff] %vm870_vm2, %v854_v8  ;;  %v839_v45 = vsel %vm645_vm1, %v1167_v7, %v1410_v53  ;;  %1188 = vpow2.f32 %v1049_v59  ;;  %v548_v13 = vpop.f32.mrb[16].mxu0 }
 0x11e   : > { %v1171_v12 = vpop.eup %1170  ;;  %872 = vst.msk [vmem:[%s1463_s15 + $0x8] sm:$0xff] %vm870_vm2, %v839_v45  ;;  %v855_v46 = vsel %vm645_vm1, %v1169_v11, %v1413_v54  ;;  %1190 = vpow2.f32 %v1034_v9  ;;  %v612_v14 = vpop.f32.mrb[16].mxu1  ;;  %v1496_v17 = vadd.f32 %v1399_v42, %v548_v13 }
 0x11f   : > { %v1173_v15 = vpop.eup %1172  ;;  %888 = vst.msk [vmem:[%s1463_s15 + $0x88] sm:$0xff] %vm870_vm2, %v855_v46  ;;  %v746_v16 = vadd.f32 1.0, %v1171_v12  ;;  %1192 = vpow2.f32 %v1050_v10  ;;  %v1499_v53 = vadd.f32 %v1399_v42, %v612_v14  ;;  %v550_v20 = vpop.f32.mrb[17].mxu0 }
 0x120   : > { %v614_v21 = vpop.f32.mrb[17].mxu1  ;;  %v1175_v22 = vpop.eup %1174  ;;  %v762_v23 = vadd.f32 1.0, %v1173_v15  ;;  %v1035_v27 = vmul.f32 -1.442695, %v1496_v17 }
 0x121   : > { %v551_v24 = vpop.f32.mrb[18].mxu0  ;;  %v615_v54 = vpop.f32.mrb[18].mxu1  ;;  %1194 = vrcp.f32 %v746_v16  ;;  %v747_v26 = vadd.f32 1.0, %v1175_v22  ;;  %v1051_v28 = vmul.f32 -1.442695, %v1499_v53 }
 0x122   : > { %v1177_v25 = vpop.eup %1176  ;;  %v553_v29 = vpop.f32.mrb[19].mxu0  ;;  %1196 = vrcp.f32 %v762_v23  ;;  %v1504_v35 = vadd.f32 %v1399_v42, %v551_v24  ;;  %v1507_v36 = vadd.f32 %v1399_v42, %v615_v54 }
 0x123   : > { %v1179_v30 = vpop.eup %1178  ;;  %v763_v33 = vadd.f32 1.0, %v1177_v25  ;;  %v617_v37 = vpop.f32.mrb[19].mxu1  ;;  %1198 = vrcp.f32 %v747_v26 }
 0x124   : > { %v1181_v38 = vpop.eup %1180  ;;  %v840_v39 = vsel %vm645_vm1, %v1179_v30, %v1418_v61  ;;  %v1036_v43 = vmul.f32 -1.442695, %v1504_v35  ;;  %v1052_v44 = vmul.f32 -1.442695, %v1507_v36 }
 0x125   : > { %v1183_v40 = vpop.eup %1182  ;;  %873 = vst.msk [vmem:[%s1463_s15 + $0x10] sm:$0xff] %vm870_vm2, %v840_v39  ;;  %v856_v41 = vsel %vm645_vm1, %v1181_v38, %v1421_v62  ;;  %1200 = vrcp.f32 %v763_v33  ;;  %v556_v51 = vpop.f32.mrb[20].mxu0 }
 0x126   : > { %v1185_v49 = vpop.eup %1184  ;;  %889 = vst.msk [vmem:[%s1463_s15 + $0x90] sm:$0xff] %vm870_vm2, %v856_v41  ;;  %v841_v61 = vsel %vm645_vm1, %v1183_v40, %v1426_v5  ;;  %1202 = vpow2.f32 %v1035_v27  ;;  %v620_v52 = vpop.f32.mrb[20].mxu1  ;;  %v1532_v57 = vadd.f32 %v1399_v42, %v556_v51 }
 0x127   : > { %v1187_v50 = vpop.eup %1186  ;;  %874 = vst.msk [vmem:[%s1463_s15 + $0x18] sm:$0xff] %vm870_vm2, %v841_v61  ;;  %v857_v62 = vsel %vm645_vm1, %v1185_v49, %v1429_v6  ;;  %1204 = vpow2.f32 %v1051_v28  ;;  %v1535_v5 = vadd.f32 %v1399_v42, %v620_v52  ;;  %v558_v58 = vpop.f32.mrb[21].mxu0 }
 0x128   : > { %v1189_v55 = vpop.eup %1188  ;;  %890 = vst.msk [vmem:[%s1463_s15 + $0x98] sm:$0xff] %vm870_vm2, %v857_v62  ;;  %v748_v56 = vadd.f32 1.0, %v1187_v50  ;;  %1206 = vpow2.f32 %v1036_v43  ;;  %v622_v59 = vpop.f32.mrb[21].mxu1  ;;  %v1037_v7 = vmul.f32 -1.442695, %v1532_v57 }
 0x129   : > { %v1191_v60 = vpop.eup %1190  ;;  %v764_v63 = vadd.f32 1.0, %v1189_v55  ;;  %1208 = vpow2.f32 %v1052_v44  ;;  %v559_v6 = vpop.f32.mrb[22].mxu0  ;;  %v1053_v8 = vmul.f32 -1.442695, %v1535_v5 }
 0x12a   : > { %v623_v2 = vpop.f32.mrb[22].mxu1  ;;  %v1193_v3 = vpop.eup %1192  ;;  %1210 = vrcp.f32 %v748_v56  ;;  %v749_v4 = vadd.f32 1.0, %v1191_v60  ;;  %v1540_v11 = vadd.f32 %v1399_v42, %v559_v6 }
 0x12b   : > { %v561_v9 = vpop.f32.mrb[23].mxu0  ;;  %1212 = vrcp.f32 %v764_v63  ;;  %v765_v10 = vadd.f32 1.0, %v1193_v3  ;;  %v1543_v45 = vadd.f32 %v1399_v42, %v623_v2  ;;  %v625_v12 = vpop.f32.mrb[23].mxu1 }
 0x12c   : > { %v1195_v46 = vpop.eup %1194  ;;  %1214 = vrcp.f32 %v749_v4  ;;  %v1038_v15 = vmul.f32 -1.442695, %v1540_v11 }
 0x12d   : > { %v1197_v13 = vpop.eup %1196  ;;  %v842_v14 = vsel %vm645_vm1, %v1195_v46, %v1434_v18  ;;  %1216 = vrcp.f32 %v765_v10  ;;  %v1054_v16 = vmul.f32 -1.442695, %v1543_v45  ;;  %v564_v23 = vpop.f32.mrb[24].mxu0 }
 0x12e   : > { %v1199_v20 = vpop.eup %1198  ;;  %875 = vst.msk [vmem:[%s1463_s15 + $0x20] sm:$0xff] %vm870_vm2, %v842_v14  ;;  %v858_v21 = vsel %vm645_vm1, %v1197_v13, %v1437_v19  ;;  %1218 = vpow2.f32 %v1037_v7  ;;  %v628_v24 = vpop.f32.mrb[24].mxu1  ;;  %v1566_v19 = vadd.f32 %v1399_v42, %v564_v23 }
 0x12f   : > { %v1201_v22 = vpop.eup %1200  ;;  %891 = vst.msk [vmem:[%s1463_s15 + $0xa0] sm:$0xff] %vm870_vm2, %v858_v21  ;;  %v843_v18 = vsel %vm645_vm1, %v1199_v20, %v1442_v31  ;;  %1220 = vpow2.f32 %v1053_v8  ;;  %v1569_v26 = vadd.f32 %v1399_v42, %v628_v24  ;;  %v566_v27 = vpop.f32.mrb[25].mxu0 }
 0x130   : > { %v1203_v54 = vpop.eup %1202  ;;  %876 = vst.msk [vmem:[%s1463_s15 + $0x28] sm:$0xff] %vm870_vm2, %v843_v18  ;;  %v859_v25 = vsel %vm645_vm1, %v1201_v22, %v1445_v32  ;;  %1222 = vpow2.f32 %v1038_v15  ;;  %v630_v28 = vpop.f32.mrb[25].mxu1  ;;  %v1039_v43 = vmul.f32 -1.442695, %v1566_v19 }
 0x131   : > { %v1205_v31 = vpop.eup %1204  ;;  %892 = vst.msk [vmem:[%s1463_s15 + $0xa8] sm:$0xff] %vm870_vm2, %v859_v25  ;;  %v750_v29 = vadd.f32 1.0, %v1203_v54  ;;  %1224 = vpow2.f32 %v1054_v16  ;;  %v567_v30 = vpop.f32.mrb[26].mxu0  ;;  %v1055_v62 = vmul.f32 -1.442695, %v1569_v26 }
 0x132   : > { %v631_v33 = vpop.f32.mrb[26].mxu1  ;;  %v1207_v37 = vpop.eup %1206  ;;  %v766_v38 = vadd.f32 1.0, %v1205_v31  ;;  %v1574_v32 = vadd.f32 %v1399_v42, %v567_v30 }
 0x133   : > { %v569_v39 = vpop.f32.mrb[27].mxu0  ;;  %v1209_v40 = vpop.eup %1208  ;;  %1226 = vrcp.f32 %v750_v29  ;;  %v751_v41 = vadd.f32 1.0, %v1207_v37  ;;  %v1578_v44 = vadd.f32 %v1399_v42, %v631_v33 }
 0x134   : > { %v633_v49 = vpop.f32.mrb[27].mxu1  ;;  %v1211_v61 = vpop.eup %1210  ;;  %1228 = vrcp.f32 %v766_v38  ;;  %v767_v50 = vadd.f32 1.0, %v1209_v40  ;;  %v1040_v55 = vmul.f32 -1.442695, %v1574_v32 }
 0x135   : > { %v1213_v51 = vpop.eup %1212  ;;  %v844_v52 = vsel %vm645_vm1, %v1211_v61, %v1452_v47  ;;  %1230 = vrcp.f32 %v751_v41  ;;  %v1056_v59 = vmul.f32 -1.442695, %v1578_v44  ;;  %v572_v63 = vpop.f32.mrb[28].mxu0 }
 0x136   : > { %v1215_v56 = vpop.eup %1214  ;;  %877 = vst.msk [vmem:[%s1463_s15 + $0x30] sm:$0xff] %vm870_vm2, %v844_v52  ;;  %v860_v58 = vsel %vm645_vm1, %v1213_v51, %v1455_v48  ;;  %1232 = vrcp.f32 %v767_v50  ;;  %v636_v6 = vpop.f32.mrb[28].mxu1  ;;  %v1602_v3 = vadd.f32 %v1399_v42, %v572_v63 }
 0x137   : > { %v1217_v60 = vpop.eup %1216  ;;  %893 = vst.msk [vmem:[%s1463_s15 + $0xb0] sm:$0xff] %vm870_vm2, %v860_v58  ;;  %v845_v47 = vsel %vm645_vm1, %v1215_v56, %v1468_v0  ;;  %1234 = vpow2.f32 %v1039_v43  ;;  %v1605_v4 = vadd.f32 %v1399_v42, %v636_v6  ;;  %v574_v7 = vpop.f32.mrb[29].mxu0 }
 0x138   : > { %v1219_v2 = vpop.eup %1218  ;;  %878 = vst.msk [vmem:[%s1463_s15 + $0x38] sm:$0xff] %vm870_vm2, %v845_v47  ;;  %v861_v48 = vsel %vm645_vm1, %v1217_v60, %v1471_v1  ;;  %1236 = vpow2.f32 %v1055_v62  ;;  %v638_v8 = vpop.f32.mrb[29].mxu1  ;;  %v1041_v1 = vmul.f32 -1.442695, %v1602_v3 }
 0x139   : > { %v1221_v0 = vpop.eup %1220  ;;  %894 = vst.msk [vmem:[%s1463_s15 + $0xb8] sm:$0xff] %vm870_vm2, %v861_v48  ;;  %v752_v9 = vadd.f32 1.0, %v1219_v2  ;;  %1238 = vpow2.f32 %v1040_v55  ;;  %v575_v10 = vpop.f32.mrb[30].mxu0  ;;  %v1057_v23 = vmul.f32 -1.442695, %v1605_v4 }
 0x13a   : > { %v639_v12 = vpop.f32.mrb[30].mxu1  ;;  %v1223_v46 = vpop.eup %1222  ;;  %v768_v13 = vadd.f32 1.0, %v1221_v0  ;;  %1240 = vpow2.f32 %v1056_v59  ;;  %v1611_v20 = vadd.f32 %v1399_v42, %v575_v10 }
 0x13b   : > { %v577_v14 = vpop.f32.mrb[31].mxu0  ;;  %v1225_v15 = vpop.eup %1224  ;;  %1242 = vrcp.f32 %v752_v9  ;;  %v753_v16 = vadd.f32 1.0, %v1223_v46  ;;  %v1614_v21 = vadd.f32 %v1399_v42, %v639_v12 }
 0x13c   : > { %v641_v22 = vpop.f32.mrb[31].mxu1  ;;  %1244 = vrcp.f32 %v768_v13  ;;  %v769_v18 = vadd.f32 1.0, %v1225_v15  ;;  %v1042_v54 = vmul.f32 -1.442695, %v1611_v20 }
 0x13d   : > { %v1227_v24 = vpop.eup %1226  ;;  %1246 = vrcp.f32 %v753_v16  ;;  %v1058_v42 = vmul.f32 -1.442695, %v1614_v21 }
 0x13e   : > { %v1229_v25 = vpop.eup %1228  ;;  %v846_v27 = vsel %vm645_vm1, %v1227_v24, %v1496_v17  ;;  %1248 = vrcp.f32 %v769_v18 }
 0x13f   : > { %v1231_v28 = vpop.eup %1230  ;;  %879 = vst.msk [vmem:[%s1463_s15 + $0x40] sm:$0xff] %vm870_vm2, %v846_v27  ;;  %v862_v31 = vsel %vm645_vm1, %v1229_v25, %v1499_v53  ;;  %1250 = vpow2.f32 %v1041_v1 }
 0x140   : > { %v1233_v29 = vpop.eup %1232  ;;  %895 = vst.msk [vmem:[%s1463_s15 + $0xc0] sm:$0xff] %vm870_vm2, %v862_v31  ;;  %v847_v30 = vsel %vm645_vm1, %v1231_v28, %v1504_v35  ;;  %1252 = vpow2.f32 %v1057_v23 }
 0x141   : > { %v1235_v17 = vpop.eup %1234  ;;  %880 = vst.msk [vmem:[%s1463_s15 + $0x48] sm:$0xff] %vm870_vm2, %v847_v30  ;;  %v863_v33 = vsel %vm645_vm1, %v1233_v29, %v1507_v36  ;;  %1254 = vpow2.f32 %v1042_v54 }
 0x142   : > { %v1237_v37 = vpop.eup %1236  ;;  %896 = vst.msk [vmem:[%s1463_s15 + $0xc8] sm:$0xff] %vm870_vm2, %v863_v33  ;;  %v754_v53 = vadd.f32 1.0, %v1235_v17  ;;  %1256 = vpow2.f32 %v1058_v42 }
 0x143   : > { %v1239_v38 = vpop.eup %1238  ;;  %v770_v39 = vadd.f32 1.0, %v1237_v37 }
 0x144   : > { %v1241_v40 = vpop.eup %1240  ;;  %1258 = vrcp.f32 %v754_v53  ;;  %v755_v35 = vadd.f32 1.0, %v1239_v38 }
 0x145   : > { %v1243_v41 = vpop.eup %1242  ;;  %1260 = vrcp.f32 %v770_v39  ;;  %v771_v43 = vadd.f32 1.0, %v1241_v40 }
 0x146   : > { %v1245_v49 = vpop.eup %1244  ;;  %v848_v36 = vsel %vm645_vm1, %v1243_v41, %v1532_v57  ;;  %1262 = vrcp.f32 %v755_v35 }
 0x147   : > { %v1247_v61 = vpop.eup %1246  ;;  %881 = vst.msk [vmem:[%s1463_s15 + $0x50] sm:$0xff] %vm870_vm2, %v848_v36  ;;  %v864_v50 = vsel %vm645_vm1, %v1245_v49, %v1535_v5  ;;  %1264 = vrcp.f32 %v771_v43 }
 0x148   : > { %v1249_v62 = vpop.eup %1248  ;;  %897 = vst.msk [vmem:[%s1463_s15 + $0xd0] sm:$0xff] %vm870_vm2, %v864_v50  ;;  %v849_v51 = vsel %vm645_vm1, %v1247_v61, %v1540_v11 }
 0x149   : > { %v1251_v52 = vpop.eup %1250  ;;  %882 = vst.msk [vmem:[%s1463_s15 + $0x58] sm:$0xff] %vm870_vm2, %v849_v51  ;;  %v865_v57 = vsel %vm645_vm1, %v1249_v62, %v1543_v45 }
 0x14a   : > { %v1253_v55 = vpop.eup %1252  ;;  %898 = vst.msk [vmem:[%s1463_s15 + $0xd8] sm:$0xff] %vm870_vm2, %v865_v57  ;;  %v756_v5 = vadd.f32 1.0, %v1251_v52 }
 0x14b   : > { %v1255_v56 = vpop.eup %1254  ;;  %v772_v58 = vadd.f32 1.0, %v1253_v55 }
 0x14c   : > { %v1257_v59 = vpop.eup %1256  ;;  %1266 = vrcp.f32 %v756_v5  ;;  %v757_v60 = vadd.f32 1.0, %v1255_v56 }
 0x14d   : > { %1268 = vrcp.f32 %v772_v58  ;;  %v773_v11 = vadd.f32 1.0, %v1257_v59 }
 0x14e   : > { %v1259_v47 = vpop.eup %1258  ;;  %1270 = vrcp.f32 %v757_v60 }
 0x14f   : > { %v1261_v63 = vpop.eup %1260  ;;  %v850_v45 = vsel %vm645_vm1, %v1259_v47, %v1566_v19  ;;  %1272 = vrcp.f32 %v773_v11 }
 0x150   : > { %v1263_v6 = vpop.eup %1262  ;;  %883 = vst.msk [vmem:[%s1463_s15 + $0x60] sm:$0xff] %vm870_vm2, %v850_v45  ;;  %v866_v2 = vsel %vm645_vm1, %v1261_v63, %v1569_v26 }
 0x151   : > { %v1265_v48 = vpop.eup %1264  ;;  %899 = vst.msk [vmem:[%s1463_s15 + $0xe0] sm:$0xff] %vm870_vm2, %v866_v2  ;;  %v851_v7 = vsel %vm645_vm1, %v1263_v6, %v1574_v32 }
 0x152   : > { %884 = vst.msk [vmem:[%s1463_s15 + $0x68] sm:$0xff] %vm870_vm2, %v851_v7  ;;  %v867_v19 = vsel %vm645_vm1, %v1265_v48, %v1578_v44 }
 0x153   : > { %900 = vst.msk [vmem:[%s1463_s15 + $0xe8] sm:$0xff] %vm870_vm2, %v867_v19 }
 0x156   : > { %v1267_v8 = vpop.eup %1266 }
 0x157   : > { %v1269_v0 = vpop.eup %1268  ;;  %v852_v26 = vsel %vm645_vm1, %v1267_v8, %v1602_v3 }
 0x158   : > { %v1271_v9 = vpop.eup %1270  ;;  %885 = vst.msk [vmem:[%s1463_s15 + $0x70] sm:$0xff] %vm870_vm2, %v852_v26  ;;  %v868_v32 = vsel %vm645_vm1, %v1269_v0, %v1605_v4 }
 0x159   : > { %v1273_v10 = vpop.eup %1272  ;;  %901 = vst.msk [vmem:[%s1463_s15 + $0xf0] sm:$0xff] %vm870_vm2, %v868_v32  ;;  %v853_v44 = vsel %vm645_vm1, %v1271_v9, %v1611_v20 }
 0x15a   : > { %886 = vst.msk [vmem:[%s1463_s15 + $0x78] sm:$0xff] %vm870_vm2, %v853_v44  ;;  %v869_v3 = vsel %vm645_vm1, %v1273_v10, %v1614_v21 }
 0x15b   : > { %902 = vst.msk [vmem:[%s1463_s15 + $0xf8] sm:$0xff] %vm870_vm2, %v869_v3 }
 0x15c PF: > { %s13_s12 = sadd.s32 1, %s1280_s12  }
 0x15d   : > { %p10_p4 = scmp.ge.s32.totalorder %s13_s12, 4  }
 0x15f   :  { %12 = sbr.rel (!%p10_p4) target bundleno = 1 (0x1), region = 62 }

// kernel: feature_fusor_forward.13
= control target key start
LH: loop header
LB: loop body
LE: loop exit
PB: predicated region body
PF: predicated region fallthrough
CT: control target
= control target key end

     0   :  { %vm318_vm0 = vcmask 261120   ;;  %s1319_s1 = inlined_call_operand.vmem [shape: bf16[288,32], index: 1, kind: input, shape index: {}]   ;;  %s1320_s0 = inlined_call_operand.vmem [shape: bf16[128,288], index: 0, kind: input, shape index: {}]   ;;  %s1321_s2 = inlined_call_operand.vmem [shape: f32[1,32], index: 2, kind: input, shape index: {}]   ;;  %s1322_s3 = inlined_call_operand.vmem [shape: f32[128,32], index: 3, kind: output, shape index: {}]  }
   0x1   :  { %v849_v0 = vld [vmem:[%s1319_s1 + $0x40] sm:$0xff]   ;;  %v851_v2 = vld [vmem:[%s1319_s1 + $0x48] sm:$0xff]   ;;  %v853_v4 = vld [vmem:[%s1319_s1 + $0x50] sm:$0xff]  }
   0x2   :  { %v850_v1 = vld [vmem:[%s1319_s1] sm:$0xff]   ;;  %739 = vmatprep.subr.bf16.mxu0 %v849_v0  ;;  %833 = vmatprep.subr.bf16.mxu1 %v849_v0  ;;  %v852_v3 = vld [vmem:[%s1319_s1 + $0x8] sm:$0xff]   ;;  %v854_v5 = vld [vmem:[%s1319_s1 + $0x10] sm:$0xff]  }
   0x3   :  { %740 = vmatpush3.bf16.msra.mxu0 %v850_v1  ;;  %841 = vmatpush3.bf16.msra.mxu1 %v850_v1  ;;  %v855_v6 = vld [vmem:[%s1319_s1 + $0x58] sm:$0xff]   ;;  %v857_v8 = vld [vmem:[%s1319_s1 + $0x60] sm:$0xff]   ;;  %v859_v10 = vld [vmem:[%s1319_s1 + $0x68] sm:$0xff]  }
   0x4   :  { %741 = vmatprep.subr.bf16.mxu0 %v851_v2  ;;  %834 = vmatprep.subr.bf16.mxu1 %v851_v2  ;;  %v856_v7 = vld [vmem:[%s1319_s1 + $0x18] sm:$0xff]   ;;  %v858_v9 = vld [vmem:[%s1319_s1 + $0x20] sm:$0xff]   ;;  %v860_v13 = vld [vmem:[%s1319_s1 + $0x28] sm:$0xff]  }
   0x5   :  { %v867_v11 = vld [vmem:[%s1320_s0 + $0x4] ss:$12 sps:$4 sm:$0xff]   ;;  %v870_v12 = vld [vmem:[%s1320_s0 + $0x94] ss:$12 sps:$4 sm:$0xff]   ;;  %v863_v16 = vld [vmem:[%s1319_s1 + $0x78] sm:$0xff]  }
   0x6   :  { %v861_v14 = vld [vmem:[%s1319_s1 + $0x70] sm:$0xff]   ;;  %375 = vmatprep.mubr.bf16.mxu0 %v867_v11  ;;  %423 = vmatprep.mubr.bf16.mxu1 %v870_v12  ;;  %v864_v17 = vld [vmem:[%s1319_s1 + $0x38] sm:$0xff]   ;;  %v865_v18 = vld [vmem:[%s1320_s0] ss:$12 sps:$4 sm:$0xff]  }
   0x7   :  { %742 = vmatpush3.bf16.msra.mxu0 %v852_v3  ;;  %842 = vmatpush3.bf16.msra.mxu1 %v852_v3  ;;  %v862_v15 = vld [vmem:[%s1319_s1 + $0x30] sm:$0xff]   ;;  %v871_v19 = vld [vmem:[%s1319_s1 + $0x80] sm:$0xff]   ;;  %v872_v21 = vld [vmem:[%s1320_s0 + $0x1c] ss:$12 sps:$4 sm:$0xff]  }
   0x8   :  { %743 = vmatprep.subr.bf16.mxu0 %v853_v4  ;;  %835 = vmatprep.subr.bf16.mxu1 %v853_v4  ;;  %v868_v20 = vld [vmem:[%s1320_s0 + $0x90] ss:$12 sps:$4 sm:$0xff]   ;;  %v874_v22 = vld [vmem:[%s1320_s0 + $0xac] ss:$12 sps:$4 sm:$0xff]   ;;  %v877_v25 = vld [vmem:[%s1320_s0 + $0xa8] ss:$12 sps:$4 sm:$0xff]  }
   0x9   :  { %v878_v23 = vld [vmem:[%s1319_s1 + $0x88] sm:$0xff]   ;;  %v876_v24 = vld [vmem:[%s1320_s0 + $0x18] ss:$12 sps:$4 sm:$0xff]   ;;  %v879_v26 = vld [vmem:[%s1320_s0 + $0x34] ss:$12 sps:$4 sm:$0xff]  }
   0xa   :  { %v881_v27 = vld [vmem:[%s1320_s0 + $0x8] ss:$12 sps:$4 sm:$0xff]   ;;  %v882_v28 = vld [vmem:[%s1320_s0 + $0x30] ss:$12 sps:$4 sm:$0xff]   ;;  %v883_v29 = vld [vmem:[%s1320_s0 + $0x20] ss:$12 sps:$4 sm:$0xff]  }
   0xb   :  { %744 = vmatpush3.bf16.msra.mxu0 %v854_v5  ;;  %843 = vmatpush3.bf16.msra.mxu1 %v854_v5  ;;  %v884_v30 = vld [vmem:[%s1320_s0 + $0x4c] ss:$12 sps:$4 sm:$0xff]   ;;  %v887_v32 = vld [vmem:[%s1320_s0 + $0x48] ss:$12 sps:$4 sm:$0xff]   ;;  %v888_v33 = vld [vmem:[%s1320_s0 + $0x50] ss:$12 sps:$4 sm:$0xff]  }
   0xc   :  { %745 = vmatprep.subr.bf16.mxu0 %v855_v6  ;;  %836 = vmatprep.subr.bf16.mxu1 %v855_v6  ;;  %v886_v31 = vld [vmem:[%s1320_s0 + $0x38] ss:$12 sps:$4 sm:$0xff]   ;;  %v891_v35 = vld [vmem:[%s1320_s0 + $0x68] ss:$12 sps:$4 sm:$0xff]   ;;  %v892_v36 = vld [vmem:[%s1320_s0 + $0x60] ss:$12 sps:$4 sm:$0xff]  }
   0xd   :  { %v889_v34 = vld [vmem:[%s1320_s0 + $0x64] ss:$12 sps:$4 sm:$0xff]   ;;  %v893_v37 = vld [vmem:[%s1320_s0 + $0x80] ss:$12 sps:$4 sm:$0xff]   ;;  %v894_v38 = vld [vmem:[%s1320_s0 + $0x7c] ss:$12 sps:$4 sm:$0xff]  }
   0xe   :  { %v896_v39 = vld [vmem:[%s1320_s0 + $0x98] ss:$12 sps:$4 sm:$0xff]   ;;  %v898_v41 = vld [vmem:[%s1320_s0 + $0xb0] ss:$12 sps:$4 sm:$0xff]   ;;  %v1128_v2 = vld [vmem:[%s1321_s2] ss:$0 sm:$0xff] }
   0xf   :  { %746 = vmatpush3.bf16.msra.mxu0 %v856_v7  ;;  %844 = vmatpush3.bf16.msra.mxu1 %v856_v7  ;;  %v897_v40 = vld [vmem:[%s1320_s0 + $0x78] ss:$12 sps:$4 sm:$0xff]  }
  0x10   :  { %747 = vmatprep.subr.bf16.mxu0 %v857_v8  ;;  %837 = vmatprep.subr.bf16.mxu1 %v857_v8 }
  0x13   :  { %748 = vmatpush3.bf16.msra.mxu0 %v858_v9  ;;  %845 = vmatpush3.bf16.msra.mxu1 %v858_v9 }
  0x14   :  { %749 = vmatprep.subr.bf16.mxu0 %v859_v10  ;;  %838 = vmatprep.subr.bf16.mxu1 %v859_v10 }
  0x17   :  { %750 = vmatpush3.bf16.msra.mxu0 %v860_v13  ;;  %846 = vmatpush3.bf16.msra.mxu1 %v860_v13 }
  0x18   :  { %751 = vmatprep.subr.bf16.mxu0 %v861_v14  ;;  %839 = vmatprep.subr.bf16.mxu1 %v861_v14 }
  0x1b   :  { %752 = vmatpush3.bf16.msra.mxu0 %v862_v15  ;;  %847 = vmatpush3.bf16.msra.mxu1 %v862_v15 }
  0x1c   :  { %753 = vmatprep.subr.bf16.mxu0 %v863_v16  ;;  %840 = vmatprep.subr.bf16.mxu1 %v863_v16 }
  0x1f   :  { %754 = vmatpush3.bf16.msra.mxu0 %v864_v17  ;;  %848 = vmatpush3.bf16.msra.mxu1 %v864_v17 }
  0x20   :  { %813 = vmatprep.subr.bf16.mxu1 %v871_v19 }
  0x22   :  { %376 = vmatmul.mubr.bf16.vlgmr.msra.gmra.mrb[0].mxu0 %v865_v18  ;;  %424 = vmatmul.mubr.bf16.vlgmr.msra.gmra.mrb[0].mxu1 %v868_v20 }
  0x23   :  { %814 = vmatpush3.bf16.msra.mxu1 %v871_v19  ;;  %383 = vmatprep.mubr.bf16.mxu0 %v872_v21 }
  0x24   :  { %431 = vmatprep.mubr.bf16.mxu1 %v874_v22  ;;  %815 = vmatprep.subr.bf16.mxu1 %v878_v23 }
  0x27   :  { %816 = vmatpush3.bf16.msra.mxu1 %v878_v23 }
  0x2a   :  { %384 = vmatmul.mubr.bf16.gmra.mrb[4].mxu0 %v876_v24  ;;  %432 = vmatmul.mubr.bf16.gmra.mrb[4].mxu1 %v877_v25 }
  0x2b   :  { %391 = vmatprep.mubr.bf16.mxu0 %v879_v26  ;;  %817 = vmatprep.mubr.msk.bf16.mxu1 %vm318_vm0, %v881_v27 }
  0x32   :  { %392 = vmatmul.mubr.bf16.gmra.mrb[8].mxu0 %v882_v28  ;;  %818 = vmatmul.mubr.msk.bf16.vlgmr.msra.gmra.mrb[8].mxu1 %vm318_vm0, %v883_v29 }
  0x33   :  { %399 = vmatprep.mubr.bf16.mxu0 %v884_v30  ;;  %821 = vmatprep.mubr.msk.bf16.mxu1 %vm318_vm0, %v886_v31 }
  0x3a   :  { %400 = vmatmul.mubr.bf16.gmra.mrb[12].mxu0 %v887_v32  ;;  %822 = vmatmul.mubr.msk.bf16.gmra.mrb[12].mxu1 %vm318_vm0, %v888_v33 }
  0x3b   :  { %407 = vmatprep.mubr.bf16.mxu0 %v889_v34  ;;  %825 = vmatprep.mubr.msk.bf16.mxu1 %vm318_vm0, %v891_v35 }
  0x42   :  { %408 = vmatmul.mubr.bf16.gmra.mrb[16].mxu0 %v892_v36  ;;  %826 = vmatmul.mubr.msk.bf16.gmra.mrb[16].mxu1 %vm318_vm0, %v893_v37 }
  0x43   :  { %415 = vmatprep.mubr.bf16.mxu0 %v894_v38  ;;  %829 = vmatprep.mubr.msk.bf16.mxu1 %vm318_vm0, %v896_v39 }
  0x4a   :  { %416 = vmatmul.mubr.bf16.gmra.mrb[20].mxu0 %v897_v40  ;;  %830 = vmatmul.mubr.msk.bf16.gmra.mrb[20].mxu1 %vm318_vm0, %v898_v41 }
  0xf5   :  { %v755_v42 = vpop.f32.mrb[0].mxu0  ;;  %v791_v43 = vpop.f32.mrb[0].mxu1 }
  0xf6   :  { %v756_v44 = vpop.f32.mrb[1].mxu0  ;;  %v792_v45 = vpop.f32.mrb[1].mxu1 }
  0xf7   :  { %v757_v46 = vadd.f32 %v756_v44, %v755_v42  ;;  %v758_v47 = vpop.f32.mrb[2].mxu0  ;;  %v1117_v48 = vadd.f32 %v792_v45, %v791_v43  ;;  %v794_v49 = vpop.f32.mrb[2].mxu1 }
  0xf8   :  { %v759_v50 = vpop.f32.mrb[3].mxu0  ;;  %v795_v51 = vpop.f32.mrb[3].mxu1 }
  0xf9   :  { %v760_v52 = vadd.f32 %v759_v50, %v758_v47  ;;  %v1119_v53 = vadd.f32 %v795_v51, %v794_v49  ;;  %v378_v6 = vadd.f32 %v757_v46, %v1128_v2  ;;  %v537_v46 = vlaneseq }
  0xfb   :  { %v381_v15 = vadd.f32 %v760_v52, %v1128_v2 }
  0xfd   :  { %v761_v54 = vpop.f32.mrb[4].mxu0  ;;  %v797_v55 = vpop.f32.mrb[4].mxu1 }
  0xfe   :  { %v762_v56 = vpop.f32.mrb[5].mxu0  ;;  %v798_v57 = vpop.f32.mrb[5].mxu1 }
  0xff   :  { %v763_v58 = vadd.f32 %v762_v56, %v761_v54  ;;  %v764_v59 = vpop.f32.mrb[6].mxu0  ;;  %v1121_v60 = vadd.f32 %v798_v57, %v797_v55  ;;  %v800_v61 = vpop.f32.mrb[6].mxu1 }
 0x100   :  { %v765_v62 = vpop.f32.mrb[7].mxu0  ;;  %v801_v63 = vpop.f32.mrb[7].mxu1 }
 0x101   :  { %v766_v0 = vadd.f32 %v765_v62, %v764_v59  ;;  %v1123_v1 = vadd.f32 %v801_v63, %v800_v61  ;;  %v386_v3 = vadd.f32 %v763_v58, %v1128_v2 }
 0x103   :  { %v389_v10 = vadd.f32 %v766_v0, %v1128_v2 }
 0x105   :  { %v767_v4 = vpop.f32.mrb[8].mxu0  ;;  %v819_v5 = vpop.f32.mrb[8].mxu1 }
 0x106   :  { %v1132_v7 = vadd.f32 %v819_v5, %v386_v3  ;;  %v768_v8 = vpop.f32.mrb[9].mxu0  ;;  %v474_v9 = vpop.f32.mrb[9].mxu1 }
 0x107   :  { %v769_v11 = vadd.f32 %v768_v8, %v767_v4  ;;  %v1135_v12 = vadd.f32 %v474_v9, %v378_v6  ;;  %v770_v13 = vpop.f32.mrb[10].mxu0  ;;  %v820_v14 = vpop.f32.mrb[10].mxu1  ;;  %v1166_v6 = vand.u32 127, %v537_v46 }
 0x108   :  { %v725_v16 = vmul.f32 -1.442695, %v1132_v7  ;;  %v1139_v17 = vadd.f32 %v820_v14, %v389_v10  ;;  %v771_v18 = vpop.f32.mrb[11].mxu0  ;;  %v477_v19 = vpop.f32.mrb[11].mxu1 }
 0x109   :  { %v723_v20 = vmul.f32 -1.442695, %v1135_v12  ;;  %v772_v21 = vadd.f32 %v771_v18, %v770_v13  ;;  %v1142_v22 = vadd.f32 %v477_v19, %v381_v15  ;;  %v394_v27 = vadd.f32 %v769_v11, %v1128_v2 }
 0x10a   :  { %899 = vpow2.f32 %v725_v16  ;;  %v726_v23 = vmul.f32 -1.442695, %v1139_v17  ;;  %v434_v13 = vadd.f32 %v1121_v60, %v1128_v2  ;;  %vm539_vm1 = vcmp.ge.s32.totalorder %v1166_v6, 18 }
 0x10b   :  { %901 = vpow2.f32 %v723_v20  ;;  %v724_v24 = vmul.f32 -1.442695, %v1142_v22  ;;  %v397_v34 = vadd.f32 %v772_v21, %v1128_v2  ;;  %v426_v20 = vadd.f32 %v1117_v48, %v1128_v2 }
 0x10c   :  { %903 = vpow2.f32 %v726_v23  ;;  %v437_v60 = vadd.f32 %v1123_v1, %v1128_v2 }
 0x10d   :  { %905 = vpow2.f32 %v724_v24  ;;  %v773_v25 = vpop.f32.mrb[12].mxu0  ;;  %v823_v26 = vpop.f32.mrb[12].mxu1 }
 0x10e   :  { %v774_v28 = vpop.f32.mrb[13].mxu0  ;;  %v490_v29 = vpop.f32.mrb[13].mxu1 }
 0x10f   :  { %v775_v30 = vadd.f32 %v774_v28, %v773_v25  ;;  %v1147_v31 = vadd.f32 %v490_v29, %v394_v27  ;;  %v776_v32 = vpop.f32.mrb[14].mxu0  ;;  %v824_v33 = vpop.f32.mrb[14].mxu1 }
 0x110   :  { %v777_v35 = vpop.f32.mrb[15].mxu0  ;;  %v493_v36 = vpop.f32.mrb[15].mxu1 }
 0x111   :  { %v402_v37 = vadd.f32 %v775_v30, %v1128_v2  ;;  %v727_v38 = vmul.f32 -1.442695, %v1147_v31  ;;  %v778_v39 = vadd.f32 %v777_v35, %v776_v32  ;;  %v1152_v40 = vadd.f32 %v493_v36, %v397_v34 }
 0x113   :  { %v1154_v41 = vadd.f32 %v823_v26, %v402_v37  ;;  %907 = vpow2.f32 %v727_v38  ;;  %v405_v42 = vadd.f32 %v778_v39, %v1128_v2  ;;  %v728_v43 = vmul.f32 -1.442695, %v1152_v40 }
 0x114   :  { %v900_v44 = vpop.eup %899  ;;  %v429_v26 = vadd.f32 %v1119_v53, %v1128_v2 }
 0x115   :  { %v902_v45 = vpop.eup %901  ;;  %v590_v47 = vadd.f32 1.0, %v900_v44  ;;  %v1158_v49 = vadd.f32 %v824_v33, %v405_v42  ;;  %909 = vpow2.f32 %v728_v43  ;;  %v779_v50 = vpop.f32.mrb[16].mxu0  ;;  %v729_v59 = vmul.f32 -1.442695, %v1154_v41 }
 0x116   :  { %v1160_v51 = vpop.f32.mrb[16].mxu1  ;;  %v904_v52 = vpop.eup %903  ;;  %v588_v54 = vadd.f32 1.0, %v902_v45 }
 0x117   :  { %v780_v55 = vpop.f32.mrb[17].mxu0  ;;  %v506_v56 = vpop.f32.mrb[17].mxu1  ;;  %911 = vrcp.f32 %v590_v47  ;;  %v591_v58 = vadd.f32 1.0, %v904_v52  ;;  %v730_v3 = vmul.f32 -1.442695, %v1158_v49 }
 0x118   :  { %v906_v57 = vpop.eup %905  ;;  %v781_v61 = vadd.f32 %v780_v55, %v779_v50  ;;  %v782_v62 = vpop.f32.mrb[18].mxu0  ;;  %913 = vrcp.f32 %v588_v54 }
 0x119   :  { %v1163_v63 = vpop.f32.mrb[18].mxu1  ;;  %v589_v0 = vadd.f32 1.0, %v906_v57  ;;  %v783_v4 = vpop.f32.mrb[19].mxu0  ;;  %915 = vrcp.f32 %v591_v58 }
 0x11a   :  { %v509_v5 = vpop.f32.mrb[19].mxu1  ;;  %v410_v8 = vadd.f32 %v781_v61, %v1128_v2  ;;  %v784_v9 = vadd.f32 %v783_v4, %v782_v62 }
 0x11b   :  { %917 = vrcp.f32 %v589_v0 }
 0x11c   :  { %919 = vpow2.f32 %v729_v59  ;;  %v1169_v10 = vadd.f32 %v506_v56, %v410_v8  ;;  %v413_v11 = vadd.f32 %v784_v9, %v1128_v2 }
 0x11d   :  { %921 = vpow2.f32 %v730_v3  ;;  %v908_v14 = vpop.eup %907  ;;  %v785_v18 = vpop.f32.mrb[20].mxu0 }
 0x11e   :  { %v731_v15 = vmul.f32 -1.442695, %v1169_v10  ;;  %v1176_v16 = vadd.f32 %v509_v5, %v413_v11  ;;  %v831_v19 = vpop.f32.mrb[20].mxu1  ;;  %v592_v21 = vadd.f32 1.0, %v908_v14  ;;  %v786_v24 = vpop.f32.mrb[21].mxu0 }
 0x11f   :  { %v1180_v23 = vadd.f32 %v831_v19, %v434_v13  ;;  %v522_v25 = vpop.f32.mrb[21].mxu1  ;;  %v910_v27 = vpop.eup %909  ;;  %v787_v29 = vadd.f32 %v786_v24, %v785_v18 }
 0x120   :  { %923 = vpow2.f32 %v731_v15  ;;  %v732_v28 = vmul.f32 -1.442695, %v1176_v16  ;;  %v1187_v30 = vadd.f32 %v522_v25, %v426_v20  ;;  %v788_v32 = vpop.f32.mrb[22].mxu0  ;;  %v832_v48 = vpop.f32.mrb[22].mxu1  ;;  %v593_v33 = vadd.f32 1.0, %v910_v27 }
 0x121   :  { %925 = vrcp.f32 %v592_v21  ;;  %v737_v34 = vmul.f32 -1.442695, %v1180_v23  ;;  %v1190_v35 = vadd.f32 %v832_v48, %v437_v60  ;;  %v789_v36 = vpop.f32.mrb[23].mxu0  ;;  %v525_v1 = vpop.f32.mrb[23].mxu1  ;;  %v418_v53 = vadd.f32 %v787_v29, %v1128_v2 }
 0x122   :  { %v912_v37 = vpop.eup %911  ;;  %927 = vpow2.f32 %v732_v28  ;;  %v735_v38 = vmul.f32 -1.442695, %v1187_v30  ;;  %v790_v39 = vadd.f32 %v789_v36, %v788_v32  ;;  %v1198_v45 = vadd.f32 %v525_v1, %v429_v26 }
 0x123   :  { %v914_v42 = vpop.eup %913  ;;  %v638_v43 = vsel %vm539_vm1, %v912_v37, %v1132_v7  ;;  %929 = vrcp.f32 %v593_v33  ;;  %v738_v44 = vmul.f32 -1.442695, %v1190_v35  ;;  %v1208_v50 = vadd.f32 %v1160_v51, %v418_v53 }
 0x124   :  { %v916_v46 = vpop.eup %915  ;;  %654 = vst.msk [vmem:[%s1322_s3 + $0x10] sm:$0xff] %vm318_vm0, %v638_v43  ;;  %v636_v47 = vsel %vm539_vm1, %v914_v42, %v1135_v12  ;;  %931 = vpow2.f32 %v737_v34  ;;  %v421_v7 = vadd.f32 %v790_v39, %v1128_v2  ;;  %v736_v55 = vmul.f32 -1.442695, %v1198_v45 }
 0x125   :  { %v918_v52 = vpop.eup %917  ;;  %652 = vst.msk [vmem:[%s1322_s3] sm:$0xff] %vm318_vm0, %v636_v47  ;;  %v639_v54 = vsel %vm539_vm1, %v916_v46, %v1139_v17  ;;  %933 = vpow2.f32 %v735_v38  ;;  %v733_v51 = vmul.f32 -1.442695, %v1208_v50 }
 0x126   :  { %v920_v12 = vpop.eup %919  ;;  %655 = vst.msk [vmem:[%s1322_s3 + $0x18] sm:$0xff] %vm318_vm0, %v639_v54  ;;  %v637_v2 = vsel %vm539_vm1, %v918_v52, %v1142_v22  ;;  %935 = vpow2.f32 %v738_v44  ;;  %v1228_v56 = vadd.f32 %v1163_v63, %v421_v7 }
 0x127   :  { %v922_v17 = vpop.eup %921  ;;  %653 = vst.msk [vmem:[%s1322_s3 + $0x8] sm:$0xff] %vm318_vm0, %v637_v2  ;;  %v594_v57 = vadd.f32 1.0, %v920_v12  ;;  %937 = vpow2.f32 %v736_v55 }
 0x128   :  { %v595_v58 = vadd.f32 1.0, %v922_v17  ;;  %939 = vpow2.f32 %v733_v51  ;;  %v734_v59 = vmul.f32 -1.442695, %v1228_v56 }
 0x129   :  { %941 = vrcp.f32 %v594_v57 }
 0x12a   :  { %v924_v22 = vpop.eup %923  ;;  %943 = vrcp.f32 %v595_v58 }
 0x12b   :  { %v926_v61 = vpop.eup %925  ;;  %v596_v62 = vadd.f32 1.0, %v924_v22  ;;  %945 = vpow2.f32 %v734_v59 }
 0x12c   :  { %v928_v63 = vpop.eup %927  ;;  %v640_v0 = vsel %vm539_vm1, %v926_v61, %v1147_v31 }
 0x12d   :  { %v930_v3 = vpop.eup %929  ;;  %656 = vst.msk [vmem:[%s1322_s3 + $0x20] sm:$0xff] %vm318_vm0, %v640_v0  ;;  %947 = vrcp.f32 %v596_v62  ;;  %v597_v4 = vadd.f32 1.0, %v928_v63 }
 0x12e   :  { %v932_v5 = vpop.eup %931  ;;  %v641_v8 = vsel %vm539_vm1, %v930_v3, %v1152_v40 }
 0x12f   :  { %v934_v9 = vpop.eup %933  ;;  %657 = vst.msk [vmem:[%s1322_s3 + $0x28] sm:$0xff] %vm318_vm0, %v641_v8  ;;  %949 = vrcp.f32 %v597_v4  ;;  %v602_v31 = vadd.f32 1.0, %v932_v5 }
 0x130   :  { %v936_v11 = vpop.eup %935  ;;  %v600_v13 = vadd.f32 1.0, %v934_v9 }
 0x131   :  { %v938_v14 = vpop.eup %937  ;;  %951 = vrcp.f32 %v602_v31  ;;  %v603_v15 = vadd.f32 1.0, %v936_v11 }
 0x132   :  { %v940_v18 = vpop.eup %939  ;;  %953 = vrcp.f32 %v600_v13  ;;  %v601_v19 = vadd.f32 1.0, %v938_v14 }
 0x133   :  { %v942_v20 = vpop.eup %941  ;;  %v598_v21 = vadd.f32 1.0, %v940_v18  ;;  %955 = vrcp.f32 %v603_v15 }
 0x134   :  { %v944_v40 = vpop.eup %943  ;;  %v642_v24 = vsel %vm539_vm1, %v942_v20, %v1154_v41  ;;  %957 = vrcp.f32 %v601_v19 }
 0x135   :  { %v946_v25 = vpop.eup %945  ;;  %658 = vst.msk [vmem:[%s1322_s3 + $0x30] sm:$0xff] %vm318_vm0, %v642_v24  ;;  %v643_v60 = vsel %vm539_vm1, %v944_v40, %v1158_v49  ;;  %959 = vrcp.f32 %v598_v21 }
 0x136   :  { %659 = vst.msk [vmem:[%s1322_s3 + $0x38] sm:$0xff] %vm318_vm0, %v643_v60  ;;  %v599_v26 = vadd.f32 1.0, %v946_v25 }
 0x137   :  { %v948_v27 = vpop.eup %947 }
 0x138   :  { %v644_v41 = vsel %vm539_vm1, %v948_v27, %v1169_v10  ;;  %961 = vrcp.f32 %v599_v26 }
 0x139   :  { %v950_v28 = vpop.eup %949  ;;  %660 = vst.msk [vmem:[%s1322_s3 + $0x40] sm:$0xff] %vm318_vm0, %v644_v41 }
 0x13a   :  { %v645_v49 = vsel %vm539_vm1, %v950_v28, %v1176_v16 }
 0x13b   :  { %v952_v29 = vpop.eup %951  ;;  %661 = vst.msk [vmem:[%s1322_s3 + $0x48] sm:$0xff] %vm318_vm0, %v645_v49 }
 0x13c   :  { %v954_v32 = vpop.eup %953  ;;  %v650_v10 = vsel %vm539_vm1, %v952_v29, %v1180_v23 }
 0x13d   :  { %v956_v48 = vpop.eup %955  ;;  %666 = vst.msk [vmem:[%s1322_s3 + $0x70] sm:$0xff] %vm318_vm0, %v650_v10  ;;  %v648_v16 = vsel %vm539_vm1, %v954_v32, %v1187_v30 }
 0x13e   :  { %v958_v33 = vpop.eup %957  ;;  %664 = vst.msk [vmem:[%s1322_s3 + $0x60] sm:$0xff] %vm318_vm0, %v648_v16  ;;  %v651_v23 = vsel %vm539_vm1, %v956_v48, %v1190_v35 }
 0x13f   :  { %v960_v34 = vpop.eup %959  ;;  %667 = vst.msk [vmem:[%s1322_s3 + $0x78] sm:$0xff] %vm318_vm0, %v651_v23  ;;  %v649_v30 = vsel %vm539_vm1, %v958_v33, %v1198_v45 }
 0x140   :  { %v646_v36 = vsel %vm539_vm1, %v960_v34, %v1208_v50  ;;  %665 = vst.msk [vmem:[%s1322_s3 + $0x68] sm:$0xff] %vm318_vm0, %v649_v30 }
 0x141   :  { %662 = vst.msk [vmem:[%s1322_s3 + $0x50] sm:$0xff] %vm318_vm0, %v646_v36 }
 0x142   :  { %v962_v35 = vpop.eup %961 }
 0x143   :  { %v647_v1 = vsel %vm539_vm1, %v962_v35, %v1228_v56 }
 0x144   :  { %663 = vst.msk [vmem:[%s1322_s3 + $0x58] sm:$0xff] %vm318_vm0, %v647_v1 }

// kernel: feature_fusor_forward.11
= control target key start
LH: loop header
LB: loop body
LE: loop exit
PB: predicated region body
PF: predicated region fallthrough
CT: control target
= control target key end

     0   :  { %vm372_vm0 = vcmask 523264   ;;  %vm557_vm2 = vcmask 261120   ;;  %s932_s1 = inlined_call_operand.vmem [shape: bf16[576,32], index: 1, kind: input, shape index: {}]   ;;  %s933_s0 = inlined_call_operand.vmem [shape: bf16[32,576], index: 0, kind: input, shape index: {}]   ;;  %s934_s2 = inlined_call_operand.vmem [shape: f32[1,32], index: 2, kind: input, shape index: {}]   ;;  %s935_s3 = inlined_call_operand.vmem [shape: f32[32,32], index: 3, kind: output, shape index: {}]  }
   0x1   :  { %v693_v0 = vld [vmem:[%s932_s1 + $0x40] sm:$0xff]   ;;  %v697_v4 = vld [vmem:[%s932_s1 + $0x48] sm:$0xff]   ;;  %v701_v8 = vld [vmem:[%s932_s1 + $0x50] sm:$0xff]  }
   0x2   :  { %v694_v1 = vld [vmem:[%s932_s1] sm:$0xff]   ;;  %619 = vmatprep.subr.bf16.mxu0 %v693_v0  ;;  %v698_v5 = vld [vmem:[%s932_s1 + $0x8] sm:$0xff]   ;;  %v702_v9 = vld [vmem:[%s932_s1 + $0x10] sm:$0xff]  }
   0x3   :  { %v695_v2 = vld [vmem:[%s932_s1 + $0xc0] sm:$0xff]   ;;  %620 = vmatpush3.bf16.msra.mxu0 %v694_v1  ;;  %v699_v6 = vld [vmem:[%s932_s1 + $0xc8] sm:$0xff]   ;;  %v703_v10 = vld [vmem:[%s932_s1 + $0xd0] sm:$0xff]  }
   0x4   :  { %v696_v3 = vld [vmem:[%s932_s1 + $0x80] sm:$0xff]   ;;  %647 = vmatprep.subr.bf16.mxu1 %v695_v2  ;;  %621 = vmatprep.subr.bf16.mxu0 %v697_v4  ;;  %v700_v7 = vld [vmem:[%s932_s1 + $0x88] sm:$0xff]   ;;  %v704_v11 = vld [vmem:[%s932_s1 + $0x90] sm:$0xff]  }
   0x5   :  { %648 = vmatpush3.bf16.msra.mxu1 %v696_v3  ;;  %v705_v12 = vld [vmem:[%s932_s1 + $0x58] sm:$0xff]   ;;  %v709_v16 = vld [vmem:[%s932_s1 + $0x60] sm:$0xff]   ;;  %v713_v20 = vld [vmem:[%s932_s1 + $0x68] sm:$0xff]  }
   0x6   :  { %649 = vmatprep.subr.bf16.mxu1 %v699_v6  ;;  %v706_v13 = vld [vmem:[%s932_s1 + $0x18] sm:$0xff]   ;;  %v710_v17 = vld [vmem:[%s932_s1 + $0x20] sm:$0xff]   ;;  %v714_v21 = vld [vmem:[%s932_s1 + $0x28] sm:$0xff]  }
   0x7   :  { %622 = vmatpush3.bf16.msra.mxu0 %v698_v5  ;;  %v707_v14 = vld [vmem:[%s932_s1 + $0xd8] sm:$0xff]   ;;  %v711_v18 = vld [vmem:[%s932_s1 + $0xe0] sm:$0xff]   ;;  %v715_v22 = vld [vmem:[%s932_s1 + $0xe8] sm:$0xff]  }
   0x8   :  { %623 = vmatprep.subr.bf16.mxu0 %v701_v8  ;;  %v708_v15 = vld [vmem:[%s932_s1 + $0x98] sm:$0xff]   ;;  %v712_v19 = vld [vmem:[%s932_s1 + $0xa0] sm:$0xff]   ;;  %v716_v23 = vld [vmem:[%s932_s1 + $0xa8] sm:$0xff]  }
   0x9   :  { %650 = vmatpush3.bf16.msra.mxu1 %v700_v7  ;;  %v717_v24 = vld [vmem:[%s932_s1 + $0x70] sm:$0xff]   ;;  %v721_v28 = vld [vmem:[%s932_s1 + $0x78] sm:$0xff]   ;;  %v728_v34 = vld [vmem:[%s932_s1 + $0x100] sm:$0xff]  }
   0xa   :  { %651 = vmatprep.subr.bf16.mxu1 %v703_v10  ;;  %v718_v25 = vld [vmem:[%s932_s1 + $0x30] sm:$0xff]   ;;  %v722_v29 = vld [vmem:[%s932_s1 + $0x38] sm:$0xff]   ;;  %v731_v36 = vld [vmem:[%s933_s0 + $0xc] ss:$20 sps:$4 sm:$0xff]  }
   0xb   :  { %624 = vmatpush3.bf16.msra.mxu0 %v702_v9  ;;  %v719_v26 = vld [vmem:[%s932_s1 + $0xf0] sm:$0xff]   ;;  %v723_v30 = vld [vmem:[%s932_s1 + $0xf8] sm:$0xff]   ;;  %v732_v37 = vld [vmem:[%s932_s1 + $0x108] sm:$0xff]   ;;  %460 = vmatprep.mubr.bf16.mxu1 %v731_v36 }
   0xc   :  { %625 = vmatprep.subr.bf16.mxu0 %v705_v12  ;;  %v720_v27 = vld [vmem:[%s932_s1 + $0xb0] sm:$0xff]   ;;  %v726_v32 = vld [vmem:[%s933_s0 + $0x4] ss:$20 sps:$4 sm:$0xff]   ;;  %v729_v35 = vld [vmem:[%s933_s0 + $0x8] ss:$20 sps:$4 sm:$0xff]  }
   0xd   :  { %652 = vmatpush3.bf16.msra.mxu1 %v704_v11  ;;  %v724_v31 = vld [vmem:[%s933_s0] ss:$20 sps:$4 sm:$0xff]   ;;  %v727_v33 = vld [vmem:[%s932_s1 + $0xb8] sm:$0xff]   ;;  %411 = vmatprep.mubr.bf16.mxu0 %v726_v32  ;;  %v739_v42 = vld [vmem:[%s933_s0 + $0x30] ss:$20 sps:$4 sm:$0xff]  }
   0xe   :  { %653 = vmatprep.subr.bf16.mxu1 %v707_v14  ;;  %v733_v38 = vld [vmem:[%s933_s0 + $0x2c] ss:$20 sps:$4 sm:$0xff]   ;;  %v735_v39 = vld [vmem:[%s933_s0 + $0x28] ss:$20 sps:$4 sm:$0xff]   ;;  %v736_v40 = vld [vmem:[%s932_s1 + $0x110] sm:$0xff]  }
   0xf   :  { %626 = vmatpush3.bf16.msra.mxu0 %v706_v13  ;;  %v737_v41 = vld [vmem:[%s933_s0 + $0x34] ss:$20 sps:$4 sm:$0xff]   ;;  %v740_v43 = vld [vmem:[%s932_s1 + $0x118] sm:$0xff]   ;;  %v741_v44 = vld [vmem:[%s933_s0 + $0x10] ss:$20 sps:$4 sm:$0xff]  }
  0x10   :  { %627 = vmatprep.subr.bf16.mxu0 %v709_v16  ;;  %v742_v45 = vld [vmem:[%s933_s0 + $0x38] ss:$20 sps:$4 sm:$0xff]   ;;  %v566_v47 = vld [vmem:[%s934_s2] ss:$0 sm:$0xff] }
  0x11   :  { %654 = vmatpush3.bf16.msra.mxu1 %v708_v15 }
  0x12   :  { %655 = vmatprep.subr.bf16.mxu1 %v711_v18 }
  0x13   :  { %628 = vmatpush3.bf16.msra.mxu0 %v710_v17 }
  0x14   :  { %629 = vmatprep.subr.bf16.mxu0 %v713_v20 }
  0x15   :  { %656 = vmatpush3.bf16.msra.mxu1 %v712_v19 }
  0x16   :  { %657 = vmatprep.subr.bf16.mxu1 %v715_v22 }
  0x17   :  { %630 = vmatpush3.bf16.msra.mxu0 %v714_v21 }
  0x18   :  { %631 = vmatprep.subr.bf16.mxu0 %v717_v24 }
  0x19   :  { %658 = vmatpush3.bf16.msra.mxu1 %v716_v23 }
  0x1a   :  { %659 = vmatprep.subr.bf16.mxu1 %v719_v26 }
  0x1b   :  { %632 = vmatpush3.bf16.msra.mxu0 %v718_v25 }
  0x1c   :  { %633 = vmatprep.subr.bf16.mxu0 %v721_v28 }
  0x1d   :  { %660 = vmatpush3.bf16.msra.mxu1 %v720_v27 }
  0x1e   :  { %661 = vmatprep.subr.bf16.mxu1 %v723_v30 }
  0x1f   :  { %634 = vmatpush3.bf16.msra.mxu0 %v722_v29 }
  0x20   :  { %681 = vmatprep.subr.bf16.mxu0 %v728_v34 }
  0x21   :  { %662 = vmatpush3.bf16.msra.mxu1 %v727_v33  ;;  %v526_v33 = vlaneseq }
  0x22   :  { %412 = vmatmul.mubr.bf16.vlgmr.msra.gmra.mrb[0].mxu0 %v724_v31 }
  0x23   :  { %682 = vmatpush3.bf16.msra.mxu0 %v728_v34  ;;  %419 = vmatprep.mubr.bf16.mxu0 %v733_v38  ;;  %v527_v36 = vand.u32 127, %v526_v33 }
  0x24   :  { %461 = vmatmul.mubr.bf16.vlgmr.msra.gmra.mrb[0].mxu1 %v729_v35  ;;  %683 = vmatprep.subr.bf16.mxu0 %v732_v37 }
  0x25   :  { %468 = vmatprep.mubr.bf16.mxu1 %v737_v41  ;;  %vm528_vm1 = vcmp.ge.s32.totalorder %v527_v36, 18 }
  0x27   :  { %684 = vmatpush3.bf16.msra.mxu0 %v732_v37 }
  0x28   :  { %685 = vmatprep.subr.bf16.mxu0 %v736_v40 }
  0x2a   :  { %420 = vmatmul.mubr.bf16.gmra.mrb[4].mxu0 %v735_v39 }
  0x2b   :  { %689 = vmatprep.mubr.msk.bf16.mxu0 %vm372_vm0, %v741_v44  ;;  %686 = vmatpush3.bf16.msra.mxu0 %v736_v40 }
  0x2c   :  { %469 = vmatmul.mubr.bf16.gmra.mrb[4].mxu1 %v739_v42  ;;  %687 = vmatprep.subr.bf16.mxu0 %v740_v43 }
  0x2f   :  { %688 = vmatpush3.bf16.msra.mxu0 %v740_v43 }
  0x32   :  { %690 = vmatmul.mubr.msk.bf16.vlgmr.msra.gmra.mrb[8].mxu0 %vm372_vm0, %v742_v45 }
  0xf5   :  { %v635_v46 = vpop.f32.mrb[0].mxu0 }
  0xf6   :  { %v636_v48 = vpop.f32.mrb[1].mxu0 }
  0xf7   :  { %v637_v49 = vadd.f32 %v636_v48, %v635_v46  ;;  %v638_v50 = vpop.f32.mrb[2].mxu0  ;;  %v663_v51 = vpop.f32.mrb[0].mxu1 }
  0xf8   :  { %v639_v52 = vpop.f32.mrb[3].mxu0  ;;  %v664_v55 = vpop.f32.mrb[1].mxu1 }
  0xf9   :  { %v414_v53 = vadd.f32 %v637_v49, %v566_v47  ;;  %v640_v54 = vadd.f32 %v639_v52, %v638_v50  ;;  %v665_v56 = vadd.f32 %v664_v55, %v663_v51  ;;  %v666_v57 = vpop.f32.mrb[2].mxu1 }
  0xfa   :  { %v667_v59 = vpop.f32.mrb[3].mxu1 }
  0xfb   :  { %v417_v58 = vadd.f32 %v640_v54, %v566_v47  ;;  %v668_v60 = vadd.f32 %v667_v59, %v666_v57  ;;  %v463_v61 = vadd.f32 %v665_v56, %v414_v53 }
  0xfd   :  { %v641_v62 = vpop.f32.mrb[4].mxu0  ;;  %v466_v0 = vadd.f32 %v668_v60, %v417_v58 }
  0xfe   :  { %v642_v63 = vpop.f32.mrb[5].mxu0 }
  0xff   :  { %v643_v1 = vadd.f32 %v642_v63, %v641_v62  ;;  %v644_v2 = vpop.f32.mrb[6].mxu0  ;;  %v669_v3 = vpop.f32.mrb[4].mxu1 }
 0x100   :  { %v645_v4 = vpop.f32.mrb[7].mxu0  ;;  %v670_v7 = vpop.f32.mrb[5].mxu1 }
 0x101   :  { %v422_v5 = vadd.f32 %v643_v1, %v566_v47  ;;  %v646_v6 = vadd.f32 %v645_v4, %v644_v2  ;;  %v671_v8 = vadd.f32 %v670_v7, %v669_v3  ;;  %v672_v9 = vpop.f32.mrb[6].mxu1 }
 0x102   :  { %v673_v11 = vpop.f32.mrb[7].mxu1 }
 0x103   :  { %v425_v10 = vadd.f32 %v646_v6, %v566_v47  ;;  %v674_v12 = vadd.f32 %v673_v11, %v672_v9  ;;  %v471_v13 = vadd.f32 %v671_v8, %v422_v5 }
 0x105   :  { %v691_v14 = vpop.f32.mrb[8].mxu0  ;;  %v474_v15 = vadd.f32 %v674_v12, %v425_v10 }
 0x106   :  { %v520_v16 = vadd.f32 %v691_v14, %v471_v13  ;;  %v511_v17 = vpop.f32.mrb[9].mxu0 }
 0x107   :  { %v512_v18 = vadd.f32 %v511_v17, %v463_v61  ;;  %v692_v19 = vpop.f32.mrb[10].mxu0 }
 0x108   :  { %v617_v20 = vmul.f32 -1.442695, %v520_v16  ;;  %v523_v21 = vadd.f32 %v692_v19, %v474_v15  ;;  %v514_v22 = vpop.f32.mrb[11].mxu0 }
 0x109   :  { %v615_v23 = vmul.f32 -1.442695, %v512_v18  ;;  %v515_v24 = vadd.f32 %v514_v22, %v466_v0 }
 0x10a   :  { %743 = vpow2.f32 %v617_v20  ;;  %v618_v25 = vmul.f32 -1.442695, %v523_v21 }
 0x10b   :  { %745 = vpow2.f32 %v615_v23  ;;  %v616_v26 = vmul.f32 -1.442695, %v515_v24 }
 0x10c   :  { %747 = vpow2.f32 %v618_v25 }
 0x10d   :  { %749 = vpow2.f32 %v616_v26 }
 0x114   :  { %v744_v27 = vpop.eup %743 }
 0x115   :  { %v746_v28 = vpop.eup %745  ;;  %v543_v29 = vadd.f32 1.0, %v744_v27 }
 0x116   :  { %v748_v30 = vpop.eup %747  ;;  %v541_v31 = vadd.f32 1.0, %v746_v28 }
 0x117   :  { %v750_v32 = vpop.eup %749  ;;  %751 = vrcp.f32 %v543_v29  ;;  %v544_v34 = vadd.f32 1.0, %v748_v30 }
 0x118   :  { %753 = vrcp.f32 %v541_v31  ;;  %v542_v35 = vadd.f32 1.0, %v750_v32 }
 0x119   :  { %755 = vrcp.f32 %v544_v34 }
 0x11a   :  { %757 = vrcp.f32 %v542_v35 }
 0x121   :  { %v752_v37 = vpop.eup %751 }
 0x122   :  { %v754_v38 = vpop.eup %753  ;;  %v555_v39 = vsel %vm528_vm1, %v752_v37, %v520_v16 }
 0x123   :  { %v756_v40 = vpop.eup %755  ;;  %560 = vst.msk [vmem:[%s935_s3 + $0x10] sm:$0xff] %vm557_vm2, %v555_v39  ;;  %v553_v41 = vsel %vm528_vm1, %v754_v38, %v512_v18 }
 0x124   :  { %v758_v42 = vpop.eup %757  ;;  %558 = vst.msk [vmem:[%s935_s3] sm:$0xff] %vm557_vm2, %v553_v41  ;;  %v556_v43 = vsel %vm528_vm1, %v756_v40, %v523_v21 }
 0x125   :  { %561 = vst.msk [vmem:[%s935_s3 + $0x18] sm:$0xff] %vm557_vm2, %v556_v43  ;;  %v554_v44 = vsel %vm528_vm1, %v758_v42, %v515_v24 }
 0x126   :  { %559 = vst.msk [vmem:[%s935_s3 + $0x8] sm:$0xff] %vm557_vm2, %v554_v44 }

// kernel: feature_fusor_forward.12
= control target key start
LH: loop header
LB: loop body
LE: loop exit
PB: predicated region body
PF: predicated region fallthrough
CT: control target
= control target key end

     0   :  { %vm372_vm0 = vcmask 523264   ;;  %vm530_vm1 = vcmask 261120   ;;  %s885_s1 = inlined_call_operand.vmem [shape: bf16[576,32], index: 1, kind: input, shape index: {}]   ;;  %s886_s0 = inlined_call_operand.vmem [shape: bf16[32,576], index: 0, kind: input, shape index: {}]   ;;  %s887_s2 = inlined_call_operand.vmem [shape: f32[1,32], index: 2, kind: input, shape index: {}]   ;;  %s888_s3 = inlined_call_operand.vmem [shape: f32[32,32], index: 3, kind: output, shape index: {}]  }
   0x1   :  { %v662_v0 = vld [vmem:[%s885_s1 + $0x40] sm:$0xff]   ;;  %v666_v4 = vld [vmem:[%s885_s1 + $0x48] sm:$0xff]   ;;  %v670_v8 = vld [vmem:[%s885_s1 + $0x50] sm:$0xff]  }
   0x2   :  { %v663_v1 = vld [vmem:[%s885_s1] sm:$0xff]   ;;  %588 = vmatprep.subr.bf16.mxu0 %v662_v0  ;;  %v667_v5 = vld [vmem:[%s885_s1 + $0x8] sm:$0xff]   ;;  %v671_v9 = vld [vmem:[%s885_s1 + $0x10] sm:$0xff]  }
   0x3   :  { %v664_v2 = vld [vmem:[%s885_s1 + $0xc0] sm:$0xff]   ;;  %589 = vmatpush3.bf16.msra.mxu0 %v663_v1  ;;  %v668_v6 = vld [vmem:[%s885_s1 + $0xc8] sm:$0xff]   ;;  %v672_v10 = vld [vmem:[%s885_s1 + $0xd0] sm:$0xff]  }
   0x4   :  { %v665_v3 = vld [vmem:[%s885_s1 + $0x80] sm:$0xff]   ;;  %616 = vmatprep.subr.bf16.mxu1 %v664_v2  ;;  %590 = vmatprep.subr.bf16.mxu0 %v666_v4  ;;  %v669_v7 = vld [vmem:[%s885_s1 + $0x88] sm:$0xff]   ;;  %v673_v11 = vld [vmem:[%s885_s1 + $0x90] sm:$0xff]  }
   0x5   :  { %617 = vmatpush3.bf16.msra.mxu1 %v665_v3  ;;  %v674_v12 = vld [vmem:[%s885_s1 + $0x58] sm:$0xff]   ;;  %v678_v16 = vld [vmem:[%s885_s1 + $0x60] sm:$0xff]   ;;  %v682_v20 = vld [vmem:[%s885_s1 + $0x68] sm:$0xff]  }
   0x6   :  { %618 = vmatprep.subr.bf16.mxu1 %v668_v6  ;;  %v675_v13 = vld [vmem:[%s885_s1 + $0x18] sm:$0xff]   ;;  %v679_v17 = vld [vmem:[%s885_s1 + $0x20] sm:$0xff]   ;;  %v683_v21 = vld [vmem:[%s885_s1 + $0x28] sm:$0xff]  }
   0x7   :  { %591 = vmatpush3.bf16.msra.mxu0 %v667_v5  ;;  %v676_v14 = vld [vmem:[%s885_s1 + $0xd8] sm:$0xff]   ;;  %v680_v18 = vld [vmem:[%s885_s1 + $0xe0] sm:$0xff]   ;;  %v684_v22 = vld [vmem:[%s885_s1 + $0xe8] sm:$0xff]  }
   0x8   :  { %592 = vmatprep.subr.bf16.mxu0 %v670_v8  ;;  %v677_v15 = vld [vmem:[%s885_s1 + $0x98] sm:$0xff]   ;;  %v681_v19 = vld [vmem:[%s885_s1 + $0xa0] sm:$0xff]   ;;  %v685_v23 = vld [vmem:[%s885_s1 + $0xa8] sm:$0xff]  }
   0x9   :  { %619 = vmatpush3.bf16.msra.mxu1 %v669_v7  ;;  %v686_v24 = vld [vmem:[%s885_s1 + $0x70] sm:$0xff]   ;;  %v690_v28 = vld [vmem:[%s885_s1 + $0x78] sm:$0xff]   ;;  %v697_v34 = vld [vmem:[%s885_s1 + $0x100] sm:$0xff]  }
   0xa   :  { %620 = vmatprep.subr.bf16.mxu1 %v672_v10  ;;  %v687_v25 = vld [vmem:[%s885_s1 + $0x30] sm:$0xff]   ;;  %v691_v29 = vld [vmem:[%s885_s1 + $0x38] sm:$0xff]   ;;  %v700_v36 = vld [vmem:[%s886_s0 + $0xc] ss:$20 sps:$4 sm:$0xff]  }
   0xb   :  { %593 = vmatpush3.bf16.msra.mxu0 %v671_v9  ;;  %v688_v26 = vld [vmem:[%s885_s1 + $0xf0] sm:$0xff]   ;;  %v692_v30 = vld [vmem:[%s885_s1 + $0xf8] sm:$0xff]   ;;  %v701_v37 = vld [vmem:[%s885_s1 + $0x108] sm:$0xff]   ;;  %460 = vmatprep.mubr.bf16.mxu1 %v700_v36 }
   0xc   :  { %594 = vmatprep.subr.bf16.mxu0 %v674_v12  ;;  %v689_v27 = vld [vmem:[%s885_s1 + $0xb0] sm:$0xff]   ;;  %v695_v32 = vld [vmem:[%s886_s0 + $0x4] ss:$20 sps:$4 sm:$0xff]   ;;  %v698_v35 = vld [vmem:[%s886_s0 + $0x8] ss:$20 sps:$4 sm:$0xff]  }
   0xd   :  { %621 = vmatpush3.bf16.msra.mxu1 %v673_v11  ;;  %v693_v31 = vld [vmem:[%s886_s0] ss:$20 sps:$4 sm:$0xff]   ;;  %v696_v33 = vld [vmem:[%s885_s1 + $0xb8] sm:$0xff]   ;;  %411 = vmatprep.mubr.bf16.mxu0 %v695_v32  ;;  %v708_v42 = vld [vmem:[%s886_s0 + $0x30] ss:$20 sps:$4 sm:$0xff]  }
   0xe   :  { %622 = vmatprep.subr.bf16.mxu1 %v676_v14  ;;  %v702_v38 = vld [vmem:[%s886_s0 + $0x2c] ss:$20 sps:$4 sm:$0xff]   ;;  %v704_v39 = vld [vmem:[%s886_s0 + $0x28] ss:$20 sps:$4 sm:$0xff]   ;;  %v705_v40 = vld [vmem:[%s885_s1 + $0x110] sm:$0xff]  }
   0xf   :  { %595 = vmatpush3.bf16.msra.mxu0 %v675_v13  ;;  %v706_v41 = vld [vmem:[%s886_s0 + $0x34] ss:$20 sps:$4 sm:$0xff]   ;;  %v709_v43 = vld [vmem:[%s885_s1 + $0x118] sm:$0xff]   ;;  %v710_v44 = vld [vmem:[%s886_s0 + $0x10] ss:$20 sps:$4 sm:$0xff]  }
  0x10   :  { %596 = vmatprep.subr.bf16.mxu0 %v678_v16  ;;  %v711_v45 = vld [vmem:[%s886_s0 + $0x38] ss:$20 sps:$4 sm:$0xff]   ;;  %v539_v47 = vld [vmem:[%s887_s2] ss:$0 sm:$0xff] }
  0x11   :  { %623 = vmatpush3.bf16.msra.mxu1 %v677_v15 }
  0x12   :  { %624 = vmatprep.subr.bf16.mxu1 %v680_v18 }
  0x13   :  { %597 = vmatpush3.bf16.msra.mxu0 %v679_v17 }
  0x14   :  { %598 = vmatprep.subr.bf16.mxu0 %v682_v20 }
  0x15   :  { %625 = vmatpush3.bf16.msra.mxu1 %v681_v19 }
  0x16   :  { %626 = vmatprep.subr.bf16.mxu1 %v684_v22 }
  0x17   :  { %599 = vmatpush3.bf16.msra.mxu0 %v683_v21 }
  0x18   :  { %600 = vmatprep.subr.bf16.mxu0 %v686_v24 }
  0x19   :  { %627 = vmatpush3.bf16.msra.mxu1 %v685_v23 }
  0x1a   :  { %628 = vmatprep.subr.bf16.mxu1 %v688_v26 }
  0x1b   :  { %601 = vmatpush3.bf16.msra.mxu0 %v687_v25 }
  0x1c   :  { %602 = vmatprep.subr.bf16.mxu0 %v690_v28 }
  0x1d   :  { %629 = vmatpush3.bf16.msra.mxu1 %v689_v27 }
  0x1e   :  { %630 = vmatprep.subr.bf16.mxu1 %v692_v30 }
  0x1f   :  { %603 = vmatpush3.bf16.msra.mxu0 %v691_v29 }
  0x20   :  { %650 = vmatprep.subr.bf16.mxu0 %v697_v34 }
  0x21   :  { %631 = vmatpush3.bf16.msra.mxu1 %v696_v33 }
  0x22   :  { %412 = vmatmul.mubr.bf16.vlgmr.msra.gmra.mrb[0].mxu0 %v693_v31 }
  0x23   :  { %651 = vmatpush3.bf16.msra.mxu0 %v697_v34  ;;  %419 = vmatprep.mubr.bf16.mxu0 %v702_v38 }
  0x24   :  { %461 = vmatmul.mubr.bf16.vlgmr.msra.gmra.mrb[0].mxu1 %v698_v35  ;;  %652 = vmatprep.subr.bf16.mxu0 %v701_v37 }
  0x25   :  { %468 = vmatprep.mubr.bf16.mxu1 %v706_v41 }
  0x27   :  { %653 = vmatpush3.bf16.msra.mxu0 %v701_v37 }
  0x28   :  { %654 = vmatprep.subr.bf16.mxu0 %v705_v40 }
  0x2a   :  { %420 = vmatmul.mubr.bf16.gmra.mrb[4].mxu0 %v704_v39 }
  0x2b   :  { %658 = vmatprep.mubr.msk.bf16.mxu0 %vm372_vm0, %v710_v44  ;;  %655 = vmatpush3.bf16.msra.mxu0 %v705_v40 }
  0x2c   :  { %469 = vmatmul.mubr.bf16.gmra.mrb[4].mxu1 %v708_v42  ;;  %656 = vmatprep.subr.bf16.mxu0 %v709_v43 }
  0x2f   :  { %657 = vmatpush3.bf16.msra.mxu0 %v709_v43 }
  0x32   :  { %659 = vmatmul.mubr.msk.bf16.vlgmr.msra.gmra.mrb[8].mxu0 %vm372_vm0, %v711_v45 }
  0xf5   :  { %v604_v46 = vpop.f32.mrb[0].mxu0 }
  0xf6   :  { %v605_v48 = vpop.f32.mrb[1].mxu0 }
  0xf7   :  { %v606_v49 = vadd.f32 %v605_v48, %v604_v46  ;;  %v607_v50 = vpop.f32.mrb[2].mxu0  ;;  %v632_v51 = vpop.f32.mrb[0].mxu1 }
  0xf8   :  { %v608_v52 = vpop.f32.mrb[3].mxu0  ;;  %v633_v55 = vpop.f32.mrb[1].mxu1 }
  0xf9   :  { %v414_v53 = vadd.f32 %v606_v49, %v539_v47  ;;  %v609_v54 = vadd.f32 %v608_v52, %v607_v50  ;;  %v634_v56 = vadd.f32 %v633_v55, %v632_v51  ;;  %v635_v57 = vpop.f32.mrb[2].mxu1 }
  0xfa   :  { %v636_v59 = vpop.f32.mrb[3].mxu1 }
  0xfb   :  { %v417_v58 = vadd.f32 %v609_v54, %v539_v47  ;;  %v637_v60 = vadd.f32 %v636_v59, %v635_v57  ;;  %v463_v61 = vadd.f32 %v634_v56, %v414_v53 }
  0xfd   :  { %v610_v62 = vpop.f32.mrb[4].mxu0  ;;  %v466_v0 = vadd.f32 %v637_v60, %v417_v58 }
  0xfe   :  { %v611_v63 = vpop.f32.mrb[5].mxu0 }
  0xff   :  { %v612_v1 = vadd.f32 %v611_v63, %v610_v62  ;;  %v613_v2 = vpop.f32.mrb[6].mxu0  ;;  %v638_v3 = vpop.f32.mrb[4].mxu1 }
 0x100   :  { %v614_v4 = vpop.f32.mrb[7].mxu0  ;;  %v639_v7 = vpop.f32.mrb[5].mxu1 }
 0x101   :  { %v422_v5 = vadd.f32 %v612_v1, %v539_v47  ;;  %v615_v6 = vadd.f32 %v614_v4, %v613_v2  ;;  %v640_v8 = vadd.f32 %v639_v7, %v638_v3  ;;  %v641_v9 = vpop.f32.mrb[6].mxu1 }
 0x102   :  { %v642_v11 = vpop.f32.mrb[7].mxu1 }
 0x103   :  { %v425_v10 = vadd.f32 %v615_v6, %v539_v47  ;;  %v643_v12 = vadd.f32 %v642_v11, %v641_v9  ;;  %v471_v13 = vadd.f32 %v640_v8, %v422_v5 }
 0x105   :  { %v660_v14 = vpop.f32.mrb[8].mxu0  ;;  %v474_v15 = vadd.f32 %v643_v12, %v425_v10 }
 0x106   :  { %v520_v16 = vadd.f32 %v660_v14, %v471_v13  ;;  %v511_v17 = vpop.f32.mrb[9].mxu0 }
 0x107   :  { %v512_v18 = vadd.f32 %v511_v17, %v463_v61  ;;  %v661_v19 = vpop.f32.mrb[10].mxu0 }
 0x108   :  { %v528_v20 = vmax.f32 %v520_v16, 0.0  ;;  %v523_v21 = vadd.f32 %v661_v19, %v474_v15  ;;  %v514_v22 = vpop.f32.mrb[11].mxu0 }
 0x109   :  { %v526_v23 = vmax.f32 %v512_v18, 0.0  ;;  %v515_v24 = vadd.f32 %v514_v22, %v466_v0 }
 0x10a   :  { %533 = vst.msk [vmem:[%s888_s3 + $0x10] sm:$0xff] %vm530_vm1, %v528_v20  ;;  %v529_v25 = vmax.f32 %v523_v21, 0.0 }
 0x10b   :  { %531 = vst.msk [vmem:[%s888_s3] sm:$0xff] %vm530_vm1, %v526_v23  ;;  %v527_v26 = vmax.f32 %v515_v24, 0.0 }
 0x10c   :  { %534 = vst.msk [vmem:[%s888_s3 + $0x18] sm:$0xff] %vm530_vm1, %v529_v25 }
 0x10d   :  { %532 = vst.msk [vmem:[%s888_s3 + $0x8] sm:$0xff] %vm530_vm1, %v527_v26 }

// kernel: feature_fusor_forward.14
= control target key start
LH: loop header
LB: loop body
LE: loop exit
PB: predicated region body
PF: predicated region fallthrough
CT: control target
= control target key end

     0   :  { %vm321_vm0 = vcmask 261120   ;;  %s1123_s1 = inlined_call_operand.vmem [shape: bf16[288,32], index: 1, kind: input, shape index: {}]   ;;  %s1124_s0 = inlined_call_operand.vmem [shape: bf16[128,288], index: 0, kind: input, shape index: {}]   ;;  %s1125_s2 = inlined_call_operand.vmem [shape: f32[1,32], index: 2, kind: input, shape index: {}]   ;;  %s1126_s3 = inlined_call_operand.vmem [shape: f32[128,32], index: 3, kind: input, shape index: {}]   ;;  %s1127_s4 = inlined_call_operand.vmem [shape: f32[128,32], index: 4, kind: output, shape index: {}]  }
   0x1   :  { %v769_v0 = vld [vmem:[%s1123_s1 + $0x40] sm:$0xff]   ;;  %v771_v2 = vld [vmem:[%s1123_s1 + $0x48] sm:$0xff]   ;;  %v773_v4 = vld [vmem:[%s1123_s1 + $0x50] sm:$0xff]  }
   0x2   :  { %v770_v1 = vld [vmem:[%s1123_s1] sm:$0xff]   ;;  %659 = vmatprep.subr.bf16.mxu0 %v769_v0  ;;  %753 = vmatprep.subr.bf16.mxu1 %v769_v0  ;;  %v772_v3 = vld [vmem:[%s1123_s1 + $0x8] sm:$0xff]   ;;  %v774_v5 = vld [vmem:[%s1123_s1 + $0x10] sm:$0xff]  }
   0x3   :  { %660 = vmatpush3.bf16.msra.mxu0 %v770_v1  ;;  %761 = vmatpush3.bf16.msra.mxu1 %v770_v1  ;;  %v775_v6 = vld [vmem:[%s1123_s1 + $0x58] sm:$0xff]   ;;  %v777_v8 = vld [vmem:[%s1123_s1 + $0x60] sm:$0xff]   ;;  %v779_v10 = vld [vmem:[%s1123_s1 + $0x68] sm:$0xff]  }
   0x4   :  { %661 = vmatprep.subr.bf16.mxu0 %v771_v2  ;;  %754 = vmatprep.subr.bf16.mxu1 %v771_v2  ;;  %v776_v7 = vld [vmem:[%s1123_s1 + $0x18] sm:$0xff]   ;;  %v778_v9 = vld [vmem:[%s1123_s1 + $0x20] sm:$0xff]   ;;  %v780_v13 = vld [vmem:[%s1123_s1 + $0x28] sm:$0xff]  }
   0x5   :  { %v787_v11 = vld [vmem:[%s1124_s0 + $0x4] ss:$12 sps:$4 sm:$0xff]   ;;  %v790_v12 = vld [vmem:[%s1124_s0 + $0x94] ss:$12 sps:$4 sm:$0xff]   ;;  %v783_v16 = vld [vmem:[%s1123_s1 + $0x78] sm:$0xff]  }
   0x6   :  { %v781_v14 = vld [vmem:[%s1123_s1 + $0x70] sm:$0xff]   ;;  %378 = vmatprep.mubr.bf16.mxu0 %v787_v11  ;;  %426 = vmatprep.mubr.bf16.mxu1 %v790_v12  ;;  %v784_v17 = vld [vmem:[%s1123_s1 + $0x38] sm:$0xff]   ;;  %v785_v18 = vld [vmem:[%s1124_s0] ss:$12 sps:$4 sm:$0xff]  }
   0x7   :  { %662 = vmatpush3.bf16.msra.mxu0 %v772_v3  ;;  %762 = vmatpush3.bf16.msra.mxu1 %v772_v3  ;;  %v782_v15 = vld [vmem:[%s1123_s1 + $0x30] sm:$0xff]   ;;  %v791_v19 = vld [vmem:[%s1123_s1 + $0x80] sm:$0xff]   ;;  %v792_v21 = vld [vmem:[%s1124_s0 + $0x1c] ss:$12 sps:$4 sm:$0xff]  }
   0x8   :  { %663 = vmatprep.subr.bf16.mxu0 %v773_v4  ;;  %755 = vmatprep.subr.bf16.mxu1 %v773_v4  ;;  %v788_v20 = vld [vmem:[%s1124_s0 + $0x90] ss:$12 sps:$4 sm:$0xff]   ;;  %v794_v22 = vld [vmem:[%s1124_s0 + $0xac] ss:$12 sps:$4 sm:$0xff]   ;;  %v797_v25 = vld [vmem:[%s1124_s0 + $0xa8] ss:$12 sps:$4 sm:$0xff]  }
   0x9   :  { %v798_v23 = vld [vmem:[%s1123_s1 + $0x88] sm:$0xff]   ;;  %v796_v24 = vld [vmem:[%s1124_s0 + $0x18] ss:$12 sps:$4 sm:$0xff]   ;;  %v799_v26 = vld [vmem:[%s1124_s0 + $0x34] ss:$12 sps:$4 sm:$0xff]  }
   0xa   :  { %v801_v27 = vld [vmem:[%s1124_s0 + $0x8] ss:$12 sps:$4 sm:$0xff]   ;;  %v802_v28 = vld [vmem:[%s1124_s0 + $0x30] ss:$12 sps:$4 sm:$0xff]   ;;  %v803_v29 = vld [vmem:[%s1124_s0 + $0x20] ss:$12 sps:$4 sm:$0xff]  }
   0xb   :  { %664 = vmatpush3.bf16.msra.mxu0 %v774_v5  ;;  %763 = vmatpush3.bf16.msra.mxu1 %v774_v5  ;;  %v804_v30 = vld [vmem:[%s1124_s0 + $0x4c] ss:$12 sps:$4 sm:$0xff]   ;;  %v807_v32 = vld [vmem:[%s1124_s0 + $0x48] ss:$12 sps:$4 sm:$0xff]   ;;  %v808_v33 = vld [vmem:[%s1124_s0 + $0x50] ss:$12 sps:$4 sm:$0xff]  }
   0xc   :  { %665 = vmatprep.subr.bf16.mxu0 %v775_v6  ;;  %756 = vmatprep.subr.bf16.mxu1 %v775_v6  ;;  %v806_v31 = vld [vmem:[%s1124_s0 + $0x38] ss:$12 sps:$4 sm:$0xff]   ;;  %v811_v35 = vld [vmem:[%s1124_s0 + $0x68] ss:$12 sps:$4 sm:$0xff]   ;;  %v812_v36 = vld [vmem:[%s1124_s0 + $0x60] ss:$12 sps:$4 sm:$0xff]  }
   0xd   :  { %v809_v34 = vld [vmem:[%s1124_s0 + $0x64] ss:$12 sps:$4 sm:$0xff]   ;;  %v813_v37 = vld [vmem:[%s1124_s0 + $0x80] ss:$12 sps:$4 sm:$0xff]   ;;  %v814_v38 = vld [vmem:[%s1124_s0 + $0x7c] ss:$12 sps:$4 sm:$0xff]  }
   0xe   :  { %v816_v39 = vld [vmem:[%s1124_s0 + $0x98] ss:$12 sps:$4 sm:$0xff]   ;;  %v818_v41 = vld [vmem:[%s1124_s0 + $0xb0] ss:$12 sps:$4 sm:$0xff]   ;;  %v989_v2 = vld [vmem:[%s1125_s2] ss:$0 sm:$0xff] }
   0xf   :  { %666 = vmatpush3.bf16.msra.mxu0 %v776_v7  ;;  %764 = vmatpush3.bf16.msra.mxu1 %v776_v7  ;;  %v817_v40 = vld [vmem:[%s1124_s0 + $0x78] ss:$12 sps:$4 sm:$0xff]   ;;  %v558_v11 = vld [vmem:[%s1126_s3 + $0x10] sm:$0xff] }
  0x10   :  { %667 = vmatprep.subr.bf16.mxu0 %v777_v8  ;;  %757 = vmatprep.subr.bf16.mxu1 %v777_v8 }
  0x13   :  { %668 = vmatpush3.bf16.msra.mxu0 %v778_v9  ;;  %765 = vmatpush3.bf16.msra.mxu1 %v778_v9 }
  0x14   :  { %669 = vmatprep.subr.bf16.mxu0 %v779_v10  ;;  %758 = vmatprep.subr.bf16.mxu1 %v779_v10 }
  0x17   :  { %670 = vmatpush3.bf16.msra.mxu0 %v780_v13  ;;  %766 = vmatpush3.bf16.msra.mxu1 %v780_v13 }
  0x18   :  { %671 = vmatprep.subr.bf16.mxu0 %v781_v14  ;;  %759 = vmatprep.subr.bf16.mxu1 %v781_v14 }
  0x1b   :  { %672 = vmatpush3.bf16.msra.mxu0 %v782_v15  ;;  %767 = vmatpush3.bf16.msra.mxu1 %v782_v15 }
  0x1c   :  { %673 = vmatprep.subr.bf16.mxu0 %v783_v16  ;;  %760 = vmatprep.subr.bf16.mxu1 %v783_v16 }
  0x1f   :  { %674 = vmatpush3.bf16.msra.mxu0 %v784_v17  ;;  %768 = vmatpush3.bf16.msra.mxu1 %v784_v17 }
  0x20   :  { %733 = vmatprep.subr.bf16.mxu1 %v791_v19 }
  0x22   :  { %379 = vmatmul.mubr.bf16.vlgmr.msra.gmra.mrb[0].mxu0 %v785_v18  ;;  %427 = vmatmul.mubr.bf16.vlgmr.msra.gmra.mrb[0].mxu1 %v788_v20  ;;  %v556_v18 = vld [vmem:[%s1126_s3] sm:$0xff] }
  0x23   :  { %734 = vmatpush3.bf16.msra.mxu1 %v791_v19  ;;  %386 = vmatprep.mubr.bf16.mxu0 %v792_v21 }
  0x24   :  { %434 = vmatprep.mubr.bf16.mxu1 %v794_v22  ;;  %735 = vmatprep.subr.bf16.mxu1 %v798_v23 }
  0x27   :  { %736 = vmatpush3.bf16.msra.mxu1 %v798_v23  ;;  %v559_v23 = vld [vmem:[%s1126_s3 + $0x18] sm:$0xff] }
  0x2a   :  { %387 = vmatmul.mubr.bf16.gmra.mrb[4].mxu0 %v796_v24  ;;  %435 = vmatmul.mubr.bf16.gmra.mrb[4].mxu1 %v797_v25 }
  0x2b   :  { %394 = vmatprep.mubr.bf16.mxu0 %v799_v26  ;;  %737 = vmatprep.mubr.msk.bf16.mxu1 %vm321_vm0, %v801_v27 }
  0x32   :  { %395 = vmatmul.mubr.bf16.gmra.mrb[8].mxu0 %v802_v28  ;;  %738 = vmatmul.mubr.msk.bf16.vlgmr.msra.gmra.mrb[8].mxu1 %vm321_vm0, %v803_v29  ;;  %v557_v28 = vld [vmem:[%s1126_s3 + $0x8] sm:$0xff] }
  0x33   :  { %402 = vmatprep.mubr.bf16.mxu0 %v804_v30  ;;  %741 = vmatprep.mubr.msk.bf16.mxu1 %vm321_vm0, %v806_v31 }
  0x3a   :  { %403 = vmatmul.mubr.bf16.gmra.mrb[12].mxu0 %v807_v32  ;;  %742 = vmatmul.mubr.msk.bf16.gmra.mrb[12].mxu1 %vm321_vm0, %v808_v33 }
  0x3b   :  { %410 = vmatprep.mubr.bf16.mxu0 %v809_v34  ;;  %745 = vmatprep.mubr.msk.bf16.mxu1 %vm321_vm0, %v811_v35 }
  0x42   :  { %411 = vmatmul.mubr.bf16.gmra.mrb[16].mxu0 %v812_v36  ;;  %746 = vmatmul.mubr.msk.bf16.gmra.mrb[16].mxu1 %vm321_vm0, %v813_v37 }
  0x43   :  { %418 = vmatprep.mubr.bf16.mxu0 %v814_v38  ;;  %749 = vmatprep.mubr.msk.bf16.mxu1 %vm321_vm0, %v816_v39 }
  0x4a   :  { %419 = vmatmul.mubr.bf16.gmra.mrb[20].mxu0 %v817_v40  ;;  %750 = vmatmul.mubr.msk.bf16.gmra.mrb[20].mxu1 %vm321_vm0, %v818_v41 }
  0xf5   :  { %v675_v42 = vpop.f32.mrb[0].mxu0  ;;  %v711_v43 = vpop.f32.mrb[0].mxu1 }
  0xf6   :  { %v676_v44 = vpop.f32.mrb[1].mxu0  ;;  %v712_v45 = vpop.f32.mrb[1].mxu1 }
  0xf7   :  { %v677_v46 = vadd.f32 %v676_v44, %v675_v42  ;;  %v678_v47 = vpop.f32.mrb[2].mxu0  ;;  %v978_v48 = vadd.f32 %v712_v45, %v711_v43  ;;  %v714_v49 = vpop.f32.mrb[2].mxu1  ;;  %v560_v43 = vld [vmem:[%s1126_s3 + $0x20] sm:$0xff] }
  0xf8   :  { %v679_v50 = vpop.f32.mrb[3].mxu0  ;;  %v715_v51 = vpop.f32.mrb[3].mxu1 }
  0xf9   :  { %v680_v52 = vadd.f32 %v679_v50, %v678_v47  ;;  %v980_v53 = vadd.f32 %v715_v51, %v714_v49  ;;  %v381_v6 = vadd.f32 %v677_v46, %v989_v2  ;;  %v561_v51 = vld [vmem:[%s1126_s3 + $0x28] sm:$0xff] }
  0xfb   :  { %v384_v16 = vadd.f32 %v680_v52, %v989_v2 }
  0xfd   :  { %v681_v54 = vpop.f32.mrb[4].mxu0  ;;  %v717_v55 = vpop.f32.mrb[4].mxu1 }
  0xfe   :  { %v682_v56 = vpop.f32.mrb[5].mxu0  ;;  %v718_v57 = vpop.f32.mrb[5].mxu1 }
  0xff   :  { %v683_v58 = vadd.f32 %v682_v56, %v681_v54  ;;  %v684_v59 = vpop.f32.mrb[6].mxu0  ;;  %v982_v60 = vadd.f32 %v718_v57, %v717_v55  ;;  %v720_v61 = vpop.f32.mrb[6].mxu1  ;;  %v562_v57 = vld [vmem:[%s1126_s3 + $0x30] sm:$0xff] }
 0x100   :  { %v685_v62 = vpop.f32.mrb[7].mxu0  ;;  %v721_v63 = vpop.f32.mrb[7].mxu1 }
 0x101   :  { %v686_v0 = vadd.f32 %v685_v62, %v684_v59  ;;  %v984_v1 = vadd.f32 %v721_v63, %v720_v61  ;;  %v389_v3 = vadd.f32 %v683_v58, %v989_v2 }
 0x103   :  { %v392_v10 = vadd.f32 %v686_v0, %v989_v2  ;;  %v563_v0 = vld [vmem:[%s1126_s3 + $0x38] sm:$0xff] }
 0x105   :  { %v687_v4 = vpop.f32.mrb[8].mxu0  ;;  %v739_v5 = vpop.f32.mrb[8].mxu1 }
 0x106   :  { %v486_v7 = vadd.f32 %v739_v5, %v389_v3  ;;  %v688_v8 = vpop.f32.mrb[9].mxu0  ;;  %v477_v9 = vpop.f32.mrb[9].mxu1 }
 0x107   :  { %v689_v12 = vadd.f32 %v688_v8, %v687_v4  ;;  %v478_v13 = vadd.f32 %v477_v9, %v381_v6  ;;  %v690_v14 = vpop.f32.mrb[10].mxu0  ;;  %v740_v15 = vpop.f32.mrb[10].mxu1 }
 0x108   :  { %v542_v17 = vmax.f32 %v486_v7, 0.0  ;;  %v489_v19 = vadd.f32 %v740_v15, %v392_v10  ;;  %v691_v20 = vpop.f32.mrb[11].mxu0  ;;  %v480_v21 = vpop.f32.mrb[11].mxu1 }
 0x109   :  { %v540_v22 = vmax.f32 %v478_v13, 0.0  ;;  %v692_v24 = vadd.f32 %v691_v20, %v690_v14  ;;  %v481_v25 = vadd.f32 %v480_v21, %v384_v16  ;;  %v397_v35 = vadd.f32 %v689_v12, %v989_v2 }
 0x10a   :  { %v574_v26 = vadd.f32 %v558_v11, %v542_v17  ;;  %v543_v27 = vmax.f32 %v489_v19, 0.0  ;;  %v564_v17 = vld [vmem:[%s1126_s3 + $0x40] sm:$0xff] }
 0x10b   :  { %v572_v29 = vadd.f32 %v556_v18, %v540_v22  ;;  %v541_v30 = vmax.f32 %v481_v25, 0.0  ;;  %v400_v42 = vadd.f32 %v692_v24, %v989_v2  ;;  %v437_v18 = vadd.f32 %v982_v60, %v989_v2  ;;  %v565_v24 = vld [vmem:[%s1126_s3 + $0x48] sm:$0xff]  ;;  %v570_v60 = vld [vmem:[%s1126_s3 + $0x70] sm:$0xff] }
 0x10c   :  { %590 = vst.msk [vmem:[%s1127_s4 + $0x10] sm:$0xff] %vm321_vm0, %v574_v26  ;;  %v575_v31 = vadd.f32 %v559_v23, %v543_v27  ;;  %v429_v23 = vadd.f32 %v978_v48, %v989_v2 }
 0x10d   :  { %588 = vst.msk [vmem:[%s1127_s4] sm:$0xff] %vm321_vm0, %v572_v29  ;;  %v573_v32 = vadd.f32 %v557_v28, %v541_v30  ;;  %v693_v33 = vpop.f32.mrb[12].mxu0  ;;  %v743_v34 = vpop.f32.mrb[12].mxu1  ;;  %v440_v28 = vadd.f32 %v984_v1, %v989_v2  ;;  %v432_v1 = vadd.f32 %v980_v53, %v989_v2 }
 0x10e   :  { %591 = vst.msk [vmem:[%s1127_s4 + $0x18] sm:$0xff] %vm321_vm0, %v575_v31  ;;  %v694_v36 = vpop.f32.mrb[13].mxu0  ;;  %v493_v37 = vpop.f32.mrb[13].mxu1 }
 0x10f   :  { %589 = vst.msk [vmem:[%s1127_s4 + $0x8] sm:$0xff] %vm321_vm0, %v573_v32  ;;  %v695_v38 = vadd.f32 %v694_v36, %v693_v33  ;;  %v494_v39 = vadd.f32 %v493_v37, %v397_v35  ;;  %v696_v40 = vpop.f32.mrb[14].mxu0  ;;  %v744_v41 = vpop.f32.mrb[14].mxu1  ;;  %v568_v35 = vld [vmem:[%s1126_s3 + $0x60] sm:$0xff] }
 0x110   :  { %v697_v44 = vpop.f32.mrb[15].mxu0  ;;  %v496_v45 = vpop.f32.mrb[15].mxu1 }
 0x111   :  { %v405_v46 = vadd.f32 %v695_v38, %v989_v2  ;;  %v544_v47 = vmax.f32 %v494_v39, 0.0  ;;  %v698_v49 = vadd.f32 %v697_v44, %v696_v40  ;;  %v497_v50 = vadd.f32 %v496_v45, %v400_v42  ;;  %v571_v42 = vld [vmem:[%s1126_s3 + $0x78] sm:$0xff] }
 0x113   :  { %v502_v52 = vadd.f32 %v743_v34, %v405_v46  ;;  %v576_v54 = vadd.f32 %v560_v43, %v544_v47  ;;  %v408_v55 = vadd.f32 %v698_v49, %v989_v2  ;;  %v545_v56 = vmax.f32 %v497_v50, 0.0  ;;  %v569_v50 = vld [vmem:[%s1126_s3 + $0x68] sm:$0xff] }
 0x115   :  { %v546_v58 = vmax.f32 %v502_v52, 0.0  ;;  %592 = vst.msk [vmem:[%s1127_s4 + $0x20] sm:$0xff] %vm321_vm0, %v576_v54  ;;  %v505_v59 = vadd.f32 %v744_v41, %v408_v55  ;;  %v577_v61 = vadd.f32 %v561_v51, %v545_v56  ;;  %v699_v62 = vpop.f32.mrb[16].mxu0  ;;  %v747_v63 = vpop.f32.mrb[16].mxu1  ;;  %v566_v51 = vld [vmem:[%s1126_s3 + $0x50] sm:$0xff]  ;;  %v567_v56 = vld [vmem:[%s1126_s3 + $0x58] sm:$0xff] }
 0x116   :  { %v700_v3 = vpop.f32.mrb[17].mxu0  ;;  %v509_v4 = vpop.f32.mrb[17].mxu1 }
 0x117   :  { %v578_v5 = vadd.f32 %v562_v57, %v546_v58  ;;  %v547_v6 = vmax.f32 %v505_v59, 0.0  ;;  %593 = vst.msk [vmem:[%s1127_s4 + $0x28] sm:$0xff] %vm321_vm0, %v577_v61  ;;  %v701_v7 = vadd.f32 %v700_v3, %v699_v62  ;;  %v702_v8 = vpop.f32.mrb[18].mxu0  ;;  %v748_v9 = vpop.f32.mrb[18].mxu1 }
 0x118   :  { %v703_v10 = vpop.f32.mrb[19].mxu0  ;;  %v512_v11 = vpop.f32.mrb[19].mxu1 }
 0x119   :  { %594 = vst.msk [vmem:[%s1127_s4 + $0x30] sm:$0xff] %vm321_vm0, %v578_v5  ;;  %v579_v12 = vadd.f32 %v563_v0, %v547_v6  ;;  %v413_v13 = vadd.f32 %v701_v7, %v989_v2  ;;  %v704_v14 = vadd.f32 %v703_v10, %v702_v8 }
 0x11b   :  { %595 = vst.msk [vmem:[%s1127_s4 + $0x38] sm:$0xff] %vm321_vm0, %v579_v12  ;;  %v510_v15 = vadd.f32 %v509_v4, %v413_v13  ;;  %v416_v16 = vadd.f32 %v704_v14, %v989_v2 }
 0x11d   :  { %v548_v19 = vmax.f32 %v510_v15, 0.0  ;;  %v513_v20 = vadd.f32 %v512_v11, %v416_v16  ;;  %v705_v21 = vpop.f32.mrb[20].mxu0  ;;  %v751_v22 = vpop.f32.mrb[20].mxu1 }
 0x11e   :  { %v534_v25 = vadd.f32 %v751_v22, %v437_v18  ;;  %v706_v26 = vpop.f32.mrb[21].mxu0  ;;  %v525_v27 = vpop.f32.mrb[21].mxu1 }
 0x11f   :  { %v580_v29 = vadd.f32 %v564_v17, %v548_v19  ;;  %v549_v30 = vmax.f32 %v513_v20, 0.0  ;;  %v707_v31 = vadd.f32 %v706_v26, %v705_v21  ;;  %v526_v32 = vadd.f32 %v525_v27, %v429_v23  ;;  %v708_v33 = vpop.f32.mrb[22].mxu0  ;;  %v752_v48 = vpop.f32.mrb[22].mxu1 }
 0x120   :  { %v554_v34 = vmax.f32 %v534_v25, 0.0  ;;  %v537_v36 = vadd.f32 %v752_v48, %v440_v28  ;;  %v709_v37 = vpop.f32.mrb[23].mxu0  ;;  %v528_v38 = vpop.f32.mrb[23].mxu1 }
 0x121   :  { %596 = vst.msk [vmem:[%s1127_s4 + $0x40] sm:$0xff] %vm321_vm0, %v580_v29  ;;  %v581_v39 = vadd.f32 %v565_v24, %v549_v30  ;;  %v421_v40 = vadd.f32 %v707_v31, %v989_v2  ;;  %v552_v41 = vmax.f32 %v526_v32, 0.0  ;;  %v710_v43 = vadd.f32 %v709_v37, %v708_v33 }
 0x122   :  { %v586_v44 = vadd.f32 %v570_v60, %v554_v34  ;;  %v555_v45 = vmax.f32 %v537_v36, 0.0  ;;  %v529_v46 = vadd.f32 %v528_v38, %v432_v1 }
 0x123   :  { %597 = vst.msk [vmem:[%s1127_s4 + $0x48] sm:$0xff] %vm321_vm0, %v581_v39  ;;  %v518_v53 = vadd.f32 %v747_v63, %v421_v40  ;;  %v584_v47 = vadd.f32 %v568_v35, %v552_v41  ;;  %v424_v49 = vadd.f32 %v710_v43, %v989_v2 }
 0x124   :  { %602 = vst.msk [vmem:[%s1127_s4 + $0x70] sm:$0xff] %vm321_vm0, %v586_v44  ;;  %v587_v52 = vadd.f32 %v571_v42, %v555_v45  ;;  %v553_v54 = vmax.f32 %v529_v46, 0.0 }
 0x125   :  { %v550_v55 = vmax.f32 %v518_v53, 0.0  ;;  %600 = vst.msk [vmem:[%s1127_s4 + $0x60] sm:$0xff] %vm321_vm0, %v584_v47  ;;  %v521_v2 = vadd.f32 %v748_v9, %v424_v49 }
 0x126   :  { %603 = vst.msk [vmem:[%s1127_s4 + $0x78] sm:$0xff] %vm321_vm0, %v587_v52  ;;  %v585_v57 = vadd.f32 %v569_v50, %v553_v54 }
 0x127   :  { %v582_v58 = vadd.f32 %v566_v51, %v550_v55  ;;  %v551_v59 = vmax.f32 %v521_v2, 0.0 }
 0x128   :  { %601 = vst.msk [vmem:[%s1127_s4 + $0x68] sm:$0xff] %vm321_vm0, %v585_v57 }
 0x129   :  { %598 = vst.msk [vmem:[%s1127_s4 + $0x50] sm:$0xff] %vm321_vm0, %v582_v58  ;;  %v583_v61 = vadd.f32 %v567_v56, %v551_v59 }
 0x12b   :  { %599 = vst.msk [vmem:[%s1127_s4 + $0x58] sm:$0xff] %vm321_vm0, %v583_v61 }

// kernel: feature_fusor_forward.16
= control target key start
LH: loop header
LB: loop body
LE: loop exit
PB: predicated region body
PF: predicated region fallthrough
CT: control target
= control target key end

     0   :  { %vm318_vm0 = vcmask 261120   ;;  %s1035_s1 = inlined_call_operand.vmem [shape: bf16[288,32], index: 1, kind: input, shape index: {}]   ;;  %s1036_s0 = inlined_call_operand.vmem [shape: bf16[128,288], index: 0, kind: input, shape index: {}]   ;;  %s1037_s2 = inlined_call_operand.vmem [shape: f32[1,32], index: 2, kind: input, shape index: {}]   ;;  %s1038_s3 = inlined_call_operand.vmem [shape: f32[128,32], index: 3, kind: output, shape index: {}]  }
   0x1   :  { %v734_v0 = vld [vmem:[%s1035_s1 + $0x40] sm:$0xff]   ;;  %v736_v2 = vld [vmem:[%s1035_s1 + $0x48] sm:$0xff]   ;;  %v738_v4 = vld [vmem:[%s1035_s1 + $0x50] sm:$0xff]  }
   0x2   :  { %v735_v1 = vld [vmem:[%s1035_s1] sm:$0xff]   ;;  %624 = vmatprep.subr.bf16.mxu0 %v734_v0  ;;  %718 = vmatprep.subr.bf16.mxu1 %v734_v0  ;;  %v737_v3 = vld [vmem:[%s1035_s1 + $0x8] sm:$0xff]   ;;  %v739_v5 = vld [vmem:[%s1035_s1 + $0x10] sm:$0xff]  }
   0x3   :  { %625 = vmatpush3.bf16.msra.mxu0 %v735_v1  ;;  %726 = vmatpush3.bf16.msra.mxu1 %v735_v1  ;;  %v740_v6 = vld [vmem:[%s1035_s1 + $0x58] sm:$0xff]   ;;  %v742_v8 = vld [vmem:[%s1035_s1 + $0x60] sm:$0xff]   ;;  %v744_v10 = vld [vmem:[%s1035_s1 + $0x68] sm:$0xff]  }
   0x4   :  { %626 = vmatprep.subr.bf16.mxu0 %v736_v2  ;;  %719 = vmatprep.subr.bf16.mxu1 %v736_v2  ;;  %v741_v7 = vld [vmem:[%s1035_s1 + $0x18] sm:$0xff]   ;;  %v743_v9 = vld [vmem:[%s1035_s1 + $0x20] sm:$0xff]   ;;  %v745_v13 = vld [vmem:[%s1035_s1 + $0x28] sm:$0xff]  }
   0x5   :  { %v752_v11 = vld [vmem:[%s1036_s0 + $0x4] ss:$12 sps:$4 sm:$0xff]   ;;  %v755_v12 = vld [vmem:[%s1036_s0 + $0x94] ss:$12 sps:$4 sm:$0xff]   ;;  %v748_v16 = vld [vmem:[%s1035_s1 + $0x78] sm:$0xff]  }
   0x6   :  { %v746_v14 = vld [vmem:[%s1035_s1 + $0x70] sm:$0xff]   ;;  %375 = vmatprep.mubr.bf16.mxu0 %v752_v11  ;;  %423 = vmatprep.mubr.bf16.mxu1 %v755_v12  ;;  %v749_v17 = vld [vmem:[%s1035_s1 + $0x38] sm:$0xff]   ;;  %v750_v18 = vld [vmem:[%s1036_s0] ss:$12 sps:$4 sm:$0xff]  }
   0x7   :  { %627 = vmatpush3.bf16.msra.mxu0 %v737_v3  ;;  %727 = vmatpush3.bf16.msra.mxu1 %v737_v3  ;;  %v747_v15 = vld [vmem:[%s1035_s1 + $0x30] sm:$0xff]   ;;  %v756_v19 = vld [vmem:[%s1035_s1 + $0x80] sm:$0xff]   ;;  %v757_v21 = vld [vmem:[%s1036_s0 + $0x1c] ss:$12 sps:$4 sm:$0xff]  }
   0x8   :  { %628 = vmatprep.subr.bf16.mxu0 %v738_v4  ;;  %720 = vmatprep.subr.bf16.mxu1 %v738_v4  ;;  %v753_v20 = vld [vmem:[%s1036_s0 + $0x90] ss:$12 sps:$4 sm:$0xff]   ;;  %v759_v22 = vld [vmem:[%s1036_s0 + $0xac] ss:$12 sps:$4 sm:$0xff]   ;;  %v762_v25 = vld [vmem:[%s1036_s0 + $0xa8] ss:$12 sps:$4 sm:$0xff]  }
   0x9   :  { %v763_v23 = vld [vmem:[%s1035_s1 + $0x88] sm:$0xff]   ;;  %v761_v24 = vld [vmem:[%s1036_s0 + $0x18] ss:$12 sps:$4 sm:$0xff]   ;;  %v764_v26 = vld [vmem:[%s1036_s0 + $0x34] ss:$12 sps:$4 sm:$0xff]  }
   0xa   :  { %v766_v27 = vld [vmem:[%s1036_s0 + $0x8] ss:$12 sps:$4 sm:$0xff]   ;;  %v767_v28 = vld [vmem:[%s1036_s0 + $0x30] ss:$12 sps:$4 sm:$0xff]   ;;  %v768_v29 = vld [vmem:[%s1036_s0 + $0x20] ss:$12 sps:$4 sm:$0xff]  }
   0xb   :  { %629 = vmatpush3.bf16.msra.mxu0 %v739_v5  ;;  %728 = vmatpush3.bf16.msra.mxu1 %v739_v5  ;;  %v769_v30 = vld [vmem:[%s1036_s0 + $0x4c] ss:$12 sps:$4 sm:$0xff]   ;;  %v772_v32 = vld [vmem:[%s1036_s0 + $0x48] ss:$12 sps:$4 sm:$0xff]   ;;  %v773_v33 = vld [vmem:[%s1036_s0 + $0x50] ss:$12 sps:$4 sm:$0xff]  }
   0xc   :  { %630 = vmatprep.subr.bf16.mxu0 %v740_v6  ;;  %721 = vmatprep.subr.bf16.mxu1 %v740_v6  ;;  %v771_v31 = vld [vmem:[%s1036_s0 + $0x38] ss:$12 sps:$4 sm:$0xff]   ;;  %v776_v35 = vld [vmem:[%s1036_s0 + $0x68] ss:$12 sps:$4 sm:$0xff]   ;;  %v777_v36 = vld [vmem:[%s1036_s0 + $0x60] ss:$12 sps:$4 sm:$0xff]  }
   0xd   :  { %v774_v34 = vld [vmem:[%s1036_s0 + $0x64] ss:$12 sps:$4 sm:$0xff]   ;;  %v778_v37 = vld [vmem:[%s1036_s0 + $0x80] ss:$12 sps:$4 sm:$0xff]   ;;  %v779_v38 = vld [vmem:[%s1036_s0 + $0x7c] ss:$12 sps:$4 sm:$0xff]  }
   0xe   :  { %v781_v39 = vld [vmem:[%s1036_s0 + $0x98] ss:$12 sps:$4 sm:$0xff]   ;;  %v783_v41 = vld [vmem:[%s1036_s0 + $0xb0] ss:$12 sps:$4 sm:$0xff]   ;;  %v949_v2 = vld [vmem:[%s1037_s2] ss:$0 sm:$0xff] }
   0xf   :  { %631 = vmatpush3.bf16.msra.mxu0 %v741_v7  ;;  %729 = vmatpush3.bf16.msra.mxu1 %v741_v7  ;;  %v782_v40 = vld [vmem:[%s1036_s0 + $0x78] ss:$12 sps:$4 sm:$0xff]  }
  0x10   :  { %632 = vmatprep.subr.bf16.mxu0 %v742_v8  ;;  %722 = vmatprep.subr.bf16.mxu1 %v742_v8 }
  0x13   :  { %633 = vmatpush3.bf16.msra.mxu0 %v743_v9  ;;  %730 = vmatpush3.bf16.msra.mxu1 %v743_v9 }
  0x14   :  { %634 = vmatprep.subr.bf16.mxu0 %v744_v10  ;;  %723 = vmatprep.subr.bf16.mxu1 %v744_v10 }
  0x17   :  { %635 = vmatpush3.bf16.msra.mxu0 %v745_v13  ;;  %731 = vmatpush3.bf16.msra.mxu1 %v745_v13 }
  0x18   :  { %636 = vmatprep.subr.bf16.mxu0 %v746_v14  ;;  %724 = vmatprep.subr.bf16.mxu1 %v746_v14 }
  0x1b   :  { %637 = vmatpush3.bf16.msra.mxu0 %v747_v15  ;;  %732 = vmatpush3.bf16.msra.mxu1 %v747_v15 }
  0x1c   :  { %638 = vmatprep.subr.bf16.mxu0 %v748_v16  ;;  %725 = vmatprep.subr.bf16.mxu1 %v748_v16 }
  0x1f   :  { %639 = vmatpush3.bf16.msra.mxu0 %v749_v17  ;;  %733 = vmatpush3.bf16.msra.mxu1 %v749_v17 }
  0x20   :  { %698 = vmatprep.subr.bf16.mxu1 %v756_v19 }
  0x22   :  { %376 = vmatmul.mubr.bf16.vlgmr.msra.gmra.mrb[0].mxu0 %v750_v18  ;;  %424 = vmatmul.mubr.bf16.vlgmr.msra.gmra.mrb[0].mxu1 %v753_v20 }
  0x23   :  { %699 = vmatpush3.bf16.msra.mxu1 %v756_v19  ;;  %383 = vmatprep.mubr.bf16.mxu0 %v757_v21 }
  0x24   :  { %431 = vmatprep.mubr.bf16.mxu1 %v759_v22  ;;  %700 = vmatprep.subr.bf16.mxu1 %v763_v23 }
  0x27   :  { %701 = vmatpush3.bf16.msra.mxu1 %v763_v23 }
  0x2a   :  { %384 = vmatmul.mubr.bf16.gmra.mrb[4].mxu0 %v761_v24  ;;  %432 = vmatmul.mubr.bf16.gmra.mrb[4].mxu1 %v762_v25 }
  0x2b   :  { %391 = vmatprep.mubr.bf16.mxu0 %v764_v26  ;;  %702 = vmatprep.mubr.msk.bf16.mxu1 %vm318_vm0, %v766_v27 }
  0x32   :  { %392 = vmatmul.mubr.bf16.gmra.mrb[8].mxu0 %v767_v28  ;;  %703 = vmatmul.mubr.msk.bf16.vlgmr.msra.gmra.mrb[8].mxu1 %vm318_vm0, %v768_v29 }
  0x33   :  { %399 = vmatprep.mubr.bf16.mxu0 %v769_v30  ;;  %706 = vmatprep.mubr.msk.bf16.mxu1 %vm318_vm0, %v771_v31 }
  0x3a   :  { %400 = vmatmul.mubr.bf16.gmra.mrb[12].mxu0 %v772_v32  ;;  %707 = vmatmul.mubr.msk.bf16.gmra.mrb[12].mxu1 %vm318_vm0, %v773_v33 }
  0x3b   :  { %407 = vmatprep.mubr.bf16.mxu0 %v774_v34  ;;  %710 = vmatprep.mubr.msk.bf16.mxu1 %vm318_vm0, %v776_v35 }
  0x42   :  { %408 = vmatmul.mubr.bf16.gmra.mrb[16].mxu0 %v777_v36  ;;  %711 = vmatmul.mubr.msk.bf16.gmra.mrb[16].mxu1 %vm318_vm0, %v778_v37 }
  0x43   :  { %415 = vmatprep.mubr.bf16.mxu0 %v779_v38  ;;  %714 = vmatprep.mubr.msk.bf16.mxu1 %vm318_vm0, %v781_v39 }
  0x4a   :  { %416 = vmatmul.mubr.bf16.gmra.mrb[20].mxu0 %v782_v40  ;;  %715 = vmatmul.mubr.msk.bf16.gmra.mrb[20].mxu1 %vm318_vm0, %v783_v41 }
  0xf5   :  { %v640_v42 = vpop.f32.mrb[0].mxu0  ;;  %v676_v43 = vpop.f32.mrb[0].mxu1 }
  0xf6   :  { %v641_v44 = vpop.f32.mrb[1].mxu0  ;;  %v677_v45 = vpop.f32.mrb[1].mxu1 }
  0xf7   :  { %v642_v46 = vadd.f32 %v641_v44, %v640_v42  ;;  %v643_v47 = vpop.f32.mrb[2].mxu0  ;;  %v938_v48 = vadd.f32 %v677_v45, %v676_v43  ;;  %v679_v49 = vpop.f32.mrb[2].mxu1 }
  0xf8   :  { %v644_v50 = vpop.f32.mrb[3].mxu0  ;;  %v680_v51 = vpop.f32.mrb[3].mxu1 }
  0xf9   :  { %v645_v52 = vadd.f32 %v644_v50, %v643_v47  ;;  %v940_v53 = vadd.f32 %v680_v51, %v679_v49  ;;  %v378_v6 = vadd.f32 %v642_v46, %v949_v2 }
  0xfb   :  { %v381_v15 = vadd.f32 %v645_v52, %v949_v2 }
  0xfd   :  { %v646_v54 = vpop.f32.mrb[4].mxu0  ;;  %v682_v55 = vpop.f32.mrb[4].mxu1 }
  0xfe   :  { %v647_v56 = vpop.f32.mrb[5].mxu0  ;;  %v683_v57 = vpop.f32.mrb[5].mxu1 }
  0xff   :  { %v648_v58 = vadd.f32 %v647_v56, %v646_v54  ;;  %v649_v59 = vpop.f32.mrb[6].mxu0  ;;  %v942_v60 = vadd.f32 %v683_v57, %v682_v55  ;;  %v685_v61 = vpop.f32.mrb[6].mxu1 }
 0x100   :  { %v650_v62 = vpop.f32.mrb[7].mxu0  ;;  %v686_v63 = vpop.f32.mrb[7].mxu1 }
 0x101   :  { %v651_v0 = vadd.f32 %v650_v62, %v649_v59  ;;  %v944_v1 = vadd.f32 %v686_v63, %v685_v61  ;;  %v386_v3 = vadd.f32 %v648_v58, %v949_v2  ;;  %v434_v63 = vadd.f32 %v942_v60, %v949_v2 }
 0x103   :  { %v389_v10 = vadd.f32 %v651_v0, %v949_v2 }
 0x105   :  { %v652_v4 = vpop.f32.mrb[8].mxu0  ;;  %v704_v5 = vpop.f32.mrb[8].mxu1 }
 0x106   :  { %v483_v7 = vadd.f32 %v704_v5, %v386_v3  ;;  %v653_v8 = vpop.f32.mrb[9].mxu0  ;;  %v474_v9 = vpop.f32.mrb[9].mxu1 }
 0x107   :  { %v654_v11 = vadd.f32 %v653_v8, %v652_v4  ;;  %v475_v12 = vadd.f32 %v474_v9, %v378_v6  ;;  %v655_v13 = vpop.f32.mrb[10].mxu0  ;;  %v705_v14 = vpop.f32.mrb[10].mxu1  ;;  %v426_v6 = vadd.f32 %v938_v48, %v949_v2 }
 0x108   :  { %v539_v16 = vmax.f32 %v483_v7, 0.0  ;;  %v486_v17 = vadd.f32 %v705_v14, %v389_v10  ;;  %v656_v18 = vpop.f32.mrb[11].mxu0  ;;  %v477_v19 = vpop.f32.mrb[11].mxu1  ;;  %v437_v10 = vadd.f32 %v944_v1, %v949_v2 }
 0x109   :  { %v537_v20 = vmax.f32 %v475_v12, 0.0  ;;  %v657_v21 = vadd.f32 %v656_v18, %v655_v13  ;;  %v478_v22 = vadd.f32 %v477_v19, %v381_v15  ;;  %v394_v27 = vadd.f32 %v654_v11, %v949_v2 }
 0x10a   :  { %555 = vst.msk [vmem:[%s1038_s3 + $0x10] sm:$0xff] %vm318_vm0, %v539_v16  ;;  %v540_v23 = vmax.f32 %v486_v17, 0.0  ;;  %v429_v15 = vadd.f32 %v940_v53, %v949_v2 }
 0x10b   :  { %553 = vst.msk [vmem:[%s1038_s3] sm:$0xff] %vm318_vm0, %v537_v20  ;;  %v538_v24 = vmax.f32 %v478_v22, 0.0  ;;  %v397_v34 = vadd.f32 %v657_v21, %v949_v2 }
 0x10c   :  { %556 = vst.msk [vmem:[%s1038_s3 + $0x18] sm:$0xff] %vm318_vm0, %v540_v23 }
 0x10d   :  { %554 = vst.msk [vmem:[%s1038_s3 + $0x8] sm:$0xff] %vm318_vm0, %v538_v24  ;;  %v658_v25 = vpop.f32.mrb[12].mxu0  ;;  %v708_v26 = vpop.f32.mrb[12].mxu1 }
 0x10e   :  { %v659_v28 = vpop.f32.mrb[13].mxu0  ;;  %v490_v29 = vpop.f32.mrb[13].mxu1 }
 0x10f   :  { %v660_v30 = vadd.f32 %v659_v28, %v658_v25  ;;  %v491_v31 = vadd.f32 %v490_v29, %v394_v27  ;;  %v661_v32 = vpop.f32.mrb[14].mxu0  ;;  %v709_v33 = vpop.f32.mrb[14].mxu1 }
 0x110   :  { %v662_v35 = vpop.f32.mrb[15].mxu0  ;;  %v493_v36 = vpop.f32.mrb[15].mxu1 }
 0x111   :  { %v402_v37 = vadd.f32 %v660_v30, %v949_v2  ;;  %v541_v38 = vmax.f32 %v491_v31, 0.0  ;;  %v663_v39 = vadd.f32 %v662_v35, %v661_v32  ;;  %v494_v40 = vadd.f32 %v493_v36, %v397_v34 }
 0x113   :  { %v499_v41 = vadd.f32 %v708_v26, %v402_v37  ;;  %557 = vst.msk [vmem:[%s1038_s3 + $0x20] sm:$0xff] %vm318_vm0, %v541_v38  ;;  %v405_v42 = vadd.f32 %v663_v39, %v949_v2  ;;  %v542_v43 = vmax.f32 %v494_v40, 0.0 }
 0x115   :  { %v543_v44 = vmax.f32 %v499_v41, 0.0  ;;  %v502_v45 = vadd.f32 %v709_v33, %v405_v42  ;;  %558 = vst.msk [vmem:[%s1038_s3 + $0x28] sm:$0xff] %vm318_vm0, %v542_v43  ;;  %v664_v46 = vpop.f32.mrb[16].mxu0  ;;  %v712_v47 = vpop.f32.mrb[16].mxu1 }
 0x116   :  { %v665_v49 = vpop.f32.mrb[17].mxu0  ;;  %v506_v50 = vpop.f32.mrb[17].mxu1 }
 0x117   :  { %559 = vst.msk [vmem:[%s1038_s3 + $0x30] sm:$0xff] %vm318_vm0, %v543_v44  ;;  %v544_v51 = vmax.f32 %v502_v45, 0.0  ;;  %v666_v52 = vadd.f32 %v665_v49, %v664_v46  ;;  %v667_v54 = vpop.f32.mrb[18].mxu0  ;;  %v713_v55 = vpop.f32.mrb[18].mxu1 }
 0x118   :  { %v668_v56 = vpop.f32.mrb[19].mxu0  ;;  %v509_v57 = vpop.f32.mrb[19].mxu1 }
 0x119   :  { %560 = vst.msk [vmem:[%s1038_s3 + $0x38] sm:$0xff] %vm318_vm0, %v544_v51  ;;  %v410_v58 = vadd.f32 %v666_v52, %v949_v2  ;;  %v669_v59 = vadd.f32 %v668_v56, %v667_v54 }
 0x11b   :  { %v507_v61 = vadd.f32 %v506_v50, %v410_v58  ;;  %v413_v62 = vadd.f32 %v669_v59, %v949_v2 }
 0x11d   :  { %v545_v0 = vmax.f32 %v507_v61, 0.0  ;;  %v510_v3 = vadd.f32 %v509_v57, %v413_v62  ;;  %v670_v4 = vpop.f32.mrb[20].mxu0  ;;  %v716_v5 = vpop.f32.mrb[20].mxu1 }
 0x11e   :  { %v531_v7 = vadd.f32 %v716_v5, %v434_v63  ;;  %v671_v8 = vpop.f32.mrb[21].mxu0  ;;  %v522_v9 = vpop.f32.mrb[21].mxu1 }
 0x11f   :  { %561 = vst.msk [vmem:[%s1038_s3 + $0x40] sm:$0xff] %vm318_vm0, %v545_v0  ;;  %v546_v11 = vmax.f32 %v510_v3, 0.0  ;;  %v672_v60 = vadd.f32 %v671_v8, %v670_v4  ;;  %v523_v12 = vadd.f32 %v522_v9, %v426_v6  ;;  %v673_v13 = vpop.f32.mrb[22].mxu0  ;;  %v717_v14 = vpop.f32.mrb[22].mxu1 }
 0x120   :  { %v551_v48 = vmax.f32 %v531_v7, 0.0  ;;  %v534_v16 = vadd.f32 %v717_v14, %v437_v10  ;;  %v674_v17 = vpop.f32.mrb[23].mxu0  ;;  %v525_v18 = vpop.f32.mrb[23].mxu1 }
 0x121   :  { %562 = vst.msk [vmem:[%s1038_s3 + $0x48] sm:$0xff] %vm318_vm0, %v546_v11  ;;  %v418_v1 = vadd.f32 %v672_v60, %v949_v2  ;;  %v549_v19 = vmax.f32 %v523_v12, 0.0  ;;  %v675_v20 = vadd.f32 %v674_v17, %v673_v13  ;;  %v526_v21 = vadd.f32 %v525_v18, %v429_v15 }
 0x122   :  { %567 = vst.msk [vmem:[%s1038_s3 + $0x70] sm:$0xff] %vm318_vm0, %v551_v48  ;;  %v552_v53 = vmax.f32 %v534_v16, 0.0 }
 0x123   :  { %v515_v22 = vadd.f32 %v712_v47, %v418_v1  ;;  %565 = vst.msk [vmem:[%s1038_s3 + $0x60] sm:$0xff] %vm318_vm0, %v549_v19  ;;  %v421_v23 = vadd.f32 %v675_v20, %v949_v2  ;;  %v550_v24 = vmax.f32 %v526_v21, 0.0 }
 0x124   :  { %568 = vst.msk [vmem:[%s1038_s3 + $0x78] sm:$0xff] %vm318_vm0, %v552_v53 }
 0x125   :  { %v547_v25 = vmax.f32 %v515_v22, 0.0  ;;  %v518_v26 = vadd.f32 %v713_v55, %v421_v23  ;;  %566 = vst.msk [vmem:[%s1038_s3 + $0x68] sm:$0xff] %vm318_vm0, %v550_v24 }
 0x127   :  { %563 = vst.msk [vmem:[%s1038_s3 + $0x50] sm:$0xff] %vm318_vm0, %v547_v25  ;;  %v548_v27 = vmax.f32 %v518_v26, 0.0 }
 0x129   :  { %564 = vst.msk [vmem:[%s1038_s3 + $0x58] sm:$0xff] %vm318_vm0, %v548_v27 }

// kernel: feature_fusor_forward.18
= control target key start
LH: loop header
LB: loop body
LE: loop exit
PB: predicated region body
PF: predicated region fallthrough
CT: control target
= control target key end

     0   :  { %s1080_s15 = smov 0   ;;  %s1319_s0 = inlined_call_operand.vmem [shape: bf16[512,144], index: 0, kind: input, shape index: {}]   ;;  %s1320_s1 = inlined_call_operand.vmem [shape: bf16[144,32], index: 1, kind: input, shape index: {}]   ;;  %s1321_s2 = inlined_call_operand.vmem [shape: f32[1,32], index: 2, kind: input, shape index: {}]   ;;  %s1322_s3 = inlined_call_operand.vmem [shape: f32[512,32], index: 3, kind: input, shape index: {}]   ;;  %s1323_s4 = inlined_call_operand.vmem [shape: f32[512,32], index: 4, kind: output, shape index: {}]  }
   0x1 LB: > { %s889_s16 = sadd.s32 4294967295, %s1052_s15   ;;  %p893_p0 = scmp.ge.s32.totalorder %s1052_s15, 1  ;;  %s1052_s15 = sphi %s1080_s15, %s14_s15  }
   0x2   : > { %p175_p1 = scmp.lt.s32.totalorder %s1052_s15, 3 }
   0x4   : > { %p176_p2 = pnand %p893_p0, %p175_p1 }
   0x5   : > { %v989_v0 = vld [vmem:[%s1320_s1] sm:$0xff] (!%p176_p2)   ;;  %v1054_v1 = vmov (!%p176_p2), 0   ;;  %s894_s19 = sshll.u32 (!%p176_p2), %s889_s16, 5  ;;  %v990_v2 = vld [vmem:[%s1320_s1 + $0x8] sm:$0xff] (!%p176_p2)   ;;  %v991_v3 = vld [vmem:[%s1320_s1 + $0x10] sm:$0xff] (!%p176_p2)   ;;  %vm482_vm0 = vcmask (!%p176_p2), 130048  }
   0x6   : > { %179 = sbr.rel (%p176_p2) target bundleno = 319 (0x13f), region = 36  ;;  %531 = vmatprep.subr.bf16.mxu0 (!%p176_p2), %v1054_v1  ;;  %962 = vmatprep.subr.bf16.mxu1 (!%p176_p2), %v1054_v1  ;;  %p208_p3 = scmp.lt.s32.totalorder (!%p176_p2), %s894_s19, 63  ;;  %v992_v4 = vld [vmem:[%s1320_s1 + $0x18] sm:$0xff] (!%p176_p2)   ;;  %v993_v7 = vld [vmem:[%s1320_s1 + $0x20] sm:$0xff] (!%p176_p2)   ;;  %v994_v8 = vld [vmem:[%s1320_s1 + $0x28] sm:$0xff] (!%p176_p2)   ;;  %vm788_vm1 = vcmask (!%p176_p2), 261120  }
   0x7   : > { %532 = vmatpush1.bf16.msra.mxu0 (!%p176_p2), %v989_v0  ;;  %971 = vmatpush1.bf16.msra.mxu1 (!%p176_p2), %v989_v0  ;;  %v995_v9 = vld [vmem:[%s1320_s1 + $0x30] sm:$0xff] (!%p176_p2)   ;;  %v996_v10 = vld [vmem:[%s1320_s1 + $0x38] sm:$0xff] (!%p176_p2)   ;;  %v997_v11 = vld [vmem:[%s1320_s1 + $0x40] sm:$0xff] (!%p176_p2)  }
   0x8   : > { %533 = vmatprep.subr.bf16.mxu0 (!%p176_p2), %v1054_v1  ;;  %963 = vmatprep.subr.bf16.mxu1 (!%p176_p2), %v1054_v1  ;;  %v1174_v42 = vld [vmem:[%s1321_s2] ss:$0 sm:$0xff] (!%p176_p2) }
   0xb   : > { %534 = vmatpush1.bf16.msra.mxu0 (!%p176_p2), %v990_v2  ;;  %972 = vmatpush1.bf16.msra.mxu1 (!%p176_p2), %v990_v2 }
   0xc   : > { %535 = vmatprep.subr.bf16.mxu0 (!%p176_p2), %v1054_v1  ;;  %964 = vmatprep.subr.bf16.mxu1 (!%p176_p2), %v1054_v1 }
   0xd   : > { %s1325_s19 = smov (!%p208_p3, %s894_s19), 63 }
   0xe   : > { %s1097_s24 = sshll.u32 %s1325_s19, 3 }
   0xf   : > { %s1103_s27 = scalar_lea.vmem %s1319_s0, %s1097_s24  ;;  %536 = vmatpush1.bf16.msra.mxu0 %v991_v3  ;;  %973 = vmatpush1.bf16.msra.mxu1 %v991_v3  ;;  %s1180_s19 = scalar_lea.vmem %s1322_s3, %s1097_s24 }
  0x10   : > { %v1000_v5 = vld [vmem:[%s1103_s27 + $0x4] ss:$8 sps:$4 sm:$0xff]   ;;  %537 = vmatprep.subr.bf16.mxu0 %v1054_v1  ;;  %965 = vmatprep.subr.bf16.mxu1 %v1054_v1  ;;  %v998_v12 = vld [vmem:[%s1103_s27] ss:$8 sps:$4 sm:$0xff]   ;;  %v1004_v14 = vld [vmem:[%s1103_s27 + $0x14] ss:$8 sps:$4 sm:$0xff]   ;;  %s1192_s22 = scalar_lea.vmem %s1323_s4, %s1097_s24 }
  0x11   : > { %v1003_v6 = vld [vmem:[%s1103_s27 + $0x84] ss:$8 sps:$4 sm:$0xff]   ;;  %943 = vmatprep.mubr.msk.bf16.mxu0 %vm482_vm0, %v1000_v5  ;;  %v1001_v13 = vld [vmem:[%s1103_s27 + $0x80] ss:$8 sps:$4 sm:$0xff]   ;;  %v1006_v15 = vld [vmem:[%s1103_s27 + $0x94] ss:$8 sps:$4 sm:$0xff]  }
  0x12   : > { %951 = vmatprep.mubr.msk.bf16.mxu1 %vm482_vm0, %v1003_v6  ;;  %v1008_v16 = vld [vmem:[%s1103_s27 + $0x10] ss:$8 sps:$4 sm:$0xff]   ;;  %v1010_v18 = vld [vmem:[%s1103_s27 + $0x24] ss:$8 sps:$4 sm:$0xff]   ;;  %v1014_v20 = vld [vmem:[%s1103_s27 + $0x20] ss:$8 sps:$4 sm:$0xff]  }
  0x13   : > { %538 = vmatpush1.bf16.msra.mxu0 %v992_v4  ;;  %974 = vmatpush1.bf16.msra.mxu1 %v992_v4  ;;  %v1009_v17 = vld [vmem:[%s1103_s27 + $0x90] ss:$8 sps:$4 sm:$0xff]   ;;  %v1012_v19 = vld [vmem:[%s1103_s27 + $0xa4] ss:$8 sps:$4 sm:$0xff]   ;;  %v1015_v21 = vld [vmem:[%s1103_s27 + $0xa0] ss:$8 sps:$4 sm:$0xff]  }
  0x14   : > { %539 = vmatprep.subr.bf16.mxu0 %v1054_v1  ;;  %966 = vmatprep.subr.bf16.mxu1 %v1054_v1  ;;  %v1016_v22 = vld [vmem:[%s1103_s27 + $0x34] ss:$8 sps:$4 sm:$0xff]   ;;  %v1020_v24 = vld [vmem:[%s1103_s27 + $0x30] ss:$8 sps:$4 sm:$0xff]   ;;  %v1022_v26 = vld [vmem:[%s1103_s27 + $0x44] ss:$8 sps:$4 sm:$0xff]  }
  0x15   : > { %v1018_v23 = vld [vmem:[%s1103_s27 + $0xb4] ss:$8 sps:$4 sm:$0xff]   ;;  %v1021_v25 = vld [vmem:[%s1103_s27 + $0xb0] ss:$8 sps:$4 sm:$0xff]   ;;  %v1024_v27 = vld [vmem:[%s1103_s27 + $0xc4] ss:$8 sps:$4 sm:$0xff]  }
  0x16   : > { %v1026_v28 = vld [vmem:[%s1103_s27 + $0x40] ss:$8 sps:$4 sm:$0xff]   ;;  %v1028_v30 = vld [vmem:[%s1103_s27 + $0x54] ss:$8 sps:$4 sm:$0xff]   ;;  %v1032_v32 = vld [vmem:[%s1103_s27 + $0x50] ss:$8 sps:$4 sm:$0xff]  }
  0x17   : > { %540 = vmatpush1.bf16.msra.mxu0 %v993_v7  ;;  %975 = vmatpush1.bf16.msra.mxu1 %v993_v7  ;;  %v1027_v29 = vld [vmem:[%s1103_s27 + $0xc0] ss:$8 sps:$4 sm:$0xff]   ;;  %v1030_v31 = vld [vmem:[%s1103_s27 + $0xd4] ss:$8 sps:$4 sm:$0xff]   ;;  %v1033_v33 = vld [vmem:[%s1103_s27 + $0xd0] ss:$8 sps:$4 sm:$0xff]  }
  0x18   : > { %541 = vmatprep.subr.bf16.mxu0 %v1054_v1  ;;  %967 = vmatprep.subr.bf16.mxu1 %v1054_v1  ;;  %v1034_v34 = vld [vmem:[%s1103_s27 + $0x64] ss:$8 sps:$4 sm:$0xff]   ;;  %v1038_v36 = vld [vmem:[%s1103_s27 + $0x60] ss:$8 sps:$4 sm:$0xff]   ;;  %v1040_v38 = vld [vmem:[%s1103_s27 + $0x74] ss:$8 sps:$4 sm:$0xff]  }
  0x19   : > { %v1036_v35 = vld [vmem:[%s1103_s27 + $0xe4] ss:$8 sps:$4 sm:$0xff]   ;;  %v1039_v37 = vld [vmem:[%s1103_s27 + $0xe0] ss:$8 sps:$4 sm:$0xff]   ;;  %v1042_v39 = vld [vmem:[%s1103_s27 + $0xf4] ss:$8 sps:$4 sm:$0xff]  }
  0x1a   : > { %v1044_v40 = vld [vmem:[%s1103_s27 + $0x70] ss:$8 sps:$4 sm:$0xff]   ;;  %v724_v49 = vld [vmem:[%s1180_s19] sm:$0xff]  ;;  %v725_v59 = vld [vmem:[%s1180_s19 + $0x8] sm:$0xff] }
  0x1b   : > { %542 = vmatpush1.bf16.msra.mxu0 %v994_v8  ;;  %976 = vmatpush1.bf16.msra.mxu1 %v994_v8  ;;  %v1045_v41 = vld [vmem:[%s1103_s27 + $0xf0] ss:$8 sps:$4 sm:$0xff]   ;;  %v740_v50 = vld [vmem:[%s1180_s19 + $0x80] sm:$0xff]  ;;  %v741_v60 = vld [vmem:[%s1180_s19 + $0x88] sm:$0xff] }
  0x1c   : > { %543 = vmatprep.subr.bf16.mxu0 %v1054_v1  ;;  %968 = vmatprep.subr.bf16.mxu1 %v1054_v1 }
  0x1f   : > { %544 = vmatpush1.bf16.msra.mxu0 %v995_v9  ;;  %977 = vmatpush1.bf16.msra.mxu1 %v995_v9  ;;  %v726_v9 = vld [vmem:[%s1180_s19 + $0x10] sm:$0xff] }
  0x20   : > { %545 = vmatprep.subr.bf16.mxu0 %v1054_v1  ;;  %969 = vmatprep.subr.bf16.mxu1 %v1054_v1 }
  0x23   : > { %546 = vmatpush1.bf16.msra.mxu0 %v996_v10  ;;  %978 = vmatpush1.bf16.msra.mxu1 %v996_v10  ;;  %v742_v10 = vld [vmem:[%s1180_s19 + $0x90] sm:$0xff] }
  0x24   : > { %547 = vmatprep.subr.bf16.mxu0 %v1054_v1  ;;  %970 = vmatprep.subr.bf16.mxu1 %v1054_v1 }
  0x27   : > { %548 = vmatpush1.bf16.msra.mxu0 %v997_v11  ;;  %979 = vmatpush1.bf16.msra.mxu1 %v997_v11 }
  0x2a   : > { %564 = vmatmul.mubr.bf16.vlgmr.msra.gmra.mrb[0].mxu0 %v998_v12  ;;  %628 = vmatmul.mubr.bf16.vlgmr.msra.gmra.mrb[0].mxu1 %v1001_v13 }
  0x2b   : > { %944 = vmatprep.mubr.msk.bf16.mxu0 %vm482_vm0, %v1004_v14  ;;  %952 = vmatprep.mubr.msk.bf16.mxu1 %vm482_vm0, %v1006_v15 }
  0x32   : > { %572 = vmatmul.mubr.bf16.gmra.mrb[4].mxu0 %v1008_v16  ;;  %636 = vmatmul.mubr.bf16.gmra.mrb[4].mxu1 %v1009_v17 }
  0x33   : > { %945 = vmatprep.mubr.msk.bf16.mxu0 %vm482_vm0, %v1010_v18  ;;  %953 = vmatprep.mubr.msk.bf16.mxu1 %vm482_vm0, %v1012_v19  ;;  %v727_v19 = vld [vmem:[%s1180_s19 + $0x18] sm:$0xff] }
  0x3a   : > { %580 = vmatmul.mubr.bf16.gmra.mrb[8].mxu0 %v1014_v20  ;;  %644 = vmatmul.mubr.bf16.gmra.mrb[8].mxu1 %v1015_v21  ;;  %v743_v20 = vld [vmem:[%s1180_s19 + $0x98] sm:$0xff] }
  0x3b   : > { %946 = vmatprep.mubr.msk.bf16.mxu0 %vm482_vm0, %v1016_v22  ;;  %954 = vmatprep.mubr.msk.bf16.mxu1 %vm482_vm0, %v1018_v23 }
  0x42   : > { %588 = vmatmul.mubr.bf16.gmra.mrb[12].mxu0 %v1020_v24  ;;  %652 = vmatmul.mubr.bf16.gmra.mrb[12].mxu1 %v1021_v25 }
  0x43   : > { %947 = vmatprep.mubr.msk.bf16.mxu0 %vm482_vm0, %v1022_v26  ;;  %955 = vmatprep.mubr.msk.bf16.mxu1 %vm482_vm0, %v1024_v27 }
  0x4a   : > { %596 = vmatmul.mubr.bf16.gmra.mrb[16].mxu0 %v1026_v28  ;;  %660 = vmatmul.mubr.bf16.gmra.mrb[16].mxu1 %v1027_v29 }
  0x4b   : > { %948 = vmatprep.mubr.msk.bf16.mxu0 %vm482_vm0, %v1028_v30  ;;  %956 = vmatprep.mubr.msk.bf16.mxu1 %vm482_vm0, %v1030_v31 }
  0x52   : > { %604 = vmatmul.mubr.bf16.gmra.mrb[20].mxu0 %v1032_v32  ;;  %668 = vmatmul.mubr.bf16.gmra.mrb[20].mxu1 %v1033_v33  ;;  %v728_v33 = vld [vmem:[%s1180_s19 + $0x20] sm:$0xff] }
  0x53   : > { %949 = vmatprep.mubr.msk.bf16.mxu0 %vm482_vm0, %v1034_v34  ;;  %957 = vmatprep.mubr.msk.bf16.mxu1 %vm482_vm0, %v1036_v35  ;;  %v744_v34 = vld [vmem:[%s1180_s19 + $0xa0] sm:$0xff] }
  0x5a   : > { %612 = vmatmul.mubr.bf16.gmra.mrb[24].mxu0 %v1038_v36  ;;  %676 = vmatmul.mubr.bf16.gmra.mrb[24].mxu1 %v1039_v37 }
  0x5b   : > { %950 = vmatprep.mubr.msk.bf16.mxu0 %vm482_vm0, %v1040_v38  ;;  %958 = vmatprep.mubr.msk.bf16.mxu1 %vm482_vm0, %v1042_v39 }
  0x62   : > { %620 = vmatmul.mubr.bf16.gmra.mrb[28].mxu0 %v1044_v40  ;;  %684 = vmatmul.mubr.bf16.gmra.mrb[28].mxu1 %v1045_v41 }
  0xfd   : > { %v565_v43 = vpop.f32.mrb[0].mxu0  ;;  %v629_v44 = vpop.f32.mrb[0].mxu1 }
  0xfe   : > { %v566_v45 = vadd.f32 %v1174_v42, %v565_v43  ;;  %v630_v46 = vadd.f32 %v1174_v42, %v629_v44  ;;  %v567_v47 = vpop.f32.mrb[1].mxu0  ;;  %v631_v48 = vpop.f32.mrb[1].mxu1  ;;  %v729_v44 = vld [vmem:[%s1180_s19 + $0x28] sm:$0xff] }
  0xff   : > { %v568_v51 = vpop.f32.mrb[2].mxu0  ;;  %v632_v52 = vpop.f32.mrb[2].mxu1 }
 0x100   : > { %v692_v53 = vmax.f32 %v566_v45, 0.0  ;;  %v708_v54 = vmax.f32 %v630_v46, 0.0  ;;  %v569_v55 = vadd.f32 %v1174_v42, %v568_v51  ;;  %v633_v56 = vadd.f32 %v1174_v42, %v632_v52  ;;  %v570_v57 = vpop.f32.mrb[3].mxu0  ;;  %v634_v58 = vpop.f32.mrb[3].mxu1  ;;  %v745_v45 = vld [vmem:[%s1180_s19 + $0xa8] sm:$0xff] }
 0x101   : > { %v730_v58 = vld [vmem:[%s1180_s19 + $0x30] sm:$0xff] }
 0x102   : > { %v756_v61 = vadd.f32 %v724_v49, %v692_v53  ;;  %v772_v62 = vadd.f32 %v740_v50, %v708_v54  ;;  %v693_v63 = vmax.f32 %v569_v55, 0.0  ;;  %v709_v0 = vmax.f32 %v633_v56, 0.0 }
 0x104   : > { %789 = vst.msk [vmem:[%s1192_s22] sm:$0xff] %vm788_vm1, %v756_v61  ;;  %805 = vst.msk [vmem:[%s1192_s22 + $0x80] sm:$0xff] %vm788_vm1, %v772_v62  ;;  %v757_v1 = vadd.f32 %v725_v59, %v693_v63  ;;  %v773_v2 = vadd.f32 %v741_v60, %v709_v0  ;;  %v746_v59 = vld [vmem:[%s1180_s19 + $0xb0] sm:$0xff] }
 0x105   : > { %v573_v3 = vpop.f32.mrb[4].mxu0  ;;  %v637_v4 = vpop.f32.mrb[4].mxu1 }
 0x106   : > { %790 = vst.msk [vmem:[%s1192_s22 + $0x8] sm:$0xff] %vm788_vm1, %v757_v1  ;;  %806 = vst.msk [vmem:[%s1192_s22 + $0x88] sm:$0xff] %vm788_vm1, %v773_v2  ;;  %v574_v5 = vadd.f32 %v1174_v42, %v573_v3  ;;  %v638_v6 = vadd.f32 %v1174_v42, %v637_v4  ;;  %v575_v7 = vpop.f32.mrb[5].mxu0  ;;  %v639_v8 = vpop.f32.mrb[5].mxu1  ;;  %v731_v4 = vld [vmem:[%s1180_s19 + $0x38] sm:$0xff] }
 0x107   : > { %v576_v11 = vpop.f32.mrb[6].mxu0  ;;  %v640_v12 = vpop.f32.mrb[6].mxu1 }
 0x108   : > { %v694_v13 = vmax.f32 %v574_v5, 0.0  ;;  %v710_v14 = vmax.f32 %v638_v6, 0.0  ;;  %v577_v15 = vadd.f32 %v1174_v42, %v576_v11  ;;  %v641_v16 = vadd.f32 %v1174_v42, %v640_v12  ;;  %v578_v17 = vpop.f32.mrb[7].mxu0  ;;  %v642_v18 = vpop.f32.mrb[7].mxu1  ;;  %v747_v5 = vld [vmem:[%s1180_s19 + $0xb8] sm:$0xff] }
 0x109   : > { %v732_v18 = vld [vmem:[%s1180_s19 + $0x40] sm:$0xff] }
 0x10a   : > { %v758_v21 = vadd.f32 %v726_v9, %v694_v13  ;;  %v774_v22 = vadd.f32 %v742_v10, %v710_v14  ;;  %v695_v23 = vmax.f32 %v577_v15, 0.0  ;;  %v711_v24 = vmax.f32 %v641_v16, 0.0 }
 0x10c   : > { %791 = vst.msk [vmem:[%s1192_s22 + $0x10] sm:$0xff] %vm788_vm1, %v758_v21  ;;  %807 = vst.msk [vmem:[%s1192_s22 + $0x90] sm:$0xff] %vm788_vm1, %v774_v22  ;;  %v759_v25 = vadd.f32 %v727_v19, %v695_v23  ;;  %v775_v26 = vadd.f32 %v743_v20, %v711_v24  ;;  %v748_v19 = vld [vmem:[%s1180_s19 + $0xc0] sm:$0xff] }
 0x10d   : > { %v581_v27 = vpop.f32.mrb[8].mxu0  ;;  %v645_v28 = vpop.f32.mrb[8].mxu1 }
 0x10e   : > { %792 = vst.msk [vmem:[%s1192_s22 + $0x18] sm:$0xff] %vm788_vm1, %v759_v25  ;;  %808 = vst.msk [vmem:[%s1192_s22 + $0x98] sm:$0xff] %vm788_vm1, %v775_v26  ;;  %v582_v29 = vadd.f32 %v1174_v42, %v581_v27  ;;  %v646_v30 = vadd.f32 %v1174_v42, %v645_v28  ;;  %v583_v31 = vpop.f32.mrb[9].mxu0  ;;  %v647_v32 = vpop.f32.mrb[9].mxu1  ;;  %v733_v28 = vld [vmem:[%s1180_s19 + $0x48] sm:$0xff] }
 0x10f   : > { %v584_v35 = vpop.f32.mrb[10].mxu0  ;;  %v648_v36 = vpop.f32.mrb[10].mxu1 }
 0x110   : > { %v696_v37 = vmax.f32 %v582_v29, 0.0  ;;  %v712_v38 = vmax.f32 %v646_v30, 0.0  ;;  %v585_v39 = vadd.f32 %v1174_v42, %v584_v35  ;;  %v649_v40 = vadd.f32 %v1174_v42, %v648_v36  ;;  %v586_v41 = vpop.f32.mrb[11].mxu0  ;;  %v650_v43 = vpop.f32.mrb[11].mxu1  ;;  %v749_v29 = vld [vmem:[%s1180_s19 + $0xc8] sm:$0xff] }
 0x111   : > { %v734_v43 = vld [vmem:[%s1180_s19 + $0x50] sm:$0xff] }
 0x112   : > { %v760_v46 = vadd.f32 %v728_v33, %v696_v37  ;;  %v776_v47 = vadd.f32 %v744_v34, %v712_v38  ;;  %v697_v48 = vmax.f32 %v585_v39, 0.0  ;;  %v713_v49 = vmax.f32 %v649_v40, 0.0 }
 0x114   : > { %793 = vst.msk [vmem:[%s1192_s22 + $0x20] sm:$0xff] %vm788_vm1, %v760_v46  ;;  %809 = vst.msk [vmem:[%s1192_s22 + $0xa0] sm:$0xff] %vm788_vm1, %v776_v47  ;;  %v761_v50 = vadd.f32 %v729_v44, %v697_v48  ;;  %v777_v51 = vadd.f32 %v745_v45, %v713_v49  ;;  %v750_v44 = vld [vmem:[%s1180_s19 + $0xd0] sm:$0xff] }
 0x115   : > { %v589_v52 = vpop.f32.mrb[12].mxu0  ;;  %v653_v53 = vpop.f32.mrb[12].mxu1 }
 0x116   : > { %794 = vst.msk [vmem:[%s1192_s22 + $0x28] sm:$0xff] %vm788_vm1, %v761_v50  ;;  %810 = vst.msk [vmem:[%s1192_s22 + $0xa8] sm:$0xff] %vm788_vm1, %v777_v51  ;;  %v590_v54 = vadd.f32 %v1174_v42, %v589_v52  ;;  %v654_v55 = vadd.f32 %v1174_v42, %v653_v53  ;;  %v591_v56 = vpop.f32.mrb[13].mxu0  ;;  %v655_v57 = vpop.f32.mrb[13].mxu1  ;;  %v735_v53 = vld [vmem:[%s1180_s19 + $0x58] sm:$0xff] }
 0x117   : > { %v592_v60 = vpop.f32.mrb[14].mxu0  ;;  %v656_v61 = vpop.f32.mrb[14].mxu1 }
 0x118   : > { %v698_v62 = vmax.f32 %v590_v54, 0.0  ;;  %v714_v63 = vmax.f32 %v654_v55, 0.0  ;;  %v593_v0 = vadd.f32 %v1174_v42, %v592_v60  ;;  %v657_v1 = vadd.f32 %v1174_v42, %v656_v61  ;;  %v594_v2 = vpop.f32.mrb[15].mxu0  ;;  %v658_v3 = vpop.f32.mrb[15].mxu1  ;;  %v751_v54 = vld [vmem:[%s1180_s19 + $0xd8] sm:$0xff] }
 0x119   : > { %v736_v3 = vld [vmem:[%s1180_s19 + $0x60] sm:$0xff] }
 0x11a   : > { %v762_v6 = vadd.f32 %v730_v58, %v698_v62  ;;  %v778_v7 = vadd.f32 %v746_v59, %v714_v63  ;;  %v699_v8 = vmax.f32 %v593_v0, 0.0  ;;  %v715_v9 = vmax.f32 %v657_v1, 0.0 }
 0x11c   : > { %795 = vst.msk [vmem:[%s1192_s22 + $0x30] sm:$0xff] %vm788_vm1, %v762_v6  ;;  %811 = vst.msk [vmem:[%s1192_s22 + $0xb0] sm:$0xff] %vm788_vm1, %v778_v7  ;;  %v763_v10 = vadd.f32 %v731_v4, %v699_v8  ;;  %v779_v11 = vadd.f32 %v747_v5, %v715_v9  ;;  %v752_v4 = vld [vmem:[%s1180_s19 + $0xe0] sm:$0xff] }
 0x11d   : > { %v597_v12 = vpop.f32.mrb[16].mxu0  ;;  %v661_v13 = vpop.f32.mrb[16].mxu1 }
 0x11e   : > { %796 = vst.msk [vmem:[%s1192_s22 + $0x38] sm:$0xff] %vm788_vm1, %v763_v10  ;;  %812 = vst.msk [vmem:[%s1192_s22 + $0xb8] sm:$0xff] %vm788_vm1, %v779_v11  ;;  %v598_v14 = vadd.f32 %v1174_v42, %v597_v12  ;;  %v662_v15 = vadd.f32 %v1174_v42, %v661_v13  ;;  %v599_v16 = vpop.f32.mrb[17].mxu0  ;;  %v663_v17 = vpop.f32.mrb[17].mxu1  ;;  %v737_v13 = vld [vmem:[%s1180_s19 + $0x68] sm:$0xff] }
 0x11f   : > { %v600_v20 = vpop.f32.mrb[18].mxu0  ;;  %v664_v21 = vpop.f32.mrb[18].mxu1 }
 0x120   : > { %v700_v22 = vmax.f32 %v598_v14, 0.0  ;;  %v716_v23 = vmax.f32 %v662_v15, 0.0  ;;  %v601_v24 = vadd.f32 %v1174_v42, %v600_v20  ;;  %v665_v25 = vadd.f32 %v1174_v42, %v664_v21  ;;  %v602_v26 = vpop.f32.mrb[19].mxu0  ;;  %v666_v27 = vpop.f32.mrb[19].mxu1  ;;  %v753_v14 = vld [vmem:[%s1180_s19 + $0xe8] sm:$0xff] }
 0x121   : > { %v738_v27 = vld [vmem:[%s1180_s19 + $0x70] sm:$0xff] }
 0x122   : > { %v764_v30 = vadd.f32 %v732_v18, %v700_v22  ;;  %v780_v31 = vadd.f32 %v748_v19, %v716_v23  ;;  %v701_v32 = vmax.f32 %v601_v24, 0.0  ;;  %v717_v33 = vmax.f32 %v665_v25, 0.0 }
 0x124   : > { %797 = vst.msk [vmem:[%s1192_s22 + $0x40] sm:$0xff] %vm788_vm1, %v764_v30  ;;  %813 = vst.msk [vmem:[%s1192_s22 + $0xc0] sm:$0xff] %vm788_vm1, %v780_v31  ;;  %v765_v34 = vadd.f32 %v733_v28, %v701_v32  ;;  %v781_v35 = vadd.f32 %v749_v29, %v717_v33  ;;  %v754_v28 = vld [vmem:[%s1180_s19 + $0xf0] sm:$0xff] }
 0x125   : > { %v605_v36 = vpop.f32.mrb[20].mxu0  ;;  %v669_v37 = vpop.f32.mrb[20].mxu1 }
 0x126   : > { %798 = vst.msk [vmem:[%s1192_s22 + $0x48] sm:$0xff] %vm788_vm1, %v765_v34  ;;  %814 = vst.msk [vmem:[%s1192_s22 + $0xc8] sm:$0xff] %vm788_vm1, %v781_v35  ;;  %v606_v38 = vadd.f32 %v1174_v42, %v605_v36  ;;  %v670_v39 = vadd.f32 %v1174_v42, %v669_v37  ;;  %v607_v40 = vpop.f32.mrb[21].mxu0  ;;  %v671_v41 = vpop.f32.mrb[21].mxu1  ;;  %v739_v37 = vld [vmem:[%s1180_s19 + $0x78] sm:$0xff] }
 0x127   : > { %v608_v45 = vpop.f32.mrb[22].mxu0  ;;  %v672_v46 = vpop.f32.mrb[22].mxu1 }
 0x128   : > { %v702_v47 = vmax.f32 %v606_v38, 0.0  ;;  %v718_v48 = vmax.f32 %v670_v39, 0.0  ;;  %v609_v49 = vadd.f32 %v1174_v42, %v608_v45  ;;  %v673_v50 = vadd.f32 %v1174_v42, %v672_v46  ;;  %v610_v51 = vpop.f32.mrb[23].mxu0  ;;  %v674_v52 = vpop.f32.mrb[23].mxu1  ;;  %v755_v38 = vld [vmem:[%s1180_s19 + $0xf8] sm:$0xff] }
 0x12a   : > { %v766_v55 = vadd.f32 %v734_v43, %v702_v47  ;;  %v782_v56 = vadd.f32 %v750_v44, %v718_v48  ;;  %v703_v57 = vmax.f32 %v609_v49, 0.0  ;;  %v719_v58 = vmax.f32 %v673_v50, 0.0 }
 0x12c   : > { %799 = vst.msk [vmem:[%s1192_s22 + $0x50] sm:$0xff] %vm788_vm1, %v766_v55  ;;  %815 = vst.msk [vmem:[%s1192_s22 + $0xd0] sm:$0xff] %vm788_vm1, %v782_v56  ;;  %v767_v59 = vadd.f32 %v735_v53, %v703_v57  ;;  %v783_v60 = vadd.f32 %v751_v54, %v719_v58 }
 0x12d   : > { %v613_v61 = vpop.f32.mrb[24].mxu0  ;;  %v677_v62 = vpop.f32.mrb[24].mxu1 }
 0x12e   : > { %800 = vst.msk [vmem:[%s1192_s22 + $0x58] sm:$0xff] %vm788_vm1, %v767_v59  ;;  %816 = vst.msk [vmem:[%s1192_s22 + $0xd8] sm:$0xff] %vm788_vm1, %v783_v60  ;;  %v614_v63 = vadd.f32 %v1174_v42, %v613_v61  ;;  %v678_v0 = vadd.f32 %v1174_v42, %v677_v62  ;;  %v615_v1 = vpop.f32.mrb[25].mxu0  ;;  %v679_v2 = vpop.f32.mrb[25].mxu1 }
 0x12f   : > { %v616_v5 = vpop.f32.mrb[26].mxu0  ;;  %v680_v6 = vpop.f32.mrb[26].mxu1 }
 0x130   : > { %v704_v7 = vmax.f32 %v614_v63, 0.0  ;;  %v720_v8 = vmax.f32 %v678_v0, 0.0  ;;  %v617_v9 = vadd.f32 %v1174_v42, %v616_v5  ;;  %v681_v10 = vadd.f32 %v1174_v42, %v680_v6  ;;  %v618_v11 = vpop.f32.mrb[27].mxu0  ;;  %v682_v12 = vpop.f32.mrb[27].mxu1 }
 0x132   : > { %v768_v15 = vadd.f32 %v736_v3, %v704_v7  ;;  %v784_v16 = vadd.f32 %v752_v4, %v720_v8  ;;  %v705_v17 = vmax.f32 %v617_v9, 0.0  ;;  %v721_v18 = vmax.f32 %v681_v10, 0.0 }
 0x134   : > { %801 = vst.msk [vmem:[%s1192_s22 + $0x60] sm:$0xff] %vm788_vm1, %v768_v15  ;;  %817 = vst.msk [vmem:[%s1192_s22 + $0xe0] sm:$0xff] %vm788_vm1, %v784_v16  ;;  %v769_v19 = vadd.f32 %v737_v13, %v705_v17  ;;  %v785_v20 = vadd.f32 %v753_v14, %v721_v18 }
 0x135   : > { %v621_v21 = vpop.f32.mrb[28].mxu0  ;;  %v685_v22 = vpop.f32.mrb[28].mxu1 }
 0x136   : > { %802 = vst.msk [vmem:[%s1192_s22 + $0x68] sm:$0xff] %vm788_vm1, %v769_v19  ;;  %818 = vst.msk [vmem:[%s1192_s22 + $0xe8] sm:$0xff] %vm788_vm1, %v785_v20  ;;  %v622_v23 = vadd.f32 %v1174_v42, %v621_v21  ;;  %v686_v24 = vadd.f32 %v1174_v42, %v685_v22  ;;  %v623_v25 = vpop.f32.mrb[29].mxu0  ;;  %v687_v26 = vpop.f32.mrb[29].mxu1 }
 0x137   : > { %v624_v29 = vpop.f32.mrb[30].mxu0  ;;  %v688_v30 = vpop.f32.mrb[30].mxu1 }
 0x138   : > { %v706_v31 = vmax.f32 %v622_v23, 0.0  ;;  %v722_v32 = vmax.f32 %v686_v24, 0.0  ;;  %v625_v33 = vadd.f32 %v1174_v42, %v624_v29  ;;  %v689_v34 = vadd.f32 %v1174_v42, %v688_v30  ;;  %v626_v35 = vpop.f32.mrb[31].mxu0  ;;  %v690_v36 = vpop.f32.mrb[31].mxu1 }
 0x13a   : > { %v770_v39 = vadd.f32 %v738_v27, %v706_v31  ;;  %v786_v40 = vadd.f32 %v754_v28, %v722_v32  ;;  %v707_v41 = vmax.f32 %v625_v33, 0.0  ;;  %v723_v43 = vmax.f32 %v689_v34, 0.0 }
 0x13c   : > { %803 = vst.msk [vmem:[%s1192_s22 + $0x70] sm:$0xff] %vm788_vm1, %v770_v39  ;;  %819 = vst.msk [vmem:[%s1192_s22 + $0xf0] sm:$0xff] %vm788_vm1, %v786_v40  ;;  %v771_v44 = vadd.f32 %v739_v37, %v707_v41  ;;  %v787_v45 = vadd.f32 %v755_v38, %v723_v43 }
 0x13e   : > { %804 = vst.msk [vmem:[%s1192_s22 + $0x78] sm:$0xff] %vm788_vm1, %v771_v44  ;;  %820 = vst.msk [vmem:[%s1192_s22 + $0xf8] sm:$0xff] %vm788_vm1, %v787_v45 }
 0x13f PF: > { %s14_s15 = sadd.s32 1, %s1052_s15  }
 0x140   : > { %p11_p4 = scmp.ge.s32.totalorder %s14_s15, 4  }
 0x142   :  { %13 = sbr.rel (!%p11_p4) target bundleno = 1 (0x1), region = 69 }

// kernel: feature_fusor_forward.19
= control target key start
LH: loop header
LB: loop body
LE: loop exit
PB: predicated region body
PF: predicated region fallthrough
CT: control target
= control target key end

     0   :  { %s1874_s12 = smov 0   ;;  %s2355_s0 = inlined_call_operand.vmem [shape: bf16[512,288], index: 0, kind: input, shape index: {}]   ;;  %s2356_s1 = inlined_call_operand.vmem [shape: bf16[288,32], index: 1, kind: input, shape index: {}]   ;;  %s2357_s2 = inlined_call_operand.vmem [shape: f32[1,32], index: 2, kind: input, shape index: {}]   ;;  %s2358_s3 = inlined_call_operand.vmem [shape: f32[512,32], index: 3, kind: output, shape index: {}]  }
   0x1 LB: > { %s1319_s13 = sadd.s32 4294967295, %s1852_s12   ;;  %p1323_p0 = scmp.ge.s32.totalorder %s1852_s12, 1  ;;  %s1852_s12 = sphi %s1874_s12, %s13_s12  }
   0x2   : > { %p139_p1 = scmp.lt.s32.totalorder %s1852_s12, 3 }
   0x4   : > { %p140_p2 = pnand %p1323_p0, %p139_p1 }
   0x5   : > { %v1636_v0 = vld [vmem:[%s2356_s1 + $0x40] sm:$0xff] (!%p140_p2)   ;;  %s1324_s16 = sshll.u32 (!%p140_p2), %s1319_s13, 5  ;;  %v1638_v2 = vld [vmem:[%s2356_s1 + $0x48] sm:$0xff] (!%p140_p2)   ;;  %v1640_v4 = vld [vmem:[%s2356_s1 + $0x50] sm:$0xff] (!%p140_p2)   ;;  %vm633_vm0 = vcmask (!%p140_p2), 261120  }
   0x6   : > { %143 = sbr.rel (%p140_p2) target bundleno = 385 (0x181), region = 32  ;;  %v1637_v1 = vld [vmem:[%s2356_s1] sm:$0xff] (!%p140_p2)   ;;  %1445 = vmatprep.subr.bf16.mxu0 (!%p140_p2), %v1636_v0  ;;  %1611 = vmatprep.subr.bf16.mxu1 (!%p140_p2), %v1636_v0  ;;  %p165_p3 = scmp.lt.s32.totalorder (!%p140_p2), %s1324_s16, 63  ;;  %v1639_v3 = vld [vmem:[%s2356_s1 + $0x8] sm:$0xff] (!%p140_p2)   ;;  %v1641_v5 = vld [vmem:[%s2356_s1 + $0x10] sm:$0xff] (!%p140_p2)  }
   0x7   : > { %1446 = vmatpush3.bf16.msra.mxu0 (!%p140_p2), %v1637_v1  ;;  %1619 = vmatpush3.bf16.msra.mxu1 (!%p140_p2), %v1637_v1  ;;  %v1642_v6 = vld [vmem:[%s2356_s1 + $0x58] sm:$0xff] (!%p140_p2)   ;;  %v1644_v8 = vld [vmem:[%s2356_s1 + $0x60] sm:$0xff] (!%p140_p2)   ;;  %v1646_v10 = vld [vmem:[%s2356_s1 + $0x68] sm:$0xff] (!%p140_p2)  }
   0x8   : > { %1447 = vmatprep.subr.bf16.mxu0 (!%p140_p2), %v1638_v2  ;;  %1612 = vmatprep.subr.bf16.mxu1 (!%p140_p2), %v1638_v2  ;;  %v1643_v7 = vld [vmem:[%s2356_s1 + $0x18] sm:$0xff] (!%p140_p2)   ;;  %v1645_v9 = vld [vmem:[%s2356_s1 + $0x20] sm:$0xff] (!%p140_p2)   ;;  %v1647_v13 = vld [vmem:[%s2356_s1 + $0x28] sm:$0xff] (!%p140_p2)  }
   0x9   : > { %v1648_v14 = vld [vmem:[%s2356_s1 + $0x70] sm:$0xff] (!%p140_p2)   ;;  %v1650_v16 = vld [vmem:[%s2356_s1 + $0x78] sm:$0xff] (!%p140_p2)   ;;  %v1658_v18 = vld [vmem:[%s2356_s1 + $0x80] sm:$0xff] (!%p140_p2)  }
   0xa   : > { %v1649_v15 = vld [vmem:[%s2356_s1 + $0x30] sm:$0xff] (!%p140_p2)   ;;  %v1651_v17 = vld [vmem:[%s2356_s1 + $0x38] sm:$0xff] (!%p140_p2)   ;;  %v1671_v23 = vld [vmem:[%s2356_s1 + $0x88] sm:$0xff] (!%p140_p2)  }
   0xb   : > { %1448 = vmatpush3.bf16.msra.mxu0 (!%p140_p2), %v1639_v3  ;;  %1620 = vmatpush3.bf16.msra.mxu1 (!%p140_p2), %v1639_v3 }
   0xc   : > { %1449 = vmatprep.subr.bf16.mxu0 (!%p140_p2), %v1640_v4  ;;  %1613 = vmatprep.subr.bf16.mxu1 (!%p140_p2), %v1640_v4 }
   0xd   : > { %s2360_s16 = smov (!%p165_p3, %s1324_s16), 63 }
   0xe   : > { %s1627_s29 = smul.u32 12, %s2360_s16  ;;  %s1327_s5 = sshll.u32 %s2360_s16, 3 }
   0xf   : > { %1450 = vmatpush3.bf16.msra.mxu0 %v1641_v5  ;;  %1621 = vmatpush3.bf16.msra.mxu1 %v1641_v5  ;;  %s2087_s7 = scalar_lea.vmem %s2358_s3, %s1327_s5 }
  0x10   : > { %1451 = vmatprep.subr.bf16.mxu0 %v1642_v6  ;;  %1614 = vmatprep.subr.bf16.mxu1 %v1642_v6  ;;  %s1915_s9 = scalar_lea.vmem %s2355_s0, %s1627_s29 }
  0x11   : > { %v1654_v11 = vld [vmem:[%s1915_s9 + $0x4] ss:$12 sps:$4 sm:$0xff]   ;;  %v1652_v19 = vld [vmem:[%s1915_s9] ss:$12 sps:$4 sm:$0xff]   ;;  %v1659_v21 = vld [vmem:[%s1915_s9 + $0x1c] ss:$12 sps:$4 sm:$0xff]  }
  0x12   : > { %v1657_v12 = vld [vmem:[%s1915_s9 + $0x124] ss:$12 sps:$4 sm:$0xff]   ;;  %714 = vmatprep.mubr.bf16.mxu0 %v1654_v11  ;;  %v1655_v20 = vld [vmem:[%s1915_s9 + $0x120] ss:$12 sps:$4 sm:$0xff]   ;;  %v1661_v22 = vld [vmem:[%s1915_s9 + $0x13c] ss:$12 sps:$4 sm:$0xff]  }
  0x13   : > { %1452 = vmatpush3.bf16.msra.mxu0 %v1643_v7  ;;  %1622 = vmatpush3.bf16.msra.mxu1 %v1643_v7  ;;  %v1663_v24 = vld [vmem:[%s1915_s9 + $0x18] ss:$12 sps:$4 sm:$0xff]   ;;  %v1665_v26 = vld [vmem:[%s1915_s9 + $0x34] ss:$12 sps:$4 sm:$0xff]   ;;  %v1669_v28 = vld [vmem:[%s1915_s9 + $0x30] ss:$12 sps:$4 sm:$0xff]  }
  0x14   : > { %1453 = vmatprep.subr.bf16.mxu0 %v1644_v8  ;;  %1615 = vmatprep.subr.bf16.mxu1 %v1644_v8  ;;  %v1664_v25 = vld [vmem:[%s1915_s9 + $0x138] ss:$12 sps:$4 sm:$0xff]   ;;  %v1667_v27 = vld [vmem:[%s1915_s9 + $0x154] ss:$12 sps:$4 sm:$0xff]   ;;  %v1670_v29 = vld [vmem:[%s1915_s9 + $0x150] ss:$12 sps:$4 sm:$0xff]  }
  0x15   : > { %810 = vmatprep.mubr.bf16.mxu1 %v1657_v12  ;;  %v1672_v30 = vld [vmem:[%s1915_s9 + $0x4c] ss:$12 sps:$4 sm:$0xff]   ;;  %v1676_v32 = vld [vmem:[%s1915_s9 + $0x48] ss:$12 sps:$4 sm:$0xff]   ;;  %v1678_v34 = vld [vmem:[%s1915_s9 + $0x64] ss:$12 sps:$4 sm:$0xff]  }
  0x16   : > { %v1674_v31 = vld [vmem:[%s1915_s9 + $0x16c] ss:$12 sps:$4 sm:$0xff]   ;;  %v1677_v33 = vld [vmem:[%s1915_s9 + $0x168] ss:$12 sps:$4 sm:$0xff]   ;;  %v1687_v41 = vld [vmem:[%s1915_s9 + $0x50] ss:$12 sps:$4 sm:$0xff]  }
  0x17   : > { %1454 = vmatpush3.bf16.msra.mxu0 %v1645_v9  ;;  %1623 = vmatpush3.bf16.msra.mxu1 %v1645_v9  ;;  %v1680_v35 = vld [vmem:[%s1915_s9 + $0x8] ss:$12 sps:$4 sm:$0xff]   ;;  %v1681_v36 = vld [vmem:[%s1915_s9 + $0x60] ss:$12 sps:$4 sm:$0xff]   ;;  %v1685_v39 = vld [vmem:[%s1915_s9 + $0x38] ss:$12 sps:$4 sm:$0xff]  }
  0x18   : > { %1455 = vmatprep.subr.bf16.mxu0 %v1646_v10  ;;  %1616 = vmatprep.subr.bf16.mxu1 %v1646_v10  ;;  %v1682_v37 = vld [vmem:[%s1915_s9 + $0x20] ss:$12 sps:$4 sm:$0xff]   ;;  %v1683_v38 = vld [vmem:[%s1915_s9 + $0x7c] ss:$12 sps:$4 sm:$0xff]   ;;  %v1686_v40 = vld [vmem:[%s1915_s9 + $0x78] ss:$12 sps:$4 sm:$0xff]  }
  0x19   : > { %v1688_v42 = vld [vmem:[%s1915_s9 + $0x94] ss:$12 sps:$4 sm:$0xff]   ;;  %v1691_v44 = vld [vmem:[%s1915_s9 + $0x90] ss:$12 sps:$4 sm:$0xff]   ;;  %v1693_v46 = vld [vmem:[%s1915_s9 + $0xac] ss:$12 sps:$4 sm:$0xff]  }
  0x1a   : > { %v1690_v43 = vld [vmem:[%s1915_s9 + $0x68] ss:$12 sps:$4 sm:$0xff]   ;;  %v1692_v45 = vld [vmem:[%s1915_s9 + $0x80] ss:$12 sps:$4 sm:$0xff]   ;;  %v1695_v47 = vld [vmem:[%s1915_s9 + $0x98] ss:$12 sps:$4 sm:$0xff]  }
  0x1b   : > { %1456 = vmatpush3.bf16.msra.mxu0 %v1647_v13  ;;  %1624 = vmatpush3.bf16.msra.mxu1 %v1647_v13  ;;  %v1696_v48 = vld [vmem:[%s1915_s9 + $0xa8] ss:$12 sps:$4 sm:$0xff]   ;;  %v1697_v49 = vld [vmem:[%s1915_s9 + $0xb0] ss:$12 sps:$4 sm:$0xff]   ;;  %v1701_v52 = vld [vmem:[%s1915_s9 + $0xc0] ss:$12 sps:$4 sm:$0xff]  }
  0x1c   : > { %1457 = vmatprep.subr.bf16.mxu0 %v1648_v14  ;;  %1617 = vmatprep.subr.bf16.mxu1 %v1648_v14  ;;  %v1698_v50 = vld [vmem:[%s1915_s9 + $0xc4] ss:$12 sps:$4 sm:$0xff]   ;;  %v1700_v51 = vld [vmem:[%s1915_s9 + $0xc8] ss:$12 sps:$4 sm:$0xff]   ;;  %v1702_v53 = vld [vmem:[%s1915_s9 + $0xe0] ss:$12 sps:$4 sm:$0xff]  }
  0x1d   : > { %v1703_v54 = vld [vmem:[%s1915_s9 + $0xdc] ss:$12 sps:$4 sm:$0xff]   ;;  %v1705_v55 = vld [vmem:[%s1915_s9 + $0xf8] ss:$12 sps:$4 sm:$0xff]   ;;  %v1708_v58 = vld [vmem:[%s1915_s9 + $0xf4] ss:$12 sps:$4 sm:$0xff]  }
  0x1e   : > { %v1706_v56 = vld [vmem:[%s1915_s9 + $0xd8] ss:$12 sps:$4 sm:$0xff]   ;;  %v1707_v57 = vld [vmem:[%s1915_s9 + $0x110] ss:$12 sps:$4 sm:$0xff]   ;;  %v1710_v59 = vld [vmem:[%s1915_s9 + $0x128] ss:$12 sps:$4 sm:$0xff]  }
  0x1f   : > { %1458 = vmatpush3.bf16.msra.mxu0 %v1649_v15  ;;  %1625 = vmatpush3.bf16.msra.mxu1 %v1649_v15  ;;  %v1711_v60 = vld [vmem:[%s1915_s9 + $0xf0] ss:$12 sps:$4 sm:$0xff]   ;;  %v1712_v61 = vld [vmem:[%s1915_s9 + $0x140] ss:$12 sps:$4 sm:$0xff]   ;;  %v1715_v63 = vld [vmem:[%s1915_s9 + $0x158] ss:$12 sps:$4 sm:$0xff]  }
  0x20   : > { %1459 = vmatprep.subr.bf16.mxu0 %v1650_v16  ;;  %1618 = vmatprep.subr.bf16.mxu1 %v1650_v16  ;;  %v1713_v62 = vld [vmem:[%s1915_s9 + $0x10c] ss:$12 sps:$4 sm:$0xff]   ;;  %v1716_v0 = vld [vmem:[%s1915_s9 + $0x108] ss:$12 sps:$4 sm:$0xff]   ;;  %v1717_v1 = vld [vmem:[%s1915_s9 + $0x170] ss:$12 sps:$4 sm:$0xff]  }
  0x23   : > { %1460 = vmatpush3.bf16.msra.mxu0 %v1651_v17  ;;  %1626 = vmatpush3.bf16.msra.mxu1 %v1651_v17 }
  0x24   : > { %1575 = vmatprep.subr.bf16.mxu1 %v1658_v18 }
  0x26   : > { %715 = vmatmul.mubr.bf16.vlgmr.msra.gmra.mrb[0].mxu0 %v1652_v19  ;;  %811 = vmatmul.mubr.bf16.vlgmr.msra.gmra.mrb[0].mxu1 %v1655_v20 }
  0x27   : > { %1576 = vmatpush3.bf16.msra.mxu1 %v1658_v18  ;;  %722 = vmatprep.mubr.bf16.mxu0 %v1659_v21 }
  0x28   : > { %818 = vmatprep.mubr.bf16.mxu1 %v1661_v22  ;;  %1577 = vmatprep.subr.bf16.mxu1 %v1671_v23 }
  0x2b   : > { %1578 = vmatpush3.bf16.msra.mxu1 %v1671_v23 }
  0x2e   : > { %723 = vmatmul.mubr.bf16.gmra.mrb[4].mxu0 %v1663_v24  ;;  %819 = vmatmul.mubr.bf16.gmra.mrb[4].mxu1 %v1664_v25 }
  0x2f   : > { %730 = vmatprep.mubr.bf16.mxu0 %v1665_v26  ;;  %826 = vmatprep.mubr.bf16.mxu1 %v1667_v27 }
  0x36   : > { %731 = vmatmul.mubr.bf16.gmra.mrb[8].mxu0 %v1669_v28  ;;  %827 = vmatmul.mubr.bf16.gmra.mrb[8].mxu1 %v1670_v29 }
  0x37   : > { %738 = vmatprep.mubr.bf16.mxu0 %v1672_v30  ;;  %834 = vmatprep.mubr.bf16.mxu1 %v1674_v31 }
  0x3e   : > { %739 = vmatmul.mubr.bf16.gmra.mrb[12].mxu0 %v1676_v32  ;;  %835 = vmatmul.mubr.bf16.gmra.mrb[12].mxu1 %v1677_v33 }
  0x3f   : > { %746 = vmatprep.mubr.bf16.mxu0 %v1678_v34  ;;  %1579 = vmatprep.mubr.msk.bf16.mxu1 %vm633_vm0, %v1680_v35 }
  0x46   : > { %747 = vmatmul.mubr.bf16.gmra.mrb[16].mxu0 %v1681_v36  ;;  %1580 = vmatmul.mubr.msk.bf16.vlgmr.msra.gmra.mrb[16].mxu1 %vm633_vm0, %v1682_v37 }
  0x47   : > { %754 = vmatprep.mubr.bf16.mxu0 %v1683_v38  ;;  %1583 = vmatprep.mubr.msk.bf16.mxu1 %vm633_vm0, %v1685_v39 }
  0x4e   : > { %755 = vmatmul.mubr.bf16.gmra.mrb[20].mxu0 %v1686_v40  ;;  %1584 = vmatmul.mubr.msk.bf16.gmra.mrb[20].mxu1 %vm633_vm0, %v1687_v41 }
  0x4f   : > { %762 = vmatprep.mubr.bf16.mxu0 %v1688_v42  ;;  %1587 = vmatprep.mubr.msk.bf16.mxu1 %vm633_vm0, %v1690_v43 }
  0x56   : > { %763 = vmatmul.mubr.bf16.gmra.mrb[24].mxu0 %v1691_v44  ;;  %1588 = vmatmul.mubr.msk.bf16.gmra.mrb[24].mxu1 %vm633_vm0, %v1692_v45 }
  0x57   : > { %770 = vmatprep.mubr.bf16.mxu0 %v1693_v46  ;;  %1591 = vmatprep.mubr.msk.bf16.mxu1 %vm633_vm0, %v1695_v47 }
  0x5e   : > { %771 = vmatmul.mubr.bf16.gmra.mrb[28].mxu0 %v1696_v48  ;;  %1592 = vmatmul.mubr.msk.bf16.gmra.mrb[28].mxu1 %vm633_vm0, %v1697_v49 }
  0x5f   : > { %778 = vmatprep.mubr.bf16.mxu0 %v1698_v50  ;;  %1595 = vmatprep.mubr.msk.bf16.mxu1 %vm633_vm0, %v1700_v51  ;;  %v2027_v50 = vld [vmem:[%s2357_s2] ss:$0 sm:$0xff] }
  0x66   : > { %779 = vmatmul.mubr.bf16.gmra.mrb[32].mxu0 %v1701_v52  ;;  %1596 = vmatmul.mubr.msk.bf16.gmra.mrb[32].mxu1 %vm633_vm0, %v1702_v53 }
  0x67   : > { %786 = vmatprep.mubr.bf16.mxu0 %v1703_v54  ;;  %1599 = vmatprep.mubr.msk.bf16.mxu1 %vm633_vm0, %v1705_v55 }
  0x6e   : > { %787 = vmatmul.mubr.bf16.gmra.mrb[36].mxu0 %v1706_v56  ;;  %1600 = vmatmul.mubr.msk.bf16.gmra.mrb[36].mxu1 %vm633_vm0, %v1707_v57 }
  0x6f   : > { %794 = vmatprep.mubr.bf16.mxu0 %v1708_v58  ;;  %1603 = vmatprep.mubr.msk.bf16.mxu1 %vm633_vm0, %v1710_v59 }
  0x76   : > { %795 = vmatmul.mubr.bf16.gmra.mrb[40].mxu0 %v1711_v60  ;;  %1604 = vmatmul.mubr.msk.bf16.gmra.mrb[40].mxu1 %vm633_vm0, %v1712_v61 }
  0x77   : > { %802 = vmatprep.mubr.bf16.mxu0 %v1713_v62  ;;  %1607 = vmatprep.mubr.msk.bf16.mxu1 %vm633_vm0, %v1715_v63 }
  0x7e   : > { %803 = vmatmul.mubr.bf16.gmra.mrb[44].mxu0 %v1716_v0  ;;  %1608 = vmatmul.mubr.msk.bf16.gmra.mrb[44].mxu1 %vm633_vm0, %v1717_v1 }
  0xf9   : > { %v1461_v2 = vpop.f32.mrb[0].mxu0  ;;  %v1533_v3 = vpop.f32.mrb[0].mxu1 }
  0xfa   : > { %v1462_v4 = vpop.f32.mrb[1].mxu0  ;;  %v1534_v5 = vpop.f32.mrb[1].mxu1 }
  0xfb   : > { %v1463_v6 = vadd.f32 %v1462_v4, %v1461_v2  ;;  %v1464_v7 = vpop.f32.mrb[2].mxu0  ;;  %v2008_v8 = vadd.f32 %v1534_v5, %v1533_v3  ;;  %v1536_v9 = vpop.f32.mrb[2].mxu1 }
  0xfc   : > { %v1465_v10 = vpop.f32.mrb[3].mxu0  ;;  %v1537_v11 = vpop.f32.mrb[3].mxu1 }
  0xfd   : > { %v1466_v12 = vadd.f32 %v1465_v10, %v1464_v7  ;;  %v2010_v13 = vadd.f32 %v1537_v11, %v1536_v9  ;;  %v717_v54 = vadd.f32 %v1463_v6, %v2027_v50 }
  0xff   : > { %v720_v63 = vadd.f32 %v1466_v12, %v2027_v50 }
 0x101   : > { %v1467_v14 = vpop.f32.mrb[4].mxu0  ;;  %v1539_v15 = vpop.f32.mrb[4].mxu1 }
 0x102   : > { %v1468_v16 = vpop.f32.mrb[5].mxu0  ;;  %v1540_v17 = vpop.f32.mrb[5].mxu1 }
 0x103   : > { %v1469_v18 = vadd.f32 %v1468_v16, %v1467_v14  ;;  %v1470_v19 = vpop.f32.mrb[6].mxu0  ;;  %v2012_v20 = vadd.f32 %v1540_v17, %v1539_v15  ;;  %v1542_v21 = vpop.f32.mrb[6].mxu1 }
 0x104   : > { %v1471_v22 = vpop.f32.mrb[7].mxu0  ;;  %v1543_v23 = vpop.f32.mrb[7].mxu1 }
 0x105   : > { %v1472_v24 = vadd.f32 %v1471_v22, %v1470_v19  ;;  %v2014_v25 = vadd.f32 %v1543_v23, %v1542_v21  ;;  %v725_v51 = vadd.f32 %v1469_v18, %v2027_v50 }
 0x107   : > { %v728_v58 = vadd.f32 %v1472_v24, %v2027_v50 }
 0x109   : > { %v1473_v26 = vpop.f32.mrb[8].mxu0  ;;  %v1545_v27 = vpop.f32.mrb[8].mxu1 }
 0x10a   : > { %v1474_v28 = vpop.f32.mrb[9].mxu0  ;;  %v1546_v29 = vpop.f32.mrb[9].mxu1 }
 0x10b   : > { %v1475_v30 = vadd.f32 %v1474_v28, %v1473_v26  ;;  %v1476_v31 = vpop.f32.mrb[10].mxu0  ;;  %v2016_v32 = vadd.f32 %v1546_v29, %v1545_v27  ;;  %v1548_v33 = vpop.f32.mrb[10].mxu1 }
 0x10c   : > { %v1477_v34 = vpop.f32.mrb[11].mxu0  ;;  %v1549_v35 = vpop.f32.mrb[11].mxu1 }
 0x10d   : > { %v1478_v36 = vadd.f32 %v1477_v34, %v1476_v31  ;;  %v2018_v37 = vadd.f32 %v1549_v35, %v1548_v33  ;;  %v733_v14 = vadd.f32 %v1475_v30, %v2027_v50 }
 0x10f   : > { %v736_v24 = vadd.f32 %v1478_v36, %v2027_v50 }
 0x111   : > { %v1479_v38 = vpop.f32.mrb[12].mxu0  ;;  %v1551_v39 = vpop.f32.mrb[12].mxu1 }
 0x112   : > { %v1480_v40 = vpop.f32.mrb[13].mxu0  ;;  %v1552_v41 = vpop.f32.mrb[13].mxu1 }
 0x113   : > { %v1481_v42 = vadd.f32 %v1480_v40, %v1479_v38  ;;  %v1482_v43 = vpop.f32.mrb[14].mxu0  ;;  %v2020_v44 = vadd.f32 %v1552_v41, %v1551_v39  ;;  %v1554_v45 = vpop.f32.mrb[14].mxu1  ;;  %v1004_v40 = vlaneseq }
 0x114   : > { %v1483_v46 = vpop.f32.mrb[15].mxu0  ;;  %v1555_v47 = vpop.f32.mrb[15].mxu1 }
 0x115   : > { %v1484_v48 = vadd.f32 %v1483_v46, %v1482_v43  ;;  %v2022_v49 = vadd.f32 %v1555_v47, %v1554_v45  ;;  %v741_v10 = vadd.f32 %v1481_v42, %v2027_v50 }
 0x117   : > { %v744_v18 = vadd.f32 %v1484_v48, %v2027_v50 }
 0x119   : > { %v1485_v52 = vpop.f32.mrb[16].mxu0  ;;  %v1581_v53 = vpop.f32.mrb[16].mxu1 }
 0x11a   : > { %v2031_v55 = vadd.f32 %v1581_v53, %v725_v51  ;;  %v1486_v56 = vpop.f32.mrb[17].mxu0  ;;  %v877_v57 = vpop.f32.mrb[17].mxu1 }
 0x11b   : > { %v1487_v59 = vadd.f32 %v1486_v56, %v1485_v52  ;;  %v2034_v60 = vadd.f32 %v877_v57, %v717_v54  ;;  %v1488_v61 = vpop.f32.mrb[18].mxu0  ;;  %v1582_v62 = vpop.f32.mrb[18].mxu1 }
 0x11c   : > { %v1413_v0 = vmul.f32 -1.442695, %v2031_v55  ;;  %v2038_v1 = vadd.f32 %v1582_v62, %v728_v58  ;;  %v1489_v2 = vpop.f32.mrb[19].mxu0  ;;  %v880_v3 = vpop.f32.mrb[19].mxu1 }
 0x11d   : > { %v1411_v4 = vmul.f32 -1.442695, %v2034_v60  ;;  %v1490_v5 = vadd.f32 %v1489_v2, %v1488_v61  ;;  %v2041_v6 = vadd.f32 %v880_v3, %v720_v63  ;;  %v749_v45 = vadd.f32 %v1487_v59, %v2027_v50 }
 0x11e   : > { %1718 = vpow2.f32 %v1413_v0  ;;  %v1414_v7 = vmul.f32 -1.442695, %v2038_v1 }
 0x11f   : > { %1720 = vpow2.f32 %v1411_v4  ;;  %v1412_v9 = vmul.f32 -1.442695, %v2041_v6  ;;  %v752_v54 = vadd.f32 %v1490_v5, %v2027_v50 }
 0x120   : > { %1722 = vpow2.f32 %v1414_v7 }
 0x121   : > { %1724 = vpow2.f32 %v1412_v9  ;;  %v1491_v11 = vpop.f32.mrb[20].mxu0  ;;  %v1585_v12 = vpop.f32.mrb[20].mxu1 }
 0x122   : > { %v2047_v15 = vadd.f32 %v1585_v12, %v741_v10  ;;  %v1492_v16 = vpop.f32.mrb[21].mxu0  ;;  %v893_v17 = vpop.f32.mrb[21].mxu1  ;;  %v2075_v10 = vand.u32 127, %v1004_v40 }
 0x123   : > { %v1493_v19 = vadd.f32 %v1492_v16, %v1491_v11  ;;  %v2050_v21 = vadd.f32 %v893_v17, %v733_v14  ;;  %v1494_v22 = vpop.f32.mrb[22].mxu0  ;;  %v1586_v23 = vpop.f32.mrb[22].mxu1 }
 0x124   : > { %v1417_v26 = vmul.f32 -1.442695, %v2047_v15  ;;  %v2054_v27 = vadd.f32 %v1586_v23, %v744_v18  ;;  %v1495_v28 = vpop.f32.mrb[23].mxu0  ;;  %v896_v29 = vpop.f32.mrb[23].mxu1  ;;  %vm1006_vm1 = vcmp.ge.s32.totalorder %v2075_v10, 18 }
 0x125   : > { %v1415_v30 = vmul.f32 -1.442695, %v2050_v21  ;;  %v1496_v31 = vadd.f32 %v1495_v28, %v1494_v22  ;;  %v2057_v33 = vadd.f32 %v896_v29, %v736_v24  ;;  %v757_v36 = vadd.f32 %v1493_v19, %v2027_v50 }
 0x126   : > { %1726 = vpow2.f32 %v1417_v26  ;;  %v1418_v34 = vmul.f32 -1.442695, %v2054_v27 }
 0x127   : > { %1728 = vpow2.f32 %v1415_v30  ;;  %v1416_v35 = vmul.f32 -1.442695, %v2057_v33  ;;  %v760_v53 = vadd.f32 %v1496_v31, %v2027_v50 }
 0x128   : > { %v1719_v38 = vpop.eup %1718  ;;  %1730 = vpow2.f32 %v1418_v34 }
 0x129   : > { %v1721_v39 = vpop.eup %1720  ;;  %v1105_v41 = vadd.f32 1.0, %v1719_v38  ;;  %1732 = vpow2.f32 %v1416_v35  ;;  %v1497_v42 = vpop.f32.mrb[24].mxu0 }
 0x12a   : > { %v1589_v43 = vpop.f32.mrb[24].mxu1  ;;  %v1723_v46 = vpop.eup %1722  ;;  %v1103_v47 = vadd.f32 1.0, %v1721_v39 }
 0x12b   : > { %v2063_v48 = vadd.f32 %v1589_v43, %v757_v36  ;;  %v1498_v51 = vpop.f32.mrb[25].mxu0  ;;  %v909_v52 = vpop.f32.mrb[25].mxu1  ;;  %1734 = vrcp.f32 %v1105_v41  ;;  %v1106_v57 = vadd.f32 1.0, %v1723_v46 }
 0x12c   : > { %v1725_v56 = vpop.eup %1724  ;;  %v1499_v58 = vadd.f32 %v1498_v51, %v1497_v42  ;;  %v2067_v61 = vadd.f32 %v909_v52, %v749_v45  ;;  %v1500_v62 = vpop.f32.mrb[26].mxu0  ;;  %1736 = vrcp.f32 %v1103_v47 }
 0x12d   : > { %v1590_v63 = vpop.f32.mrb[26].mxu1  ;;  %v1104_v59 = vadd.f32 1.0, %v1725_v56  ;;  %v1421_v0 = vmul.f32 -1.442695, %v2063_v48  ;;  %v1501_v3 = vpop.f32.mrb[27].mxu0  ;;  %1738 = vrcp.f32 %v1106_v57 }
 0x12e   : > { %v2070_v2 = vadd.f32 %v1590_v63, %v760_v53  ;;  %v912_v4 = vpop.f32.mrb[27].mxu1  ;;  %v1419_v5 = vmul.f32 -1.442695, %v2067_v61  ;;  %v1502_v7 = vadd.f32 %v1501_v3, %v1500_v62  ;;  %v765_v22 = vadd.f32 %v1499_v58, %v2027_v50 }
 0x12f   : > { %v2073_v9 = vadd.f32 %v912_v4, %v752_v54  ;;  %1740 = vrcp.f32 %v1104_v59 }
 0x130   : > { %v1422_v11 = vmul.f32 -1.442695, %v2070_v2  ;;  %1742 = vpow2.f32 %v1421_v0  ;;  %v1727_v14 = vpop.eup %1726  ;;  %v768_v40 = vadd.f32 %v1502_v7, %v2027_v50 }
 0x131   : > { %v1420_v12 = vmul.f32 -1.442695, %v2073_v9  ;;  %1744 = vpow2.f32 %v1419_v5  ;;  %v1729_v16 = vpop.eup %1728  ;;  %v1109_v17 = vadd.f32 1.0, %v1727_v14  ;;  %v1503_v18 = vpop.f32.mrb[28].mxu0 }
 0x132   : > { %1746 = vpow2.f32 %v1422_v11  ;;  %v1593_v19 = vpop.f32.mrb[28].mxu1  ;;  %v1731_v23 = vpop.eup %1730  ;;  %v1107_v24 = vadd.f32 1.0, %v1729_v16 }
 0x133   : > { %1748 = vpow2.f32 %v1420_v12  ;;  %v1504_v26 = vpop.f32.mrb[29].mxu0  ;;  %v925_v28 = vpop.f32.mrb[29].mxu1  ;;  %v1110_v30 = vadd.f32 1.0, %v1731_v23 }
 0x134   : > { %v1733_v29 = vpop.eup %1732  ;;  %1750 = vrcp.f32 %v1109_v17  ;;  %v1505_v31 = vadd.f32 %v1504_v26, %v1503_v18  ;;  %v2082_v34 = vadd.f32 %v925_v28, %v765_v22  ;;  %v1506_v35 = vpop.f32.mrb[30].mxu0 }
 0x135   : > { %v1594_v38 = vpop.f32.mrb[30].mxu1  ;;  %1752 = vrcp.f32 %v1107_v24  ;;  %v1108_v36 = vadd.f32 1.0, %v1733_v29  ;;  %v1507_v39 = vpop.f32.mrb[31].mxu0 }
 0x136   : > { %v928_v41 = vpop.f32.mrb[31].mxu1  ;;  %v1735_v42 = vpop.eup %1734  ;;  %1754 = vrcp.f32 %v1110_v30  ;;  %v773_v43 = vadd.f32 %v1505_v31, %v2027_v50  ;;  %v1423_v45 = vmul.f32 -1.442695, %v2082_v34  ;;  %v1508_v46 = vadd.f32 %v1507_v39, %v1506_v35 }
 0x137   : > { %v1737_v47 = vpop.eup %1736  ;;  %v1201_v51 = vsel %vm1006_vm1, %v1735_v42, %v2031_v55  ;;  %1756 = vrcp.f32 %v1108_v36  ;;  %v2095_v52 = vadd.f32 %v928_v41, %v768_v40 }
 0x138   : > { %v1739_v53 = vpop.eup %1738  ;;  %1233 = vst.msk [vmem:[%s2087_s7 + $0x10] sm:$0xff] %vm633_vm0, %v1201_v51  ;;  %v1199_v54 = vsel %vm1006_vm1, %v1737_v47, %v2034_v60  ;;  %v2102_v56 = vadd.f32 %v1593_v19, %v773_v43  ;;  %1758 = vpow2.f32 %v1423_v45  ;;  %v776_v57 = vadd.f32 %v1508_v46, %v2027_v50 }
 0x139   : > { %v1741_v58 = vpop.eup %1740  ;;  %1231 = vst.msk [vmem:[%s2087_s7] sm:$0xff] %vm633_vm0, %v1199_v54  ;;  %v1202_v55 = vsel %vm1006_vm1, %v1739_v53, %v2038_v1  ;;  %v1424_v62 = vmul.f32 -1.442695, %v2095_v52  ;;  %v1509_v3 = vpop.f32.mrb[32].mxu0 }
 0x13a   : > { %v1743_v63 = vpop.eup %1742  ;;  %1234 = vst.msk [vmem:[%s2087_s7 + $0x18] sm:$0xff] %vm633_vm0, %v1202_v55  ;;  %v1200_v60 = vsel %vm1006_vm1, %v1741_v58, %v2041_v6  ;;  %v1425_v59 = vmul.f32 -1.442695, %v2102_v56  ;;  %v2117_v0 = vadd.f32 %v1594_v38, %v776_v57  ;;  %v2119_v4 = vpop.f32.mrb[32].mxu1 }
 0x13b   : > { %v1745_v5 = vpop.eup %1744  ;;  %1232 = vst.msk [vmem:[%s2087_s7 + $0x8] sm:$0xff] %vm633_vm0, %v1200_v60  ;;  %v1113_v1 = vadd.f32 1.0, %v1743_v63  ;;  %1760 = vpow2.f32 %v1424_v62  ;;  %v1510_v7 = vpop.f32.mrb[33].mxu0 }
 0x13c   : > { %v941_v11 = vpop.f32.mrb[33].mxu1  ;;  %v1747_v12 = vpop.eup %1746  ;;  %v1111_v14 = vadd.f32 1.0, %v1745_v5  ;;  %1762 = vpow2.f32 %v1425_v59  ;;  %v1511_v16 = vadd.f32 %v1510_v7, %v1509_v3  ;;  %v1426_v22 = vmul.f32 -1.442695, %v2117_v0 }
 0x13d   : > { %v1512_v17 = vpop.f32.mrb[34].mxu0  ;;  %v2123_v6 = vpop.f32.mrb[34].mxu1  ;;  %1764 = vrcp.f32 %v1113_v1  ;;  %v1114_v19 = vadd.f32 1.0, %v1747_v12 }
 0x13e   : > { %v1749_v18 = vpop.eup %1748  ;;  %v1513_v23 = vpop.f32.mrb[35].mxu0  ;;  %1766 = vrcp.f32 %v1111_v14  ;;  %v781_v29 = vadd.f32 %v1511_v16, %v2027_v50 }
 0x13f   : > { %v944_v24 = vpop.f32.mrb[35].mxu1  ;;  %v1751_v26 = vpop.eup %1750  ;;  %v1112_v28 = vadd.f32 1.0, %v1749_v18  ;;  %v1514_v30 = vadd.f32 %v1513_v23, %v1512_v17  ;;  %1768 = vrcp.f32 %v1114_v19  ;;  %v821_v19 = vadd.f32 %v2012_v20, %v2027_v50 }
 0x140   : > { %v1753_v31 = vpop.eup %1752  ;;  %v1205_v35 = vsel %vm1006_vm1, %v1751_v26, %v2047_v15  ;;  %v2135_v39 = vadd.f32 %v941_v11, %v781_v29 }
 0x141   : > { %v1755_v38 = vpop.eup %1754  ;;  %1237 = vst.msk [vmem:[%s2087_s7 + $0x30] sm:$0xff] %vm633_vm0, %v1205_v35  ;;  %v1203_v36 = vsel %vm1006_vm1, %v1753_v31, %v2050_v21  ;;  %1770 = vrcp.f32 %v1112_v28  ;;  %v784_v40 = vadd.f32 %v1514_v30, %v2027_v50  ;;  %v1515_v46 = vpop.f32.mrb[36].mxu0  ;;  %v816_v31 = vadd.f32 %v2010_v13, %v2027_v50 }
 0x142   : > { %v1757_v41 = vpop.eup %1756  ;;  %1235 = vst.msk [vmem:[%s2087_s7 + $0x20] sm:$0xff] %vm633_vm0, %v1203_v36  ;;  %v1206_v15 = vsel %vm1006_vm1, %v1755_v38, %v2054_v27  ;;  %1772 = vpow2.f32 %v1426_v22  ;;  %v1427_v43 = vmul.f32 -1.442695, %v2135_v39  ;;  %v2151_v47 = vpop.f32.mrb[36].mxu1  ;;  %v829_v13 = vadd.f32 %v2016_v32, %v2027_v50 }
 0x143   : > { %v1759_v42 = vpop.eup %1758  ;;  %1238 = vst.msk [vmem:[%s2087_s7 + $0x38] sm:$0xff] %vm633_vm0, %v1206_v15  ;;  %v1204_v21 = vsel %vm1006_vm1, %v1757_v41, %v2057_v33  ;;  %v2149_v45 = vadd.f32 %v944_v24, %v784_v40  ;;  %v1516_v53 = vpop.f32.mrb[37].mxu0 }
 0x144   : > { %1236 = vst.msk [vmem:[%s2087_s7 + $0x28] sm:$0xff] %vm633_vm0, %v1204_v21  ;;  %v1115_v51 = vadd.f32 1.0, %v1759_v42  ;;  %v2155_v27 = vpop.f32.mrb[37].mxu1  ;;  %1774 = vpow2.f32 %v1427_v43  ;;  %v1517_v57 = vadd.f32 %v1516_v53, %v1515_v46  ;;  %v1518_v58 = vpop.f32.mrb[38].mxu0 }
 0x145   : > { %v1428_v54 = vmul.f32 -1.442695, %v2149_v45  ;;  %v2158_v55 = vpop.f32.mrb[38].mxu1  ;;  %v1761_v33 = vpop.eup %1760 }
 0x146   : > { %1776 = vrcp.f32 %v1115_v51  ;;  %v1519_v62 = vpop.f32.mrb[39].mxu0  ;;  %v2160_v63 = vpop.f32.mrb[39].mxu1  ;;  %v1116_v59 = vadd.f32 1.0, %v1761_v33  ;;  %v789_v3 = vadd.f32 %v1517_v57, %v2027_v50 }
 0x147   : > { %v1763_v60 = vpop.eup %1762  ;;  %1778 = vpow2.f32 %v1428_v54  ;;  %v1520_v5 = vadd.f32 %v1519_v62, %v1518_v58  ;;  %v832_v58 = vadd.f32 %v2018_v37, %v2027_v50  ;;  %v837_v37 = vadd.f32 %v2020_v44, %v2027_v50 }
 0x148   : > { %v1765_v1 = vpop.eup %1764  ;;  %v1117_v7 = vadd.f32 1.0, %v1763_v60  ;;  %1780 = vrcp.f32 %v1116_v59  ;;  %v2167_v14 = vadd.f32 %v2119_v4, %v789_v3 }
 0x149   : > { %v1767_v11 = vpop.eup %1766  ;;  %v1209_v12 = vsel %vm1006_vm1, %v1765_v1, %v2063_v48  ;;  %v792_v16 = vadd.f32 %v1520_v5, %v2027_v50  ;;  %v1521_v24 = vpop.f32.mrb[40].mxu0 }
 0x14a   : > { %v1769_v17 = vpop.eup %1768  ;;  %1241 = vst.msk [vmem:[%s2087_s7 + $0x50] sm:$0xff] %vm633_vm0, %v1209_v12  ;;  %v1207_v18 = vsel %vm1006_vm1, %v1767_v11, %v2067_v61  ;;  %1782 = vrcp.f32 %v1117_v7  ;;  %v1429_v4 = vmul.f32 -1.442695, %v2167_v14  ;;  %v1605_v26 = vpop.f32.mrb[40].mxu1  ;;  %v813_v61 = vadd.f32 %v2008_v8, %v2027_v50 }
 0x14b   : > { %v1771_v22 = vpop.eup %1770  ;;  %1239 = vst.msk [vmem:[%s2087_s7 + $0x40] sm:$0xff] %vm633_vm0, %v1207_v18  ;;  %v1210_v48 = vsel %vm1006_vm1, %v1769_v17, %v2070_v2  ;;  %v2184_v23 = vadd.f32 %v2123_v6, %v792_v16  ;;  %v2193_v29 = vadd.f32 %v1605_v26, %v821_v19  ;;  %v1522_v2 = vpop.f32.mrb[41].mxu0  ;;  %v824_v6 = vadd.f32 %v2014_v25, %v2027_v50 }
 0x14c   : > { %v1773_v28 = vpop.eup %1772  ;;  %1242 = vst.msk [vmem:[%s2087_s7 + $0x58] sm:$0xff] %vm633_vm0, %v1210_v48  ;;  %v1208_v20 = vsel %vm1006_vm1, %v1771_v22, %v2073_v9  ;;  %v973_v30 = vpop.f32.mrb[41].mxu1  ;;  %1784 = vpow2.f32 %v1429_v4  ;;  %v1523_v38 = vadd.f32 %v1522_v2, %v1521_v24  ;;  %v840_v11 = vadd.f32 %v2022_v49, %v2027_v50 }
 0x14d   : > { %1240 = vst.msk [vmem:[%s2087_s7 + $0x48] sm:$0xff] %vm633_vm0, %v1208_v20  ;;  %v1118_v8 = vadd.f32 1.0, %v1773_v28  ;;  %v1430_v35 = vmul.f32 -1.442695, %v2184_v23  ;;  %v1524_v36 = vpop.f32.mrb[42].mxu0  ;;  %v1606_v40 = vpop.f32.mrb[42].mxu1  ;;  %v2203_v41 = vadd.f32 %v973_v30, %v813_v61 }
 0x14e   : > { %v1437_v9 = vmul.f32 -1.442695, %v2193_v29  ;;  %v2205_v15 = vadd.f32 %v1606_v40, %v824_v6  ;;  %v1525_v42 = vpop.f32.mrb[43].mxu0  ;;  %v976_v25 = vpop.f32.mrb[43].mxu1  ;;  %v797_v43 = vadd.f32 %v1523_v38, %v2027_v50 }
 0x14f   : > { %v1775_v21 = vpop.eup %1774  ;;  %1786 = vrcp.f32 %v1118_v8  ;;  %v1526_v46 = vadd.f32 %v1525_v42, %v1524_v36  ;;  %v2210_v51 = vadd.f32 %v976_v25, %v816_v31  ;;  %v1435_v57 = vmul.f32 -1.442695, %v2203_v41 }
 0x150   : > { %v1777_v53 = vpop.eup %1776  ;;  %v1119_v54 = vadd.f32 1.0, %v1775_v21  ;;  %1788 = vpow2.f32 %v1430_v35  ;;  %v2219_v62 = vadd.f32 %v2155_v27, %v797_v43  ;;  %v1438_v3 = vmul.f32 -1.442695, %v2205_v15 }
 0x151   : > { %v1779_v33 = vpop.eup %1778  ;;  %v1211_v32 = vsel %vm1006_vm1, %v1777_v53, %v2082_v34  ;;  %1790 = vpow2.f32 %v1437_v9  ;;  %v800_v60 = vadd.f32 %v1526_v46, %v2027_v50  ;;  %v1527_v27 = vpop.f32.mrb[44].mxu0  ;;  %v1436_v44 = vmul.f32 -1.442695, %v2210_v51 }
 0x152   : > { %1243 = vst.msk [vmem:[%s2087_s7 + $0x60] sm:$0xff] %vm633_vm0, %v1211_v32  ;;  %1792 = vrcp.f32 %v1119_v54  ;;  %v1120_v59 = vadd.f32 1.0, %v1779_v33  ;;  %v1781_v5 = vpop.eup %1780  ;;  %v1431_v1 = vmul.f32 -1.442695, %v2219_v62  ;;  %v1609_v7 = vpop.f32.mrb[44].mxu1 }
 0x153   : > { %1794 = vpow2.f32 %v1435_v57  ;;  %v2229_v34 = vadd.f32 %v2160_v63, %v800_v60  ;;  %v1212_v16 = vsel %vm1006_vm1, %v1781_v5, %v2095_v52  ;;  %v2237_v17 = vadd.f32 %v1609_v7, %v837_v37  ;;  %v1528_v18 = vpop.f32.mrb[45].mxu0  ;;  %v989_v19 = vpop.f32.mrb[45].mxu1 }
 0x154   : > { %v1783_v12 = vpop.eup %1782  ;;  %1796 = vrcp.f32 %v1120_v59  ;;  %1244 = vst.msk [vmem:[%s2087_s7 + $0x68] sm:$0xff] %vm633_vm0, %v1212_v16  ;;  %v1529_v22 = vadd.f32 %v1528_v18, %v1527_v27  ;;  %v1530_v48 = vpop.f32.mrb[46].mxu0  ;;  %v2248_v24 = vadd.f32 %v989_v19, %v829_v13 }
 0x155   : > { %v1213_v63 = vsel %vm1006_vm1, %v1783_v12, %v2102_v56  ;;  %1798 = vpow2.f32 %v1431_v1  ;;  %v1432_v49 = vmul.f32 -1.442695, %v2229_v34  ;;  %v1610_v4 = vpop.f32.mrb[46].mxu1  ;;  %v1441_v52 = vmul.f32 -1.442695, %v2237_v17  ;;  %v1531_v61 = vpop.f32.mrb[47].mxu0 }
 0x156   : > { %1245 = vst.msk [vmem:[%s2087_s7 + $0x70] sm:$0xff] %vm633_vm0, %v1213_v63  ;;  %1800 = vpow2.f32 %v1438_v3  ;;  %v2250_v26 = vadd.f32 %v1610_v4, %v840_v11  ;;  %v992_v28 = vpop.f32.mrb[47].mxu1  ;;  %v1785_v56 = vpop.eup %1784  ;;  %v805_v20 = vadd.f32 %v1529_v22, %v2027_v50  ;;  %v1532_v2 = vadd.f32 %v1531_v61, %v1530_v48 }
 0x157   : > { %1802 = vpow2.f32 %v1432_v49  ;;  %v2253_v30 = vadd.f32 %v992_v28, %v832_v58  ;;  %v1121_v6 = vadd.f32 1.0, %v1785_v56  ;;  %v1439_v31 = vmul.f32 -1.442695, %v2248_v24 }
 0x158   : > { %1804 = vpow2.f32 %v1436_v44  ;;  %v1442_v8 = vmul.f32 -1.442695, %v2250_v26  ;;  %v2258_v38 = vadd.f32 %v2151_v47, %v805_v20  ;;  %v808_v36 = vadd.f32 %v1532_v2, %v2027_v50 }
 0x159   : > { %v1787_v35 = vpop.eup %1786  ;;  %1806 = vpow2.f32 %v1441_v52  ;;  %v1440_v5 = vmul.f32 -1.442695, %v2253_v30 }
 0x15a   : > { %v1789_v40 = vpop.eup %1788  ;;  %v1214_v9 = vsel %vm1006_vm1, %v1787_v35, %v2117_v0  ;;  %1808 = vrcp.f32 %v1121_v6  ;;  %v1433_v13 = vmul.f32 -1.442695, %v2258_v38  ;;  %v2268_v21 = vadd.f32 %v2158_v55, %v808_v36 }
 0x15b   : > { %v1791_v42 = vpop.eup %1790  ;;  %1246 = vst.msk [vmem:[%s2087_s7 + $0x78] sm:$0xff] %vm633_vm0, %v1214_v9  ;;  %v1122_v25 = vadd.f32 1.0, %v1789_v40  ;;  %1810 = vpow2.f32 %v1439_v31 }
 0x15c   : > { %v1793_v47 = vpop.eup %1792  ;;  %v1129_v50 = vadd.f32 1.0, %v1791_v42  ;;  %1812 = vpow2.f32 %v1442_v8  ;;  %v1434_v46 = vmul.f32 -1.442695, %v2268_v21 }
 0x15d   : > { %v1795_v43 = vpop.eup %1794  ;;  %v1215_v0 = vsel %vm1006_vm1, %v1793_v47, %v2135_v39  ;;  %1814 = vrcp.f32 %v1122_v25 }
 0x15e   : > { %v1797_v53 = vpop.eup %1796  ;;  %1247 = vst.msk [vmem:[%s2087_s7 + $0x80] sm:$0xff] %vm633_vm0, %v1215_v0  ;;  %1816 = vrcp.f32 %v1129_v50  ;;  %v1127_v54 = vadd.f32 1.0, %v1795_v43 }
 0x15f   : > { %v1799_v57 = vpop.eup %1798  ;;  %v1216_v55 = vsel %vm1006_vm1, %v1797_v53, %v2149_v45  ;;  %1818 = vpow2.f32 %v1433_v13 }
 0x160   : > { %v1801_v58 = vpop.eup %1800  ;;  %1248 = vst.msk [vmem:[%s2087_s7 + $0x88] sm:$0xff] %vm633_vm0, %v1216_v55  ;;  %v1123_v33 = vadd.f32 1.0, %v1799_v57  ;;  %1820 = vrcp.f32 %v1127_v54 }
 0x161   : > { %v1803_v39 = vpop.eup %1802  ;;  %v1130_v32 = vadd.f32 1.0, %v1801_v58  ;;  %1822 = vpow2.f32 %v1434_v46 }
 0x162   : > { %v1805_v60 = vpop.eup %1804  ;;  %1824 = vrcp.f32 %v1123_v33  ;;  %v1124_v59 = vadd.f32 1.0, %v1803_v39 }
 0x163   : > { %v1807_v3 = vpop.eup %1806  ;;  %1826 = vrcp.f32 %v1130_v32  ;;  %v1128_v37 = vadd.f32 1.0, %v1805_v60 }
 0x164   : > { %v1809_v1 = vpop.eup %1808  ;;  %1828 = vrcp.f32 %v1124_v59  ;;  %v1133_v45 = vadd.f32 1.0, %v1807_v3 }
 0x165   : > { %v1811_v27 = vpop.eup %1810  ;;  %v1217_v7 = vsel %vm1006_vm1, %v1809_v1, %v2167_v14  ;;  %1830 = vrcp.f32 %v1128_v37 }
 0x166   : > { %v1813_v11 = vpop.eup %1812  ;;  %1249 = vst.msk [vmem:[%s2087_s7 + $0x90] sm:$0xff] %vm633_vm0, %v1217_v7  ;;  %1832 = vrcp.f32 %v1133_v45  ;;  %v1131_v12 = vadd.f32 1.0, %v1811_v27 }
 0x167   : > { %v1815_v16 = vpop.eup %1814  ;;  %v1134_v44 = vadd.f32 1.0, %v1813_v11  ;;  %1834 = vpow2.f32 %v1440_v5 }
 0x168   : > { %v1817_v18 = vpop.eup %1816  ;;  %v1218_v19 = vsel %vm1006_vm1, %v1815_v16, %v2184_v23  ;;  %1836 = vrcp.f32 %v1131_v12 }
 0x169   : > { %v1819_v63 = vpop.eup %1818  ;;  %1250 = vst.msk [vmem:[%s2087_s7 + $0x98] sm:$0xff] %vm633_vm0, %v1218_v19  ;;  %v1225_v14 = vsel %vm1006_vm1, %v1817_v18, %v2193_v29  ;;  %1838 = vrcp.f32 %v1134_v44 }
 0x16a   : > { %v1821_v49 = vpop.eup %1820  ;;  %1257 = vst.msk [vmem:[%s2087_s7 + $0xd0] sm:$0xff] %vm633_vm0, %v1225_v14  ;;  %v1125_v22 = vadd.f32 1.0, %v1819_v63 }
 0x16b   : > { %v1823_v48 = vpop.eup %1822  ;;  %v1223_v23 = vsel %vm1006_vm1, %v1821_v49, %v2203_v41 }
 0x16c   : > { %v1825_v4 = vpop.eup %1824  ;;  %1255 = vst.msk [vmem:[%s2087_s7 + $0xc0] sm:$0xff] %vm633_vm0, %v1223_v23  ;;  %1840 = vrcp.f32 %v1125_v22  ;;  %v1126_v52 = vadd.f32 1.0, %v1823_v48 }
 0x16d   : > { %v1827_v61 = vpop.eup %1826  ;;  %v1219_v29 = vsel %vm1006_vm1, %v1825_v4, %v2219_v62 }
 0x16e   : > { %v1829_v28 = vpop.eup %1828  ;;  %1251 = vst.msk [vmem:[%s2087_s7 + $0xa0] sm:$0xff] %vm633_vm0, %v1219_v29  ;;  %v1226_v56 = vsel %vm1006_vm1, %v1827_v61, %v2205_v15  ;;  %1842 = vrcp.f32 %v1126_v52 }
 0x16f   : > { %v1831_v41 = vpop.eup %1830  ;;  %1258 = vst.msk [vmem:[%s2087_s7 + $0xd8] sm:$0xff] %vm633_vm0, %v1226_v56  ;;  %v1220_v20 = vsel %vm1006_vm1, %v1829_v28, %v2229_v34 }
 0x170   : > { %v1833_v2 = vpop.eup %1832  ;;  %1252 = vst.msk [vmem:[%s2087_s7 + $0xa8] sm:$0xff] %vm633_vm0, %v1220_v20  ;;  %v1224_v62 = vsel %vm1006_vm1, %v1831_v41, %v2210_v51 }
 0x171   : > { %v1835_v6 = vpop.eup %1834  ;;  %1256 = vst.msk [vmem:[%s2087_s7 + $0xc8] sm:$0xff] %vm633_vm0, %v1224_v62  ;;  %v1229_v15 = vsel %vm1006_vm1, %v1833_v2, %v2237_v17 }
 0x172   : > { %v1837_v31 = vpop.eup %1836  ;;  %1261 = vst.msk [vmem:[%s2087_s7 + $0xf0] sm:$0xff] %vm633_vm0, %v1229_v15  ;;  %v1132_v34 = vadd.f32 1.0, %v1835_v6 }
 0x173   : > { %v1839_v8 = vpop.eup %1838  ;;  %v1227_v35 = vsel %vm1006_vm1, %v1837_v31, %v2248_v24 }
 0x174   : > { %1259 = vst.msk [vmem:[%s2087_s7 + $0xe0] sm:$0xff] %vm633_vm0, %v1227_v35  ;;  %v1230_v51 = vsel %vm1006_vm1, %v1839_v8, %v2250_v26  ;;  %1844 = vrcp.f32 %v1132_v34 }
 0x175   : > { %1262 = vst.msk [vmem:[%s2087_s7 + $0xf8] sm:$0xff] %vm633_vm0, %v1230_v51 }
 0x176   : > { %v1841_v17 = vpop.eup %1840 }
 0x177   : > { %v1221_v36 = vsel %vm1006_vm1, %v1841_v17, %v2258_v38 }
 0x178   : > { %v1843_v40 = vpop.eup %1842  ;;  %1253 = vst.msk [vmem:[%s2087_s7 + $0xb0] sm:$0xff] %vm633_vm0, %v1221_v36 }
 0x179   : > { %v1222_v24 = vsel %vm1006_vm1, %v1843_v40, %v2268_v21 }
 0x17a   : > { %1254 = vst.msk [vmem:[%s2087_s7 + $0xb8] sm:$0xff] %vm633_vm0, %v1222_v24 }
 0x17e   : > { %v1845_v9 = vpop.eup %1844 }
 0x17f   : > { %v1228_v26 = vsel %vm1006_vm1, %v1845_v9, %v2253_v30 }
 0x180   : > { %1260 = vst.msk [vmem:[%s2087_s7 + $0xe8] sm:$0xff] %vm633_vm0, %v1228_v26 }
 0x181 PF: > { %s13_s12 = sadd.s32 1, %s1852_s12  }
 0x182   : > { %p10_p4 = scmp.ge.s32.totalorder %s13_s12, 4  }
 0x184   :  { %12 = sbr.rel (!%p10_p4) target bundleno = 1 (0x1), region = 62 }

// kernel: feature_fusor_forward.20
= control target key start
LH: loop header
LB: loop body
LE: loop exit
PB: predicated region body
PF: predicated region fallthrough
CT: control target
= control target key end

     0   :  { %s1519_s12 = smov 0   ;;  %s1793_s0 = inlined_call_operand.vmem [shape: bf16[512,288], index: 0, kind: input, shape index: {}]   ;;  %s1794_s1 = inlined_call_operand.vmem [shape: bf16[288,32], index: 1, kind: input, shape index: {}]   ;;  %s1795_s2 = inlined_call_operand.vmem [shape: f32[1,32], index: 2, kind: input, shape index: {}]   ;;  %s1796_s3 = inlined_call_operand.vmem [shape: f32[512,32], index: 3, kind: output, shape index: {}]  }
   0x1 LB: > { %s1124_s13 = sadd.s32 4294967295, %s1497_s12   ;;  %p1128_p0 = scmp.ge.s32.totalorder %s1497_s12, 1  ;;  %s1497_s12 = sphi %s1519_s12, %s13_s12  }
   0x2   : > { %p139_p1 = scmp.lt.s32.totalorder %s1497_s12, 3 }
   0x4   : > { %p140_p2 = pnand %p1128_p0, %p139_p1 }
   0x5   : > { %v1409_v0 = vld [vmem:[%s1794_s1 + $0x40] sm:$0xff] (!%p140_p2)   ;;  %s1129_s16 = sshll.u32 (!%p140_p2), %s1124_s13, 5  ;;  %v1411_v2 = vld [vmem:[%s1794_s1 + $0x48] sm:$0xff] (!%p140_p2)   ;;  %v1413_v4 = vld [vmem:[%s1794_s1 + $0x50] sm:$0xff] (!%p140_p2)   ;;  %vm633_vm0 = vcmask (!%p140_p2), 261120  }
   0x6   : > { %143 = sbr.rel (%p140_p2) target bundleno = 350 (0x15e), region = 32  ;;  %v1410_v1 = vld [vmem:[%s1794_s1] sm:$0xff] (!%p140_p2)   ;;  %1218 = vmatprep.subr.bf16.mxu0 (!%p140_p2), %v1409_v0  ;;  %1384 = vmatprep.subr.bf16.mxu1 (!%p140_p2), %v1409_v0  ;;  %p165_p3 = scmp.lt.s32.totalorder (!%p140_p2), %s1129_s16, 63  ;;  %v1412_v3 = vld [vmem:[%s1794_s1 + $0x8] sm:$0xff] (!%p140_p2)   ;;  %v1414_v5 = vld [vmem:[%s1794_s1 + $0x10] sm:$0xff] (!%p140_p2)  }
   0x7   : > { %1219 = vmatpush3.bf16.msra.mxu0 (!%p140_p2), %v1410_v1  ;;  %1392 = vmatpush3.bf16.msra.mxu1 (!%p140_p2), %v1410_v1  ;;  %v1415_v6 = vld [vmem:[%s1794_s1 + $0x58] sm:$0xff] (!%p140_p2)   ;;  %v1417_v8 = vld [vmem:[%s1794_s1 + $0x60] sm:$0xff] (!%p140_p2)   ;;  %v1419_v10 = vld [vmem:[%s1794_s1 + $0x68] sm:$0xff] (!%p140_p2)  }
   0x8   : > { %1220 = vmatprep.subr.bf16.mxu0 (!%p140_p2), %v1411_v2  ;;  %1385 = vmatprep.subr.bf16.mxu1 (!%p140_p2), %v1411_v2  ;;  %v1416_v7 = vld [vmem:[%s1794_s1 + $0x18] sm:$0xff] (!%p140_p2)   ;;  %v1418_v9 = vld [vmem:[%s1794_s1 + $0x20] sm:$0xff] (!%p140_p2)   ;;  %v1420_v13 = vld [vmem:[%s1794_s1 + $0x28] sm:$0xff] (!%p140_p2)  }
   0x9   : > { %v1421_v14 = vld [vmem:[%s1794_s1 + $0x70] sm:$0xff] (!%p140_p2)   ;;  %v1423_v16 = vld [vmem:[%s1794_s1 + $0x78] sm:$0xff] (!%p140_p2)   ;;  %v1431_v18 = vld [vmem:[%s1794_s1 + $0x80] sm:$0xff] (!%p140_p2)  }
   0xa   : > { %v1422_v15 = vld [vmem:[%s1794_s1 + $0x30] sm:$0xff] (!%p140_p2)   ;;  %v1424_v17 = vld [vmem:[%s1794_s1 + $0x38] sm:$0xff] (!%p140_p2)   ;;  %v1444_v23 = vld [vmem:[%s1794_s1 + $0x88] sm:$0xff] (!%p140_p2)  }
   0xb   : > { %1221 = vmatpush3.bf16.msra.mxu0 (!%p140_p2), %v1412_v3  ;;  %1393 = vmatpush3.bf16.msra.mxu1 (!%p140_p2), %v1412_v3 }
   0xc   : > { %1222 = vmatprep.subr.bf16.mxu0 (!%p140_p2), %v1413_v4  ;;  %1386 = vmatprep.subr.bf16.mxu1 (!%p140_p2), %v1413_v4 }
   0xd   : > { %s1798_s16 = smov (!%p165_p3, %s1129_s16), 63 }
   0xe   : > { %s1400_s29 = smul.u32 12, %s1798_s16  ;;  %s1132_s5 = sshll.u32 %s1798_s16, 3 }
   0xf   : > { %1223 = vmatpush3.bf16.msra.mxu0 %v1414_v5  ;;  %1394 = vmatpush3.bf16.msra.mxu1 %v1414_v5  ;;  %s1681_s8 = scalar_lea.vmem %s1796_s3, %s1132_s5 }
  0x10   : > { %1224 = vmatprep.subr.bf16.mxu0 %v1415_v6  ;;  %1387 = vmatprep.subr.bf16.mxu1 %v1415_v6  ;;  %s1560_s9 = scalar_lea.vmem %s1793_s0, %s1400_s29 }
  0x11   : > { %v1427_v11 = vld [vmem:[%s1560_s9 + $0x4] ss:$12 sps:$4 sm:$0xff]   ;;  %v1425_v19 = vld [vmem:[%s1560_s9] ss:$12 sps:$4 sm:$0xff]   ;;  %v1432_v21 = vld [vmem:[%s1560_s9 + $0x1c] ss:$12 sps:$4 sm:$0xff]  }
  0x12   : > { %v1430_v12 = vld [vmem:[%s1560_s9 + $0x124] ss:$12 sps:$4 sm:$0xff]   ;;  %714 = vmatprep.mubr.bf16.mxu0 %v1427_v11  ;;  %v1428_v20 = vld [vmem:[%s1560_s9 + $0x120] ss:$12 sps:$4 sm:$0xff]   ;;  %v1434_v22 = vld [vmem:[%s1560_s9 + $0x13c] ss:$12 sps:$4 sm:$0xff]  }
  0x13   : > { %1225 = vmatpush3.bf16.msra.mxu0 %v1416_v7  ;;  %1395 = vmatpush3.bf16.msra.mxu1 %v1416_v7  ;;  %v1436_v24 = vld [vmem:[%s1560_s9 + $0x18] ss:$12 sps:$4 sm:$0xff]   ;;  %v1438_v26 = vld [vmem:[%s1560_s9 + $0x34] ss:$12 sps:$4 sm:$0xff]   ;;  %v1442_v28 = vld [vmem:[%s1560_s9 + $0x30] ss:$12 sps:$4 sm:$0xff]  }
  0x14   : > { %1226 = vmatprep.subr.bf16.mxu0 %v1417_v8  ;;  %1388 = vmatprep.subr.bf16.mxu1 %v1417_v8  ;;  %v1437_v25 = vld [vmem:[%s1560_s9 + $0x138] ss:$12 sps:$4 sm:$0xff]   ;;  %v1440_v27 = vld [vmem:[%s1560_s9 + $0x154] ss:$12 sps:$4 sm:$0xff]   ;;  %v1443_v29 = vld [vmem:[%s1560_s9 + $0x150] ss:$12 sps:$4 sm:$0xff]  }
  0x15   : > { %810 = vmatprep.mubr.bf16.mxu1 %v1430_v12  ;;  %v1445_v30 = vld [vmem:[%s1560_s9 + $0x4c] ss:$12 sps:$4 sm:$0xff]   ;;  %v1449_v32 = vld [vmem:[%s1560_s9 + $0x48] ss:$12 sps:$4 sm:$0xff]   ;;  %v1451_v34 = vld [vmem:[%s1560_s9 + $0x64] ss:$12 sps:$4 sm:$0xff]  }
  0x16   : > { %v1447_v31 = vld [vmem:[%s1560_s9 + $0x16c] ss:$12 sps:$4 sm:$0xff]   ;;  %v1450_v33 = vld [vmem:[%s1560_s9 + $0x168] ss:$12 sps:$4 sm:$0xff]   ;;  %v1460_v41 = vld [vmem:[%s1560_s9 + $0x50] ss:$12 sps:$4 sm:$0xff]  }
  0x17   : > { %1227 = vmatpush3.bf16.msra.mxu0 %v1418_v9  ;;  %1396 = vmatpush3.bf16.msra.mxu1 %v1418_v9  ;;  %v1453_v35 = vld [vmem:[%s1560_s9 + $0x8] ss:$12 sps:$4 sm:$0xff]   ;;  %v1454_v36 = vld [vmem:[%s1560_s9 + $0x60] ss:$12 sps:$4 sm:$0xff]   ;;  %v1458_v39 = vld [vmem:[%s1560_s9 + $0x38] ss:$12 sps:$4 sm:$0xff]  }
  0x18   : > { %1228 = vmatprep.subr.bf16.mxu0 %v1419_v10  ;;  %1389 = vmatprep.subr.bf16.mxu1 %v1419_v10  ;;  %v1455_v37 = vld [vmem:[%s1560_s9 + $0x20] ss:$12 sps:$4 sm:$0xff]   ;;  %v1456_v38 = vld [vmem:[%s1560_s9 + $0x7c] ss:$12 sps:$4 sm:$0xff]   ;;  %v1459_v40 = vld [vmem:[%s1560_s9 + $0x78] ss:$12 sps:$4 sm:$0xff]  }
  0x19   : > { %v1461_v42 = vld [vmem:[%s1560_s9 + $0x94] ss:$12 sps:$4 sm:$0xff]   ;;  %v1464_v44 = vld [vmem:[%s1560_s9 + $0x90] ss:$12 sps:$4 sm:$0xff]   ;;  %v1466_v46 = vld [vmem:[%s1560_s9 + $0xac] ss:$12 sps:$4 sm:$0xff]  }
  0x1a   : > { %v1463_v43 = vld [vmem:[%s1560_s9 + $0x68] ss:$12 sps:$4 sm:$0xff]   ;;  %v1465_v45 = vld [vmem:[%s1560_s9 + $0x80] ss:$12 sps:$4 sm:$0xff]   ;;  %v1468_v47 = vld [vmem:[%s1560_s9 + $0x98] ss:$12 sps:$4 sm:$0xff]  }
  0x1b   : > { %1229 = vmatpush3.bf16.msra.mxu0 %v1420_v13  ;;  %1397 = vmatpush3.bf16.msra.mxu1 %v1420_v13  ;;  %v1469_v48 = vld [vmem:[%s1560_s9 + $0xa8] ss:$12 sps:$4 sm:$0xff]   ;;  %v1470_v49 = vld [vmem:[%s1560_s9 + $0xb0] ss:$12 sps:$4 sm:$0xff]   ;;  %v1474_v52 = vld [vmem:[%s1560_s9 + $0xc0] ss:$12 sps:$4 sm:$0xff]  }
  0x1c   : > { %1230 = vmatprep.subr.bf16.mxu0 %v1421_v14  ;;  %1390 = vmatprep.subr.bf16.mxu1 %v1421_v14  ;;  %v1471_v50 = vld [vmem:[%s1560_s9 + $0xc4] ss:$12 sps:$4 sm:$0xff]   ;;  %v1473_v51 = vld [vmem:[%s1560_s9 + $0xc8] ss:$12 sps:$4 sm:$0xff]   ;;  %v1475_v53 = vld [vmem:[%s1560_s9 + $0xe0] ss:$12 sps:$4 sm:$0xff]  }
  0x1d   : > { %v1476_v54 = vld [vmem:[%s1560_s9 + $0xdc] ss:$12 sps:$4 sm:$0xff]   ;;  %v1478_v55 = vld [vmem:[%s1560_s9 + $0xf8] ss:$12 sps:$4 sm:$0xff]   ;;  %v1481_v58 = vld [vmem:[%s1560_s9 + $0xf4] ss:$12 sps:$4 sm:$0xff]  }
  0x1e   : > { %v1479_v56 = vld [vmem:[%s1560_s9 + $0xd8] ss:$12 sps:$4 sm:$0xff]   ;;  %v1480_v57 = vld [vmem:[%s1560_s9 + $0x110] ss:$12 sps:$4 sm:$0xff]   ;;  %v1483_v59 = vld [vmem:[%s1560_s9 + $0x128] ss:$12 sps:$4 sm:$0xff]  }
  0x1f   : > { %1231 = vmatpush3.bf16.msra.mxu0 %v1422_v15  ;;  %1398 = vmatpush3.bf16.msra.mxu1 %v1422_v15  ;;  %v1484_v60 = vld [vmem:[%s1560_s9 + $0xf0] ss:$12 sps:$4 sm:$0xff]   ;;  %v1485_v61 = vld [vmem:[%s1560_s9 + $0x140] ss:$12 sps:$4 sm:$0xff]   ;;  %v1488_v63 = vld [vmem:[%s1560_s9 + $0x158] ss:$12 sps:$4 sm:$0xff]  }
  0x20   : > { %1232 = vmatprep.subr.bf16.mxu0 %v1423_v16  ;;  %1391 = vmatprep.subr.bf16.mxu1 %v1423_v16  ;;  %v1486_v62 = vld [vmem:[%s1560_s9 + $0x10c] ss:$12 sps:$4 sm:$0xff]   ;;  %v1489_v0 = vld [vmem:[%s1560_s9 + $0x108] ss:$12 sps:$4 sm:$0xff]   ;;  %v1490_v1 = vld [vmem:[%s1560_s9 + $0x170] ss:$12 sps:$4 sm:$0xff]  }
  0x23   : > { %1233 = vmatpush3.bf16.msra.mxu0 %v1424_v17  ;;  %1399 = vmatpush3.bf16.msra.mxu1 %v1424_v17 }
  0x24   : > { %1348 = vmatprep.subr.bf16.mxu1 %v1431_v18 }
  0x26   : > { %715 = vmatmul.mubr.bf16.vlgmr.msra.gmra.mrb[0].mxu0 %v1425_v19  ;;  %811 = vmatmul.mubr.bf16.vlgmr.msra.gmra.mrb[0].mxu1 %v1428_v20 }
  0x27   : > { %1349 = vmatpush3.bf16.msra.mxu1 %v1431_v18  ;;  %722 = vmatprep.mubr.bf16.mxu0 %v1432_v21 }
  0x28   : > { %818 = vmatprep.mubr.bf16.mxu1 %v1434_v22  ;;  %1350 = vmatprep.subr.bf16.mxu1 %v1444_v23 }
  0x2b   : > { %1351 = vmatpush3.bf16.msra.mxu1 %v1444_v23 }
  0x2e   : > { %723 = vmatmul.mubr.bf16.gmra.mrb[4].mxu0 %v1436_v24  ;;  %819 = vmatmul.mubr.bf16.gmra.mrb[4].mxu1 %v1437_v25 }
  0x2f   : > { %730 = vmatprep.mubr.bf16.mxu0 %v1438_v26  ;;  %826 = vmatprep.mubr.bf16.mxu1 %v1440_v27 }
  0x36   : > { %731 = vmatmul.mubr.bf16.gmra.mrb[8].mxu0 %v1442_v28  ;;  %827 = vmatmul.mubr.bf16.gmra.mrb[8].mxu1 %v1443_v29 }
  0x37   : > { %738 = vmatprep.mubr.bf16.mxu0 %v1445_v30  ;;  %834 = vmatprep.mubr.bf16.mxu1 %v1447_v31 }
  0x3e   : > { %739 = vmatmul.mubr.bf16.gmra.mrb[12].mxu0 %v1449_v32  ;;  %835 = vmatmul.mubr.bf16.gmra.mrb[12].mxu1 %v1450_v33 }
  0x3f   : > { %746 = vmatprep.mubr.bf16.mxu0 %v1451_v34  ;;  %1352 = vmatprep.mubr.msk.bf16.mxu1 %vm633_vm0, %v1453_v35 }
  0x46   : > { %747 = vmatmul.mubr.bf16.gmra.mrb[16].mxu0 %v1454_v36  ;;  %1353 = vmatmul.mubr.msk.bf16.vlgmr.msra.gmra.mrb[16].mxu1 %vm633_vm0, %v1455_v37 }
  0x47   : > { %754 = vmatprep.mubr.bf16.mxu0 %v1456_v38  ;;  %1356 = vmatprep.mubr.msk.bf16.mxu1 %vm633_vm0, %v1458_v39 }
  0x4e   : > { %755 = vmatmul.mubr.bf16.gmra.mrb[20].mxu0 %v1459_v40  ;;  %1357 = vmatmul.mubr.msk.bf16.gmra.mrb[20].mxu1 %vm633_vm0, %v1460_v41 }
  0x4f   : > { %762 = vmatprep.mubr.bf16.mxu0 %v1461_v42  ;;  %1360 = vmatprep.mubr.msk.bf16.mxu1 %vm633_vm0, %v1463_v43 }
  0x56   : > { %763 = vmatmul.mubr.bf16.gmra.mrb[24].mxu0 %v1464_v44  ;;  %1361 = vmatmul.mubr.msk.bf16.gmra.mrb[24].mxu1 %vm633_vm0, %v1465_v45 }
  0x57   : > { %770 = vmatprep.mubr.bf16.mxu0 %v1466_v46  ;;  %1364 = vmatprep.mubr.msk.bf16.mxu1 %vm633_vm0, %v1468_v47 }
  0x5e   : > { %771 = vmatmul.mubr.bf16.gmra.mrb[28].mxu0 %v1469_v48  ;;  %1365 = vmatmul.mubr.msk.bf16.gmra.mrb[28].mxu1 %vm633_vm0, %v1470_v49 }
  0x5f   : > { %778 = vmatprep.mubr.bf16.mxu0 %v1471_v50  ;;  %1368 = vmatprep.mubr.msk.bf16.mxu1 %vm633_vm0, %v1473_v51  ;;  %v1672_v50 = vld [vmem:[%s1795_s2] ss:$0 sm:$0xff] }
  0x66   : > { %779 = vmatmul.mubr.bf16.gmra.mrb[32].mxu0 %v1474_v52  ;;  %1369 = vmatmul.mubr.msk.bf16.gmra.mrb[32].mxu1 %vm633_vm0, %v1475_v53 }
  0x67   : > { %786 = vmatprep.mubr.bf16.mxu0 %v1476_v54  ;;  %1372 = vmatprep.mubr.msk.bf16.mxu1 %vm633_vm0, %v1478_v55 }
  0x6e   : > { %787 = vmatmul.mubr.bf16.gmra.mrb[36].mxu0 %v1479_v56  ;;  %1373 = vmatmul.mubr.msk.bf16.gmra.mrb[36].mxu1 %vm633_vm0, %v1480_v57 }
  0x6f   : > { %794 = vmatprep.mubr.bf16.mxu0 %v1481_v58  ;;  %1376 = vmatprep.mubr.msk.bf16.mxu1 %vm633_vm0, %v1483_v59 }
  0x76   : > { %795 = vmatmul.mubr.bf16.gmra.mrb[40].mxu0 %v1484_v60  ;;  %1377 = vmatmul.mubr.msk.bf16.gmra.mrb[40].mxu1 %vm633_vm0, %v1485_v61 }
  0x77   : > { %802 = vmatprep.mubr.bf16.mxu0 %v1486_v62  ;;  %1380 = vmatprep.mubr.msk.bf16.mxu1 %vm633_vm0, %v1488_v63 }
  0x7e   : > { %803 = vmatmul.mubr.bf16.gmra.mrb[44].mxu0 %v1489_v0  ;;  %1381 = vmatmul.mubr.msk.bf16.gmra.mrb[44].mxu1 %vm633_vm0, %v1490_v1 }
  0xf9   : > { %v1234_v2 = vpop.f32.mrb[0].mxu0  ;;  %v1306_v3 = vpop.f32.mrb[0].mxu1 }
  0xfa   : > { %v1235_v4 = vpop.f32.mrb[1].mxu0  ;;  %v1307_v5 = vpop.f32.mrb[1].mxu1 }
  0xfb   : > { %v1236_v6 = vadd.f32 %v1235_v4, %v1234_v2  ;;  %v1237_v7 = vpop.f32.mrb[2].mxu0  ;;  %v1653_v8 = vadd.f32 %v1307_v5, %v1306_v3  ;;  %v1309_v9 = vpop.f32.mrb[2].mxu1 }
  0xfc   : > { %v1238_v10 = vpop.f32.mrb[3].mxu0  ;;  %v1310_v11 = vpop.f32.mrb[3].mxu1 }
  0xfd   : > { %v1239_v12 = vadd.f32 %v1238_v10, %v1237_v7  ;;  %v1655_v13 = vadd.f32 %v1310_v11, %v1309_v9  ;;  %v717_v54 = vadd.f32 %v1236_v6, %v1672_v50 }
  0xff   : > { %v720_v63 = vadd.f32 %v1239_v12, %v1672_v50 }
 0x101   : > { %v1240_v14 = vpop.f32.mrb[4].mxu0  ;;  %v1312_v15 = vpop.f32.mrb[4].mxu1 }
 0x102   : > { %v1241_v16 = vpop.f32.mrb[5].mxu0  ;;  %v1313_v17 = vpop.f32.mrb[5].mxu1 }
 0x103   : > { %v1242_v18 = vadd.f32 %v1241_v16, %v1240_v14  ;;  %v1243_v19 = vpop.f32.mrb[6].mxu0  ;;  %v1657_v20 = vadd.f32 %v1313_v17, %v1312_v15  ;;  %v1315_v21 = vpop.f32.mrb[6].mxu1 }
 0x104   : > { %v1244_v22 = vpop.f32.mrb[7].mxu0  ;;  %v1316_v23 = vpop.f32.mrb[7].mxu1 }
 0x105   : > { %v1245_v24 = vadd.f32 %v1244_v22, %v1243_v19  ;;  %v1659_v25 = vadd.f32 %v1316_v23, %v1315_v21  ;;  %v725_v51 = vadd.f32 %v1242_v18, %v1672_v50 }
 0x107   : > { %v728_v58 = vadd.f32 %v1245_v24, %v1672_v50 }
 0x109   : > { %v1246_v26 = vpop.f32.mrb[8].mxu0  ;;  %v1318_v27 = vpop.f32.mrb[8].mxu1 }
 0x10a   : > { %v1247_v28 = vpop.f32.mrb[9].mxu0  ;;  %v1319_v29 = vpop.f32.mrb[9].mxu1 }
 0x10b   : > { %v1248_v30 = vadd.f32 %v1247_v28, %v1246_v26  ;;  %v1249_v31 = vpop.f32.mrb[10].mxu0  ;;  %v1661_v32 = vadd.f32 %v1319_v29, %v1318_v27  ;;  %v1321_v33 = vpop.f32.mrb[10].mxu1 }
 0x10c   : > { %v1250_v34 = vpop.f32.mrb[11].mxu0  ;;  %v1322_v35 = vpop.f32.mrb[11].mxu1 }
 0x10d   : > { %v1251_v36 = vadd.f32 %v1250_v34, %v1249_v31  ;;  %v1663_v37 = vadd.f32 %v1322_v35, %v1321_v33  ;;  %v733_v14 = vadd.f32 %v1248_v30, %v1672_v50 }
 0x10f   : > { %v736_v24 = vadd.f32 %v1251_v36, %v1672_v50 }
 0x111   : > { %v1252_v38 = vpop.f32.mrb[12].mxu0  ;;  %v1324_v39 = vpop.f32.mrb[12].mxu1 }
 0x112   : > { %v1253_v40 = vpop.f32.mrb[13].mxu0  ;;  %v1325_v41 = vpop.f32.mrb[13].mxu1 }
 0x113   : > { %v1254_v42 = vadd.f32 %v1253_v40, %v1252_v38  ;;  %v1255_v43 = vpop.f32.mrb[14].mxu0  ;;  %v1665_v44 = vadd.f32 %v1325_v41, %v1324_v39  ;;  %v1327_v45 = vpop.f32.mrb[14].mxu1 }
 0x114   : > { %v1256_v46 = vpop.f32.mrb[15].mxu0  ;;  %v1328_v47 = vpop.f32.mrb[15].mxu1 }
 0x115   : > { %v1257_v48 = vadd.f32 %v1256_v46, %v1255_v43  ;;  %v1667_v49 = vadd.f32 %v1328_v47, %v1327_v45  ;;  %v741_v10 = vadd.f32 %v1254_v42, %v1672_v50 }
 0x117   : > { %v744_v18 = vadd.f32 %v1257_v48, %v1672_v50 }
 0x119   : > { %v1258_v52 = vpop.f32.mrb[16].mxu0  ;;  %v1354_v53 = vpop.f32.mrb[16].mxu1 }
 0x11a   : > { %v886_v55 = vadd.f32 %v1354_v53, %v725_v51  ;;  %v1259_v56 = vpop.f32.mrb[17].mxu0  ;;  %v877_v57 = vpop.f32.mrb[17].mxu1 }
 0x11b   : > { %v1260_v59 = vadd.f32 %v1259_v56, %v1258_v52  ;;  %v878_v60 = vadd.f32 %v877_v57, %v717_v54  ;;  %v1261_v61 = vpop.f32.mrb[18].mxu0  ;;  %v1355_v62 = vpop.f32.mrb[18].mxu1 }
 0x11c   : > { %v1006_v0 = vmax.f32 %v886_v55, 0.0  ;;  %v889_v1 = vadd.f32 %v1355_v62, %v728_v58  ;;  %v1262_v2 = vpop.f32.mrb[19].mxu0  ;;  %v880_v3 = vpop.f32.mrb[19].mxu1 }
 0x11d   : > { %v1004_v4 = vmax.f32 %v878_v60, 0.0  ;;  %v1263_v5 = vadd.f32 %v1262_v2, %v1261_v61  ;;  %v881_v6 = vadd.f32 %v880_v3, %v720_v63  ;;  %v749_v40 = vadd.f32 %v1260_v59, %v1672_v50 }
 0x11e   : > { %1038 = vst.msk [vmem:[%s1681_s8 + $0x10] sm:$0xff] %vm633_vm0, %v1006_v0  ;;  %v1007_v7 = vmax.f32 %v889_v1, 0.0 }
 0x11f   : > { %1036 = vst.msk [vmem:[%s1681_s8] sm:$0xff] %vm633_vm0, %v1004_v4  ;;  %v1005_v9 = vmax.f32 %v881_v6, 0.0  ;;  %v752_v52 = vadd.f32 %v1263_v5, %v1672_v50 }
 0x120   : > { %1039 = vst.msk [vmem:[%s1681_s8 + $0x18] sm:$0xff] %vm633_vm0, %v1007_v7 }
 0x121   : > { %1037 = vst.msk [vmem:[%s1681_s8 + $0x8] sm:$0xff] %vm633_vm0, %v1005_v9  ;;  %v1264_v11 = vpop.f32.mrb[20].mxu0  ;;  %v1358_v12 = vpop.f32.mrb[20].mxu1 }
 0x122   : > { %v902_v15 = vadd.f32 %v1358_v12, %v741_v10  ;;  %v1265_v16 = vpop.f32.mrb[21].mxu0  ;;  %v893_v17 = vpop.f32.mrb[21].mxu1 }
 0x123   : > { %v1266_v19 = vadd.f32 %v1265_v16, %v1264_v11  ;;  %v894_v21 = vadd.f32 %v893_v17, %v733_v14  ;;  %v1267_v22 = vpop.f32.mrb[22].mxu0  ;;  %v1359_v23 = vpop.f32.mrb[22].mxu1 }
 0x124   : > { %v1010_v26 = vmax.f32 %v902_v15, 0.0  ;;  %v905_v27 = vadd.f32 %v1359_v23, %v744_v18  ;;  %v1268_v28 = vpop.f32.mrb[23].mxu0  ;;  %v896_v29 = vpop.f32.mrb[23].mxu1 }
 0x125   : > { %v1008_v30 = vmax.f32 %v894_v21, 0.0  ;;  %v1269_v31 = vadd.f32 %v1268_v28, %v1267_v22  ;;  %v897_v33 = vadd.f32 %v896_v29, %v736_v24  ;;  %v757_v38 = vadd.f32 %v1266_v19, %v1672_v50 }
 0x126   : > { %1042 = vst.msk [vmem:[%s1681_s8 + $0x30] sm:$0xff] %vm633_vm0, %v1010_v26  ;;  %v1011_v34 = vmax.f32 %v905_v27, 0.0 }
 0x127   : > { %1040 = vst.msk [vmem:[%s1681_s8 + $0x20] sm:$0xff] %vm633_vm0, %v1008_v30  ;;  %v1009_v35 = vmax.f32 %v897_v33, 0.0  ;;  %v760_v45 = vadd.f32 %v1269_v31, %v1672_v50 }
 0x128   : > { %1043 = vst.msk [vmem:[%s1681_s8 + $0x38] sm:$0xff] %vm633_vm0, %v1011_v34 }
 0x129   : > { %1041 = vst.msk [vmem:[%s1681_s8 + $0x28] sm:$0xff] %vm633_vm0, %v1009_v35  ;;  %v1270_v36 = vpop.f32.mrb[24].mxu0  ;;  %v1362_v39 = vpop.f32.mrb[24].mxu1 }
 0x12a   : > { %v918_v41 = vadd.f32 %v1362_v39, %v757_v38  ;;  %v1271_v42 = vpop.f32.mrb[25].mxu0  ;;  %v909_v43 = vpop.f32.mrb[25].mxu1 }
 0x12b   : > { %v1272_v46 = vadd.f32 %v1271_v42, %v1270_v36  ;;  %v910_v47 = vadd.f32 %v909_v43, %v749_v40  ;;  %v1273_v48 = vpop.f32.mrb[26].mxu0  ;;  %v1363_v51 = vpop.f32.mrb[26].mxu1 }
 0x12c   : > { %v1014_v53 = vmax.f32 %v918_v41, 0.0  ;;  %v921_v54 = vadd.f32 %v1363_v51, %v760_v45  ;;  %v1274_v55 = vpop.f32.mrb[27].mxu0  ;;  %v912_v56 = vpop.f32.mrb[27].mxu1 }
 0x12d   : > { %v1012_v57 = vmax.f32 %v910_v47, 0.0  ;;  %v1275_v58 = vadd.f32 %v1274_v55, %v1273_v48  ;;  %v913_v59 = vadd.f32 %v912_v56, %v752_v52  ;;  %v765_v0 = vadd.f32 %v1272_v46, %v1672_v50 }
 0x12e   : > { %1046 = vst.msk [vmem:[%s1681_s8 + $0x50] sm:$0xff] %vm633_vm0, %v1014_v53  ;;  %v1015_v60 = vmax.f32 %v921_v54, 0.0 }
 0x12f   : > { %1044 = vst.msk [vmem:[%s1681_s8 + $0x40] sm:$0xff] %vm633_vm0, %v1012_v57  ;;  %v1013_v61 = vmax.f32 %v913_v59, 0.0  ;;  %v768_v7 = vadd.f32 %v1275_v58, %v1672_v50  ;;  %v821_v58 = vadd.f32 %v1657_v20, %v1672_v50 }
 0x130   : > { %1047 = vst.msk [vmem:[%s1681_s8 + $0x58] sm:$0xff] %vm633_vm0, %v1015_v60 }
 0x131   : > { %1045 = vst.msk [vmem:[%s1681_s8 + $0x48] sm:$0xff] %vm633_vm0, %v1013_v61  ;;  %v1276_v62 = vpop.f32.mrb[28].mxu0  ;;  %v1366_v63 = vpop.f32.mrb[28].mxu1 }
 0x132   : > { %v1277_v1 = vpop.f32.mrb[29].mxu0  ;;  %v925_v2 = vpop.f32.mrb[29].mxu1 }
 0x133   : > { %v1278_v3 = vadd.f32 %v1277_v1, %v1276_v62  ;;  %v926_v4 = vadd.f32 %v925_v2, %v765_v0  ;;  %v1279_v5 = vpop.f32.mrb[30].mxu0  ;;  %v1367_v6 = vpop.f32.mrb[30].mxu1 }
 0x134   : > { %v1280_v9 = vpop.f32.mrb[31].mxu0  ;;  %v928_v10 = vpop.f32.mrb[31].mxu1 }
 0x135   : > { %v773_v11 = vadd.f32 %v1278_v3, %v1672_v50  ;;  %v1016_v12 = vmax.f32 %v926_v4, 0.0  ;;  %v1281_v14 = vadd.f32 %v1280_v9, %v1279_v5  ;;  %v929_v15 = vadd.f32 %v928_v10, %v768_v7 }
 0x136   : > { %v824_v3 = vadd.f32 %v1659_v25, %v1672_v50  ;;  %v816_v9 = vadd.f32 %v1655_v13, %v1672_v50 }
 0x137   : > { %v934_v16 = vadd.f32 %v1366_v63, %v773_v11  ;;  %1048 = vst.msk [vmem:[%s1681_s8 + $0x60] sm:$0xff] %vm633_vm0, %v1016_v12  ;;  %v776_v17 = vadd.f32 %v1281_v14, %v1672_v50  ;;  %v1017_v18 = vmax.f32 %v929_v15, 0.0  ;;  %v813_v63 = vadd.f32 %v1653_v8, %v1672_v50 }
 0x139   : > { %v1018_v19 = vmax.f32 %v934_v16, 0.0  ;;  %v937_v21 = vadd.f32 %v1367_v6, %v776_v17  ;;  %1049 = vst.msk [vmem:[%s1681_s8 + $0x68] sm:$0xff] %vm633_vm0, %v1017_v18  ;;  %v1282_v22 = vpop.f32.mrb[32].mxu0  ;;  %v1370_v23 = vpop.f32.mrb[32].mxu1 }
 0x13a   : > { %v1283_v24 = vpop.f32.mrb[33].mxu0  ;;  %v941_v26 = vpop.f32.mrb[33].mxu1 }
 0x13b   : > { %1050 = vst.msk [vmem:[%s1681_s8 + $0x70] sm:$0xff] %vm633_vm0, %v1018_v19  ;;  %v1019_v27 = vmax.f32 %v937_v21, 0.0  ;;  %v1284_v28 = vadd.f32 %v1283_v24, %v1282_v22  ;;  %v1285_v29 = vpop.f32.mrb[34].mxu0  ;;  %v1371_v30 = vpop.f32.mrb[34].mxu1  ;;  %v837_v21 = vadd.f32 %v1665_v44, %v1672_v50 }
 0x13c   : > { %v1286_v31 = vpop.f32.mrb[35].mxu0  ;;  %v944_v33 = vpop.f32.mrb[35].mxu1 }
 0x13d   : > { %1051 = vst.msk [vmem:[%s1681_s8 + $0x78] sm:$0xff] %vm633_vm0, %v1019_v27  ;;  %v781_v34 = vadd.f32 %v1284_v28, %v1672_v50  ;;  %v1287_v35 = vadd.f32 %v1286_v31, %v1285_v29  ;;  %v829_v27 = vadd.f32 %v1661_v32, %v1672_v50  ;;  %v840_v31 = vadd.f32 %v1667_v49, %v1672_v50 }
 0x13f   : > { %v942_v38 = vadd.f32 %v941_v26, %v781_v34  ;;  %v784_v36 = vadd.f32 %v1287_v35, %v1672_v50 }
 0x141   : > { %v1020_v39 = vmax.f32 %v942_v38, 0.0  ;;  %v945_v40 = vadd.f32 %v944_v33, %v784_v36  ;;  %v1288_v41 = vpop.f32.mrb[36].mxu0  ;;  %v1730_v42 = vpop.f32.mrb[36].mxu1  ;;  %v832_v36 = vadd.f32 %v1663_v37, %v1672_v50 }
 0x142   : > { %v1289_v43 = vpop.f32.mrb[37].mxu0  ;;  %v957_v45 = vpop.f32.mrb[37].mxu1 }
 0x143   : > { %1052 = vst.msk [vmem:[%s1681_s8 + $0x80] sm:$0xff] %vm633_vm0, %v1020_v39  ;;  %v1021_v46 = vmax.f32 %v945_v40, 0.0  ;;  %v1290_v47 = vadd.f32 %v1289_v43, %v1288_v41  ;;  %v1291_v48 = vpop.f32.mrb[38].mxu0  ;;  %v1734_v51 = vpop.f32.mrb[38].mxu1 }
 0x144   : > { %v1292_v52 = vpop.f32.mrb[39].mxu0  ;;  %v960_v53 = vpop.f32.mrb[39].mxu1 }
 0x145   : > { %1053 = vst.msk [vmem:[%s1681_s8 + $0x88] sm:$0xff] %vm633_vm0, %v1021_v46  ;;  %v789_v54 = vadd.f32 %v1290_v47, %v1672_v50  ;;  %v1293_v55 = vadd.f32 %v1292_v52, %v1291_v48 }
 0x147   : > { %v950_v56 = vadd.f32 %v1370_v23, %v789_v54  ;;  %v792_v57 = vadd.f32 %v1293_v55, %v1672_v50 }
 0x149   : > { %v1022_v59 = vmax.f32 %v950_v56, 0.0  ;;  %v953_v60 = vadd.f32 %v1371_v30, %v792_v57  ;;  %v1294_v61 = vpop.f32.mrb[40].mxu0  ;;  %v1378_v62 = vpop.f32.mrb[40].mxu1 }
 0x14a   : > { %v982_v0 = vadd.f32 %v1378_v62, %v821_v58  ;;  %v1295_v1 = vpop.f32.mrb[41].mxu0  ;;  %v973_v2 = vpop.f32.mrb[41].mxu1 }
 0x14b   : > { %1054 = vst.msk [vmem:[%s1681_s8 + $0x90] sm:$0xff] %vm633_vm0, %v1022_v59  ;;  %v1023_v4 = vmax.f32 %v953_v60, 0.0  ;;  %v1296_v5 = vadd.f32 %v1295_v1, %v1294_v61  ;;  %v974_v20 = vadd.f32 %v973_v2, %v813_v63  ;;  %v1297_v6 = vpop.f32.mrb[42].mxu0  ;;  %v1379_v7 = vpop.f32.mrb[42].mxu1 }
 0x14c   : > { %v1030_v8 = vmax.f32 %v982_v0, 0.0  ;;  %v985_v10 = vadd.f32 %v1379_v7, %v824_v3  ;;  %v1298_v11 = vpop.f32.mrb[43].mxu0  ;;  %v976_v12 = vpop.f32.mrb[43].mxu1 }
 0x14d   : > { %1055 = vst.msk [vmem:[%s1681_s8 + $0x98] sm:$0xff] %vm633_vm0, %v1023_v4  ;;  %v797_v25 = vadd.f32 %v1296_v5, %v1672_v50  ;;  %v1028_v14 = vmax.f32 %v974_v20, 0.0  ;;  %v1299_v15 = vadd.f32 %v1298_v11, %v1297_v6  ;;  %v977_v16 = vadd.f32 %v976_v12, %v816_v9 }
 0x14e   : > { %1062 = vst.msk [vmem:[%s1681_s8 + $0xd0] sm:$0xff] %vm633_vm0, %v1030_v8  ;;  %v1031_v17 = vmax.f32 %v985_v10, 0.0 }
 0x14f   : > { %v958_v18 = vadd.f32 %v957_v45, %v797_v25  ;;  %1060 = vst.msk [vmem:[%s1681_s8 + $0xc0] sm:$0xff] %vm633_vm0, %v1028_v14  ;;  %v800_v13 = vadd.f32 %v1299_v15, %v1672_v50  ;;  %v1029_v19 = vmax.f32 %v977_v16, 0.0 }
 0x150   : > { %1063 = vst.msk [vmem:[%s1681_s8 + $0xd8] sm:$0xff] %vm633_vm0, %v1031_v17 }
 0x151   : > { %v1024_v22 = vmax.f32 %v958_v18, 0.0  ;;  %v961_v23 = vadd.f32 %v960_v53, %v800_v13  ;;  %1061 = vst.msk [vmem:[%s1681_s8 + $0xc8] sm:$0xff] %vm633_vm0, %v1029_v19  ;;  %v1300_v24 = vpop.f32.mrb[44].mxu0  ;;  %v1382_v26 = vpop.f32.mrb[44].mxu1 }
 0x152   : > { %v998_v28 = vadd.f32 %v1382_v26, %v837_v21  ;;  %v1301_v29 = vpop.f32.mrb[45].mxu0  ;;  %v989_v30 = vpop.f32.mrb[45].mxu1 }
 0x153   : > { %1056 = vst.msk [vmem:[%s1681_s8 + $0xa0] sm:$0xff] %vm633_vm0, %v1024_v22  ;;  %v1025_v44 = vmax.f32 %v961_v23, 0.0  ;;  %v1302_v33 = vadd.f32 %v1301_v29, %v1300_v24  ;;  %v990_v34 = vadd.f32 %v989_v30, %v829_v27  ;;  %v1303_v35 = vpop.f32.mrb[46].mxu0  ;;  %v1383_v38 = vpop.f32.mrb[46].mxu1 }
 0x154   : > { %v1034_v32 = vmax.f32 %v998_v28, 0.0  ;;  %v1001_v39 = vadd.f32 %v1383_v38, %v840_v31  ;;  %v1304_v40 = vpop.f32.mrb[47].mxu0  ;;  %v992_v41 = vpop.f32.mrb[47].mxu1 }
 0x155   : > { %1057 = vst.msk [vmem:[%s1681_s8 + $0xa8] sm:$0xff] %vm633_vm0, %v1025_v44  ;;  %v805_v49 = vadd.f32 %v1302_v33, %v1672_v50  ;;  %v1032_v43 = vmax.f32 %v990_v34, 0.0  ;;  %v1305_v45 = vadd.f32 %v1304_v40, %v1303_v35  ;;  %v993_v46 = vadd.f32 %v992_v41, %v832_v36 }
 0x156   : > { %1066 = vst.msk [vmem:[%s1681_s8 + $0xf0] sm:$0xff] %vm633_vm0, %v1034_v32  ;;  %v1035_v47 = vmax.f32 %v1001_v39, 0.0 }
 0x157   : > { %v966_v37 = vadd.f32 %v1730_v42, %v805_v49  ;;  %1064 = vst.msk [vmem:[%s1681_s8 + $0xe0] sm:$0xff] %vm633_vm0, %v1032_v43  ;;  %v808_v48 = vadd.f32 %v1305_v45, %v1672_v50  ;;  %v1033_v52 = vmax.f32 %v993_v46, 0.0 }
 0x158   : > { %1067 = vst.msk [vmem:[%s1681_s8 + $0xf8] sm:$0xff] %vm633_vm0, %v1035_v47 }
 0x159   : > { %v1026_v53 = vmax.f32 %v966_v37, 0.0  ;;  %v969_v54 = vadd.f32 %v1734_v51, %v808_v48  ;;  %1065 = vst.msk [vmem:[%s1681_s8 + $0xe8] sm:$0xff] %vm633_vm0, %v1033_v52 }
 0x15b   : > { %1058 = vst.msk [vmem:[%s1681_s8 + $0xb0] sm:$0xff] %vm633_vm0, %v1026_v53  ;;  %v1027_v55 = vmax.f32 %v969_v54, 0.0 }
 0x15d   : > { %1059 = vst.msk [vmem:[%s1681_s8 + $0xb8] sm:$0xff] %vm633_vm0, %v1027_v55 }
 0x15e PF: > { %s13_s12 = sadd.s32 1, %s1497_s12  }
 0x15f   : > { %p10_p4 = scmp.ge.s32.totalorder %s13_s12, 4  }
 0x161   :  { %12 = sbr.rel (!%p10_p4) target bundleno = 1 (0x1), region = 62 }

// kernel: feature_fusor_forward.21
= control target key start
LH: loop header
LB: loop body
LE: loop exit
PB: predicated region body
PF: predicated region fallthrough
CT: control target
= control target key end

     0   :  { %s766_s12 = smov 0   ;;  %s930_s0 = inlined_call_operand.vmem [shape: bf16[512,32], index: 0, kind: input, shape index: {}]   ;;  %s931_s1 = inlined_call_operand.vmem [shape: bf16[32,32], index: 1, kind: input, shape index: {}]   ;;  %s932_s2 = inlined_call_operand.vmem [shape: f32[1,32], index: 2, kind: input, shape index: {}]   ;;  %s933_s3 = inlined_call_operand.vmem [shape: f32[512,32], index: 3, kind: output, shape index: {}]  }
   0x1 LB: > { %s608_s13 = sadd.s32 4294967295, %s744_s12   ;;  %p612_p0 = scmp.ge.s32.totalorder %s744_s12, 1  ;;  %s744_s12 = sphi %s766_s12, %s13_s12  }
   0x2   : > { %p138_p1 = scmp.lt.s32.totalorder %s744_s12, 3 }
   0x4   : > { %p139_p2 = pnand %p612_p0, %p138_p1 }
   0x5   : > { %v720_v0 = vld [vmem:[%s931_s1] sm:$0xff] (!%p139_p2)   ;;  %s613_s16 = sshll.u32 (!%p139_p2), %s608_s13, 5  ;;  %v721_v1 = vld [vmem:[%s931_s1 + $0x8] sm:$0xff] (!%p139_p2)   ;;  %vm310_vm0 = vcmask (!%p139_p2), 261120  }
   0x6   : > { %142 = sbr.rel (%p139_p2) target bundleno = 261 (0x105), region = 32  ;;  %p163_p3 = scmp.lt.s32.totalorder (!%p139_p2), %s613_s16, 63  ;;  %672 = vmatprep.subr.bf16.mxu0 (!%p139_p2), %v720_v0  ;;  %708 = vmatprep.subr.bf16.mxu1 (!%p139_p2), %v720_v0  ;;  %v824_v18 = vld [vmem:[%s932_s2] ss:$0 sm:$0xff] (!%p139_p2) }
   0x7   : > { %673 = vmatpush3.bf16.msra.mxu0 (!%p139_p2), %v720_v0  ;;  %710 = vmatpush3.bf16.msra.mxu1 (!%p139_p2), %v720_v0 }
   0x8   : > { %674 = vmatprep.subr.bf16.mxu0 (!%p139_p2), %v721_v1  ;;  %709 = vmatprep.subr.bf16.mxu1 (!%p139_p2), %v721_v1 }
   0xb   : > { %675 = vmatpush3.bf16.msra.mxu0 (!%p139_p2), %v721_v1  ;;  %711 = vmatpush3.bf16.msra.mxu1 (!%p139_p2), %v721_v1 }
   0xd   : > { %s935_s16 = smov (!%p163_p3, %s613_s16), 63 }
   0xe   : > { %s614_s19 = sshll.u32 %s935_s16, 2  ;;  %s616_s23 = sshll.u32 %s935_s16, 3 }
   0xf   : > { %s786_s22 = scalar_lea.vmem %s930_s0, %s614_s19  ;;  %s829_s28 = scalar_lea.vmem %s933_s3, %s616_s23 }
  0x10   : > { %v722_v2 = vld [vmem:[%s786_s22] sm:$0xff]   ;;  %v724_v4 = vld [vmem:[%s786_s22 + $0x8] sm:$0xff]   ;;  %v726_v6 = vld [vmem:[%s786_s22 + $0x10] sm:$0xff]  }
  0x11   : > { %v723_v3 = vld [vmem:[%s786_s22 + $0x40] sm:$0xff]   ;;  %676 = vmatprep.mubr.msk.bf16.mxu0 %vm310_vm0, %v722_v2  ;;  %v725_v5 = vld [vmem:[%s786_s22 + $0x48] sm:$0xff]   ;;  %v727_v7 = vld [vmem:[%s786_s22 + $0x50] sm:$0xff]  }
  0x12   : > { %692 = vmatprep.mubr.msk.bf16.mxu1 %vm310_vm0, %v723_v3  ;;  %677 = vmatmul.mubr.msk.bf16.vlgmr.msra.gmra.mrb[0].mxu0 %vm310_vm0, %v724_v4  ;;  %v728_v8 = vld [vmem:[%s786_s22 + $0x18] sm:$0xff]   ;;  %v730_v10 = vld [vmem:[%s786_s22 + $0x20] sm:$0xff]   ;;  %v732_v12 = vld [vmem:[%s786_s22 + $0x28] sm:$0xff]  }
  0x13   : > { %693 = vmatmul.mubr.msk.bf16.vlgmr.msra.gmra.mrb[0].mxu1 %vm310_vm0, %v725_v5  ;;  %680 = vmatprep.mubr.msk.bf16.mxu0 %vm310_vm0, %v726_v6  ;;  %v729_v9 = vld [vmem:[%s786_s22 + $0x58] sm:$0xff]   ;;  %v731_v11 = vld [vmem:[%s786_s22 + $0x60] sm:$0xff]   ;;  %v733_v13 = vld [vmem:[%s786_s22 + $0x68] sm:$0xff]  }
  0x14   : > { %696 = vmatprep.mubr.msk.bf16.mxu1 %vm310_vm0, %v727_v7  ;;  %v734_v14 = vld [vmem:[%s786_s22 + $0x30] sm:$0xff]   ;;  %v736_v16 = vld [vmem:[%s786_s22 + $0x38] sm:$0xff]  }
  0x15   : > { %v735_v15 = vld [vmem:[%s786_s22 + $0x70] sm:$0xff]   ;;  %v737_v17 = vld [vmem:[%s786_s22 + $0x78] sm:$0xff]  }
  0x1a   : > { %681 = vmatmul.mubr.msk.bf16.gmra.mrb[4].mxu0 %vm310_vm0, %v728_v8 }
  0x1b   : > { %697 = vmatmul.mubr.msk.bf16.gmra.mrb[4].mxu1 %vm310_vm0, %v729_v9  ;;  %684 = vmatprep.mubr.msk.bf16.mxu0 %vm310_vm0, %v730_v10 }
  0x1c   : > { %700 = vmatprep.mubr.msk.bf16.mxu1 %vm310_vm0, %v731_v11 }
  0x22   : > { %685 = vmatmul.mubr.msk.bf16.gmra.mrb[8].mxu0 %vm310_vm0, %v732_v12 }
  0x23   : > { %701 = vmatmul.mubr.msk.bf16.gmra.mrb[8].mxu1 %vm310_vm0, %v733_v13  ;;  %688 = vmatprep.mubr.msk.bf16.mxu0 %vm310_vm0, %v734_v14 }
  0x24   : > { %704 = vmatprep.mubr.msk.bf16.mxu1 %vm310_vm0, %v735_v15 }
  0x2a   : > { %689 = vmatmul.mubr.msk.bf16.gmra.mrb[12].mxu0 %vm310_vm0, %v736_v16 }
  0x2b   : > { %705 = vmatmul.mubr.msk.bf16.gmra.mrb[12].mxu1 %vm310_vm0, %v737_v17 }
  0xe5   : > { %v678_v19 = vpop.f32.mrb[0].mxu0 }
  0xe6   : > { %v402_v20 = vadd.f32 %v678_v19, %v824_v18  ;;  %v694_v21 = vpop.f32.mrb[0].mxu1  ;;  %v393_v22 = vpop.f32.mrb[1].mxu0 }
  0xe7   : > { %v466_v23 = vadd.f32 %v694_v21, %v824_v18  ;;  %v394_v24 = vadd.f32 %v824_v18, %v393_v22  ;;  %v457_v25 = vpop.f32.mrb[1].mxu1  ;;  %v679_v26 = vpop.f32.mrb[2].mxu0 }
  0xe8   : > { %522 = vst.msk [vmem:[%s829_s28 + $0x10] sm:$0xff] %vm310_vm0, %v402_v20  ;;  %v458_v27 = vadd.f32 %v824_v18, %v457_v25  ;;  %v405_v28 = vadd.f32 %v679_v26, %v824_v18  ;;  %v695_v29 = vpop.f32.mrb[2].mxu1  ;;  %v396_v30 = vpop.f32.mrb[3].mxu0 }
  0xe9   : > { %538 = vst.msk [vmem:[%s829_s28 + $0x90] sm:$0xff] %vm310_vm0, %v466_v23  ;;  %520 = vst.msk [vmem:[%s829_s28] sm:$0xff] %vm310_vm0, %v394_v24  ;;  %v469_v31 = vadd.f32 %v695_v29, %v824_v18  ;;  %v397_v32 = vadd.f32 %v824_v18, %v396_v30  ;;  %v460_v33 = vpop.f32.mrb[3].mxu1 }
  0xea   : > { %536 = vst.msk [vmem:[%s829_s28 + $0x80] sm:$0xff] %vm310_vm0, %v458_v27  ;;  %523 = vst.msk [vmem:[%s829_s28 + $0x18] sm:$0xff] %vm310_vm0, %v405_v28  ;;  %v461_v34 = vadd.f32 %v824_v18, %v460_v33 }
  0xeb   : > { %539 = vst.msk [vmem:[%s829_s28 + $0x98] sm:$0xff] %vm310_vm0, %v469_v31  ;;  %521 = vst.msk [vmem:[%s829_s28 + $0x8] sm:$0xff] %vm310_vm0, %v397_v32 }
  0xec   : > { %537 = vst.msk [vmem:[%s829_s28 + $0x88] sm:$0xff] %vm310_vm0, %v461_v34 }
  0xed   : > { %v682_v35 = vpop.f32.mrb[4].mxu0 }
  0xee   : > { %v418_v36 = vadd.f32 %v682_v35, %v824_v18  ;;  %v698_v37 = vpop.f32.mrb[4].mxu1  ;;  %v409_v38 = vpop.f32.mrb[5].mxu0 }
  0xef   : > { %v482_v39 = vadd.f32 %v698_v37, %v824_v18  ;;  %v410_v40 = vadd.f32 %v824_v18, %v409_v38  ;;  %v473_v41 = vpop.f32.mrb[5].mxu1  ;;  %v683_v42 = vpop.f32.mrb[6].mxu0 }
  0xf0   : > { %526 = vst.msk [vmem:[%s829_s28 + $0x30] sm:$0xff] %vm310_vm0, %v418_v36  ;;  %v474_v43 = vadd.f32 %v824_v18, %v473_v41  ;;  %v421_v44 = vadd.f32 %v683_v42, %v824_v18  ;;  %v699_v45 = vpop.f32.mrb[6].mxu1  ;;  %v412_v46 = vpop.f32.mrb[7].mxu0 }
  0xf1   : > { %542 = vst.msk [vmem:[%s829_s28 + $0xb0] sm:$0xff] %vm310_vm0, %v482_v39  ;;  %524 = vst.msk [vmem:[%s829_s28 + $0x20] sm:$0xff] %vm310_vm0, %v410_v40  ;;  %v485_v47 = vadd.f32 %v699_v45, %v824_v18  ;;  %v413_v48 = vadd.f32 %v824_v18, %v412_v46  ;;  %v476_v49 = vpop.f32.mrb[7].mxu1 }
  0xf2   : > { %540 = vst.msk [vmem:[%s829_s28 + $0xa0] sm:$0xff] %vm310_vm0, %v474_v43  ;;  %527 = vst.msk [vmem:[%s829_s28 + $0x38] sm:$0xff] %vm310_vm0, %v421_v44  ;;  %v477_v50 = vadd.f32 %v824_v18, %v476_v49 }
  0xf3   : > { %543 = vst.msk [vmem:[%s829_s28 + $0xb8] sm:$0xff] %vm310_vm0, %v485_v47  ;;  %525 = vst.msk [vmem:[%s829_s28 + $0x28] sm:$0xff] %vm310_vm0, %v413_v48 }
  0xf4   : > { %541 = vst.msk [vmem:[%s829_s28 + $0xa8] sm:$0xff] %vm310_vm0, %v477_v50 }
  0xf5   : > { %v686_v51 = vpop.f32.mrb[8].mxu0 }
  0xf6   : > { %v434_v52 = vadd.f32 %v686_v51, %v824_v18  ;;  %v702_v53 = vpop.f32.mrb[8].mxu1  ;;  %v425_v54 = vpop.f32.mrb[9].mxu0 }
  0xf7   : > { %v498_v55 = vadd.f32 %v702_v53, %v824_v18  ;;  %v426_v56 = vadd.f32 %v824_v18, %v425_v54  ;;  %v489_v57 = vpop.f32.mrb[9].mxu1  ;;  %v687_v58 = vpop.f32.mrb[10].mxu0 }
  0xf8   : > { %530 = vst.msk [vmem:[%s829_s28 + $0x50] sm:$0xff] %vm310_vm0, %v434_v52  ;;  %v490_v59 = vadd.f32 %v824_v18, %v489_v57  ;;  %v437_v60 = vadd.f32 %v687_v58, %v824_v18  ;;  %v703_v61 = vpop.f32.mrb[10].mxu1  ;;  %v428_v62 = vpop.f32.mrb[11].mxu0 }
  0xf9   : > { %546 = vst.msk [vmem:[%s829_s28 + $0xd0] sm:$0xff] %vm310_vm0, %v498_v55  ;;  %528 = vst.msk [vmem:[%s829_s28 + $0x40] sm:$0xff] %vm310_vm0, %v426_v56  ;;  %v501_v63 = vadd.f32 %v703_v61, %v824_v18  ;;  %v429_v0 = vadd.f32 %v824_v18, %v428_v62  ;;  %v492_v1 = vpop.f32.mrb[11].mxu1 }
  0xfa   : > { %544 = vst.msk [vmem:[%s829_s28 + $0xc0] sm:$0xff] %vm310_vm0, %v490_v59  ;;  %531 = vst.msk [vmem:[%s829_s28 + $0x58] sm:$0xff] %vm310_vm0, %v437_v60  ;;  %v493_v2 = vadd.f32 %v824_v18, %v492_v1 }
  0xfb   : > { %547 = vst.msk [vmem:[%s829_s28 + $0xd8] sm:$0xff] %vm310_vm0, %v501_v63  ;;  %529 = vst.msk [vmem:[%s829_s28 + $0x48] sm:$0xff] %vm310_vm0, %v429_v0 }
  0xfc   : > { %545 = vst.msk [vmem:[%s829_s28 + $0xc8] sm:$0xff] %vm310_vm0, %v493_v2 }
  0xfd   : > { %v690_v3 = vpop.f32.mrb[12].mxu0 }
  0xfe   : > { %v450_v4 = vadd.f32 %v690_v3, %v824_v18  ;;  %v706_v5 = vpop.f32.mrb[12].mxu1  ;;  %v441_v6 = vpop.f32.mrb[13].mxu0 }
  0xff   : > { %v514_v7 = vadd.f32 %v706_v5, %v824_v18  ;;  %v442_v8 = vadd.f32 %v824_v18, %v441_v6  ;;  %v505_v9 = vpop.f32.mrb[13].mxu1  ;;  %v691_v10 = vpop.f32.mrb[14].mxu0 }
 0x100   : > { %534 = vst.msk [vmem:[%s829_s28 + $0x70] sm:$0xff] %vm310_vm0, %v450_v4  ;;  %v506_v11 = vadd.f32 %v824_v18, %v505_v9  ;;  %v453_v12 = vadd.f32 %v691_v10, %v824_v18  ;;  %v707_v13 = vpop.f32.mrb[14].mxu1  ;;  %v444_v14 = vpop.f32.mrb[15].mxu0 }
 0x101   : > { %550 = vst.msk [vmem:[%s829_s28 + $0xf0] sm:$0xff] %vm310_vm0, %v514_v7  ;;  %532 = vst.msk [vmem:[%s829_s28 + $0x60] sm:$0xff] %vm310_vm0, %v442_v8  ;;  %v517_v15 = vadd.f32 %v707_v13, %v824_v18  ;;  %v445_v16 = vadd.f32 %v824_v18, %v444_v14  ;;  %v508_v17 = vpop.f32.mrb[15].mxu1 }
 0x102   : > { %548 = vst.msk [vmem:[%s829_s28 + $0xe0] sm:$0xff] %vm310_vm0, %v506_v11  ;;  %535 = vst.msk [vmem:[%s829_s28 + $0x78] sm:$0xff] %vm310_vm0, %v453_v12  ;;  %v509_v19 = vadd.f32 %v824_v18, %v508_v17 }
 0x103   : > { %551 = vst.msk [vmem:[%s829_s28 + $0xf8] sm:$0xff] %vm310_vm0, %v517_v15  ;;  %533 = vst.msk [vmem:[%s829_s28 + $0x68] sm:$0xff] %vm310_vm0, %v445_v16 }
 0x104   : > { %549 = vst.msk [vmem:[%s829_s28 + $0xe8] sm:$0xff] %vm310_vm0, %v509_v19 }
 0x105 PF: > { %s13_s12 = sadd.s32 1, %s744_s12  }
 0x106   : > { %p10_p4 = scmp.ge.s32.totalorder %s13_s12, 4  }
 0x108   :  { %12 = sbr.rel (!%p10_p4) target bundleno = 1 (0x1), region = 62 }

</bundles_post_ra>
